<compile_context>
chip_gen: v7x
topology: tpu7x:2x2x1
jax: 0.10.0
libtpu: 0.0.40
codegen_flags: <defaults>
</compile_context>

<pallas_src>
import jax
import jax.numpy as jnp
from jax import lax
from jax.experimental import pallas as pl
from jax.experimental.pallas import tpu as pltpu

# ----- small synthetic config consistent with the module -----
B = 2            # batch_size
N = 8            # n_nodes (graph / source length)
E = 32           # emb_dim == num_directions * encoder_size (memory bank size)
H = 32           # decoder_size
V = 32           # vocab_size
MAX_OOV = 8      # max_num_oov
V_EXT = V + MAX_OOV
T = 4            # max target length
ENC_LAYERS = 2
DEC_LAYERS = 1
LANE = 128       # lane padding for the packed per-step output row
BN = B * N       # flattened node count

PAD, UNK, BOS, EOS, SEP = 0, 1, 2, 3, 4


# ---------------------------------------------------------------------------
# Fused kernel: encoder prologue + T unrolled decoder steps, one invocation
# ---------------------------------------------------------------------------
def fused_kernel(
        # per-step tensors [T, B, ...]
        yemb_ref, yvocab_ref, cmaskbd_ref, genex_ref, copex_ref,
        # encoder inputs (pre-masked / block-diagonalized in the wrapper)
        embn_ref, adjbd_ref, nmaskf_ref, pool_ref, amaskbd_ref, onehot_ref,
        # weights (merged in prepare_params)
        wg_ref, bg_ref, wbr_ref, bbr_ref, wrhs_ref, brhs_ref,
        wihx_ref, bihx_ref, whh_ref, bhh_ref, wattn_ref, whq_ref,
        bp_ref, b1_ref, w2_ref, b2_ref,
        # outputs
        slab_ref, hout_ref, encout_ref):
    f32 = jnp.float32
    Tk = yemb_ref.shape[0]
    VE = onehot_ref.shape[1]          # V + max_num_oov
    MO = VE - V

    def mm(a, w):
        return jnp.dot(a, w, preferred_element_type=f32)

    # ---------------- encoder prologue (runs once) ---------------------------
    nmaskf = nmaskf_ref[...]                              # [BN,1]
    adjbd = adjbd_ref[...]                                # [2BN,BN] normalized
    h_flat = embn_ref[...]                                # [BN,E]  pre-masked
    for l in range(ENC_LAYERS):
        agg = mm(adjbd, h_flat)                           # [2BN,E] (src | ret)
        cat = jnp.concatenate([h_flat, agg[0:BN], agg[BN:2 * BN]], axis=-1)
        h_flat = jnp.maximum(mm(cat, wg_ref[l]) + bg_ref[l], 0.0) * nmaskf

    fs = mm(pool_ref[...], h_flat)                        # masked mean pool [B,E]
    encout_ref[...] = fs
    h = mm(fs, wbr_ref[...]) + bbr_ref[...]               # bridge == 'dense' [B,H]

    # fused memory-bank RHS: [mem | mem@W1_c | mem@Wp_c | mem_proj(+b) | onehot]
    extra = mm(h_flat, wrhs_ref[...]) + brhs_ref[...]     # [BN, H+1+E]
    rhs = jnp.concatenate([h_flat, extra, onehot_ref[...]], axis=-1)   # [BN, 2E+H+1+VE]

    # fused h_new projection: [W_attn @ mem^T | W1_h | Wp_h]  -> [H, BN+H+1]
    scoremat = lax.dot_general(wattn_ref[...], h_flat, (((1,), (1,)), ((), ())),
                               preferred_element_type=f32)             # [H, BN]
    hproj = jnp.concatenate([scoremat, whq_ref[...]], axis=-1)

    amaskbd = amaskbd_ref[...]                            # [B,BN] block-diag node mask
    wihx, bihx = wihx_ref[...], bihx_ref[...]
    whh, bhh = whh_ref[...], bhh_ref[...]
    bp, b1 = bp_ref[...], b1_ref[...]
    w2, b2 = w2_ref[...], b2_ref[...]

    ydec = jnp.zeros((B, E), f32)                         # y_decoded is None at t=0

    # ---------------- unrolled decoder steps ---------------------------------
    for t in range(Tk):
        x = yemb_ref[t] + ydec                            # [B,E]

        # GRU cell (PyTorch GRUCell semantics); Wp_x folded as extra column
        gx = mm(x, wihx) + bihx                           # [B,3H+1] (r|z|n|x@Wp_x)
        gh = mm(h, whh) + bhh                             # [B,3H]
        r = jax.nn.sigmoid(gx[:, 0:H] + gh[:, 0:H])
        z = jax.nn.sigmoid(gx[:, H:2 * H] + gh[:, H:2 * H])
        nn_ = jnp.tanh(gx[:, 2 * H:3 * H] + r * gh[:, 2 * H:3 * H])
        h_new = (1.0 - z) * nn_ + z * h                   # [B,H]
        x_wpx = gx[:, 3 * H:3 * H + 1]                    # [B,1]

        # fused projection of h_new: scores (block-diag), h@W1_h, h@Wp_h
        hp = mm(h_new, hproj)                             # [B, BN+H+1]
        scores = hp[:, 0:BN]
        h_w1h = hp[:, BN:BN + H]
        h_wph = hp[:, BN + H:BN + H + 1]

        # masked softmax over the block-diagonal node axis
        scores = jnp.where(amaskbd > 0.0, scores, -1e9)
        scores = scores - jnp.max(scores, axis=-1, keepdims=True)
        es = jnp.exp(scores) * amaskbd
        attn_bd = es * pl.reciprocal(
            jnp.sum(es, axis=-1, keepdims=True) + 1e-9, approx=True)   # [B,BN]

        # obtain_y_decoded normalization (block-diag layout)
        cm = cmaskbd_ref[t]                               # [B,BN]
        masked = attn_bd * cm
        normed = masked * pl.reciprocal(
            jnp.sum(masked, axis=-1, keepdims=True) + 1e-9, approx=True)

        # ONE fused MXU pass: ctx, ctx@W1_c, ctx@Wp_c, copy-dist, y_copy
        lhs = jnp.concatenate([attn_bd, normed], axis=0)  # [2B, BN]
        fused = mm(lhs, rhs)                              # [2B, 2E+H+1+VE]
        ctx_w1c = fused[0:B, E:E + H]
        ctx_wpc = fused[0:B, E + H:E + H + 1]
        copy_dist = fused[0:B, E + H + 1 + E:E + H + 1 + E + VE]       # [B,VE]
        y_copy = fused[B:2 * B, E + H + 1:E + H + 1 + E]               # [B,E]

        p_gen = jax.nn.sigmoid(ctx_wpc + h_wph + x_wpx + bp)           # [B,1]

        # vocab distribution
        hidden = jnp.tanh(h_w1h + ctx_w1c + b1)                        # [B,H]
        logits = mm(hidden, w2) + b2                                   # [B,V]
        logits = logits - jnp.max(logits, axis=-1, keepdims=True)
        ev = jnp.exp(logits)
        vocab = ev * pl.reciprocal(jnp.sum(ev, axis=-1, keepdims=True), approx=True)
        vocab_pad = jnp.concatenate([vocab, jnp.zeros((B, MO), f32)], axis=-1)
        final = p_gen * vocab_pad + (1.0 - p_gen) * copy_dist          # [B,VE]

        # lane-dense packed row: [final_dist | attn | zero pad] -> [B,128]
        attn_small = jnp.concatenate(
            [attn_bd[b:b + 1, b * N:(b + 1) * N] for b in range(B)], axis=0)
        row = jnp.concatenate(
            [final, attn_small, jnp.zeros((B, LANE - VE - N), f32)], axis=-1)
        for b in range(B):
            slab_ref[pl.ds(b * Tk + t, 1), :] = row[b:b + 1, :]

        # obtain_y_decoded mixing (gen_exclusive overwrites copy_exclusive)
        y_vocab = yvocab_ref[t]                                        # [B,E]
        mix = p_gen * y_vocab + (1.0 - p_gen) * y_copy
        gen_ex = genex_ref[t] > 0.5
        copy_ex = copex_ref[t] > 0.5
        ydec = jnp.where(gen_ex, y_vocab, jnp.where(copy_ex, y_copy, mix))
        h = h_new

    hout_ref[...] = h                                     # written once, after loop


# ---------------------------------------------------------------------------
# Parameters (deterministic, uniform(-0.1, 0.1) as in init_weights)
# ---------------------------------------------------------------------------
def init_params(key):
    keys = iter(jax.random.split(key, 32))
    u = lambda shape: jax.random.uniform(next(keys), shape, jnp.float32, -0.1, 0.1)
    p = {}
    p['enc_emb'] = u((V, E))
    p['dec_emb'] = u((V, E))
    p['W_self'] = u((ENC_LAYERS, E, E))
    p['W_src'] = u((ENC_LAYERS, E, E))
    p['W_ret'] = u((ENC_LAYERS, E, E))
    p['b_gcn'] = u((ENC_LAYERS, 1, E))
    p['W_bridge'] = u((E, H))
    p['b_bridge'] = u((1, H))
    p['W_proj_src'] = u((E, E))          # decoder.proj_src_enc_to_dec
    p['b_proj_src'] = u((1, E))
    p['W_ih'] = u((3, E, H))             # GRU input weights (r, z, n)
    p['b_ih'] = u((3, 1, H))
    p['W_hh'] = u((3, H, H))
    p['b_hh'] = u((3, 1, H))
    p['W_attn'] = u((H, E))              # 'general' attention
    p['Wp_c'] = u((E, 1))                # p_gen linear pieces
    p['Wp_h'] = u((H, 1))
    p['Wp_x'] = u((E, 1))
    p['b_p'] = u((1, 1))
    p['W1_h'] = u((H, H))                # vocab_dist_linear_1 (split)
    p['W1_c'] = u((E, H))
    p['b1'] = u((1, H))
    p['W2'] = u((H, V))                  # vocab_dist_linear_2 (transposed)
    p['b2'] = u((1, V))
    p['W_projv'] = u((H, E))             # decoder.proj_dec_out_to_dec
    p['b_projv'] = u((1, E))
    return p


def prepare_params(p):
    """Params-only preprocessing (done once, outside the per-call jit path)."""
    f32 = jnp.float32
    mp = {}
    mp['enc_emb'] = p['enc_emb']
    mp['dec_emb'] = p['dec_emb']
    mp['vocab_emb_proj'] = jnp.dot(p['W2'].T, p['W_projv']) + p['b_projv']       # [V,E]
    mp['W_gcn'] = jnp.concatenate([p['W_self'], p['W_src'], p['W_ret']], axis=1)  # [L,3E,E]
    mp['b_gcn'] = p['b_gcn']
    mp['W_bridge'] = p['W_bridge']
    mp['b_bridge'] = p['b_bridge']
    # fused memory-bank RHS projection: [W1_c | Wp_c | W_proj_src], bias only on proj
    mp['W_rhs'] = jnp.concatenate([p['W1_c'], p['Wp_c'], p['W_proj_src']], axis=1)
    mp['b_rhs'] = jnp.concatenate([jnp.zeros((1, H + 1), f32), p['b_proj_src']], axis=1)
    # GRU input weights with Wp_x as an extra output column
    mp['W_ihx'] = jnp.concatenate(
        [p['W_ih'][0], p['W_ih'][1], p['W_ih'][2], p['Wp_x']], axis=1)            # [E,3H+1]
    mp['b_ihx'] = jnp.concatenate(
        [p['b_ih'][0], p['b_ih'][1], p['b_ih'][2], jnp.zeros((1, 1), f32)], axis=1)
    mp['W_hh'] = jnp.concatenate([p['W_hh'][0], p['W_hh'][1], p['W_hh'][2]], axis=1)
    mp['b_hh'] = jnp.concatenate([p['b_hh'][0], p['b_hh'][1], p['b_hh'][2]], axis=1)
    mp['W_attn'] = p['W_attn']
    mp['W_hq'] = jnp.concatenate([p['W1_h'], p['Wp_h']], axis=1)                  # [H,H+1]
    mp['b_p'] = p['b_p']
    mp['b1'] = p['b1']
    mp['W2'] = p['W2']
    mp['b2'] = p['b2']
    return mp


def _const_spec(shape):
    nd = len(shape)
    return pl.BlockSpec(shape, lambda i, nd=nd: (0,) * nd)


# ---------------------------------------------------------------------------
# Full Seq2SeqModel.forward — ONE pallas_call
# ---------------------------------------------------------------------------
def seq2seq_forward(mp, nodes, nodes_oov, nodes_mask, src_adj, ret_adj,
                    src_mask, ret_mask, trg, trg_oov, max_num_oov):
    f32 = jnp.float32
    T_ = trg.shape[1]
    v_ext = V + max_num_oov

    nodes_i = nodes.astype(jnp.int32)
    nodes_oov_i = nodes_oov.astype(jnp.int32)
    trg_i = trg.astype(jnp.int32)
    trg_oov_i = trg_oov.astype(jnp.int32)
    nmask = nodes_mask.astype(f32)
    eyeB = jnp.eye(B, dtype=f32)

    # node embeddings, pre-masked and flattened
    embn = (jnp.take(mp['enc_emb'], nodes_i, axis=0) * nmask[:, :, None]).reshape(BN, E)

    # adjacency: mask rows, row-normalize, block-diagonalize; stack src over ret
    def _norm_bd(adj, rmask):
        a = adj.astype(f32) * rmask.astype(f32)[:, :, None]
        a = a / (jnp.sum(a, axis=-1, keepdims=True) + 1e-9)
        return (eyeB[:, None, :, None] * a[:, :, None, :]).reshape(BN, BN)
    adjbd = jnp.concatenate(
        [_norm_bd(src_adj, src_mask), _norm_bd(ret_adj, ret_mask)], axis=0)   # [2BN,BN]

    cnt = jnp.sum(nmask, axis=-1, keepdims=True) + 1e-9
    pool = (eyeB[:, :, None] * (nmask / cnt)[None, :, :]).reshape(B, BN)      # mean pool
    amaskbd = (eyeB[:, :, None] * nmask[None, :, :]).reshape(B, BN)           # attn mask
    nmask_flat = nmask.reshape(BN, 1)
    onehot = (nodes_oov_i.reshape(BN)[:, None]
              == jnp.arange(v_ext, dtype=jnp.int32)[None, :]).astype(f32)     # [BN,V_EXT]

    # per-step decoder tensors, built directly in [T, B, ...]
    y_tok = jnp.concatenate([jnp.full((1, B), BOS, jnp.int32), trg_i.T[:T_ - 1]], axis=0)
    yemb_all = jnp.take(mp['dec_emb'], y_tok, axis=0)                         # [T,B,E]
    y_unk = jnp.where(trg_oov_i >= V, UNK, trg_oov_i).T                       # [T,B]
    yvocab_all = jnp.take(mp['vocab_emb_proj'], y_unk, axis=0)                # [T,B,E]

    cmask = (nodes_oov_i[:, None, :] == trg_oov_i[:, :, None]).astype(f32)    # [B,T,N]
    cmask_tb = cmask.transpose(1, 0, 2)                                       # [T,B,N]
    cmaskbd_all = (eyeB[None, :, :, None] * cmask_tb[:, :, None, :]).reshape(T_, B, BN)
    copex_all = (trg_oov_i >= V).astype(f32).T[:, :, None]                    # [T,B,1]
    genex_all = ((jnp.sum(cmask, axis=-1) == 0) | (trg_oov_i == PAD)
                 | (trg_oov_i == UNK) | (trg_oov_i == EOS)).astype(f32).T[:, :, None]

    args = (yemb_all, yvocab_all, cmaskbd_all, genex_all, copex_all,
            embn, adjbd, nmask_flat, pool, amaskbd, onehot,
            mp['W_gcn'], mp['b_gcn'], mp['W_bridge'], mp['b_bridge'],
            mp['W_rhs'], mp['b_rhs'], mp['W_ihx'], mp['b_ihx'],
            mp['W_hh'], mp['b_hh'], mp['W_attn'], mp['W_hq'],
            mp['b_p'], mp['b1'], mp['W2'], mp['b2'])

    out_shapes = (jax.ShapeDtypeStruct((B * T_, LANE), f32),   # packed [dist|attn] rows
                  jax.ShapeDtypeStruct((B, H), f32),           # final decoder state
                  jax.ShapeDtypeStruct((B, E), f32))           # encoder final state

    slab, h_fin, enc_fin = pl.pallas_call(
        fused_kernel,
        out_shape=out_shapes,
        grid=(1,),
        in_specs=[_const_spec(a.shape) for a in args],
        out_specs=tuple(_const_spec(s.shape) for s in out_shapes),
        compiler_params=pltpu.CompilerParams(dimension_semantics=("arbitrary",)),
    )(*args)

    slab = slab.reshape(B, T_, LANE)                           # free (row-major) reshape
    decoder_dist_all = slab[:, :, :v_ext]                      # [B,T,V+max_oov]
    attention_dist_all = slab[:, :, v_ext:v_ext + N]           # [B,T,N]
    h_t_next = jnp.broadcast_to(h_fin[None], (DEC_LAYERS, B, H))
    return decoder_dist_all, h_t_next, attention_dist_all, enc_fin


if __name__ == "__main__":
    key = jax.random.PRNGKey(0)
    k_param, k1, k2, k3, k4, k5 = jax.random.split(key, 6)
    params = init_params(k_param)
    mparams = prepare_params(params)

    nodes = jax.random.randint(k1, (B, N), 5, V)
    nodes_oov = nodes.at[:, -2:].set(jax.random.randint(k2, (B, 2), V, V + MAX_OOV))
    nodes_mask = jnp.ones((B, N), jnp.float32).at[1, -1].set(0.0)
    src_mask = nodes_mask
    ret_mask = nodes_mask
    src_adj = (jax.random.uniform(k3, (B, N, N)) > 0.5).astype(jnp.float32)
    ret_adj = (jax.random.uniform(k4, (B, N, N)) > 0.5).astype(jnp.float32)
    trg = jax.random.randint(k5, (B, T), 5, V)
    trg_oov = trg.at[0, 1].set(V + 1)

    fwd = jax.jit(seq2seq_forward, static_argnums=(10,))
    dist_all, h_next, attn_all, enc_final = fwd(
        mparams, nodes, nodes_oov, nodes_mask, src_adj, ret_adj,
        src_mask, ret_mask, trg, trg_oov, MAX_OOV)
    jax.block_until_ready((dist_all, h_next, attn_all, enc_final))

    assert dist_all.shape == (B, T, V + MAX_OOV)
    assert attn_all.shape == (B, T, N)
    assert h_next.shape == (DEC_LAYERS, B, H)
    assert enc_final.shape == (B, E)
    assert bool(jnp.all(jnp.isfinite(dist_all)))
    assert bool(jnp.all(dist_all >= 0.0))
    print("KERNEL_OK")
</pallas_src>

<mosaic_0001>
module attributes {stable_mosaic.version = 11 : i64} {
  func.func @fused_kernel(%arg0: i32, %arg1: memref<4x2x32xf32, #tpu.memory_space<vmem>>, %arg2: memref<4x2x32xf32, #tpu.memory_space<vmem>>, %arg3: memref<4x2x16xf32, #tpu.memory_space<vmem>>, %arg4: memref<4x2x1xf32, #tpu.memory_space<vmem>>, %arg5: memref<4x2x1xf32, #tpu.memory_space<vmem>>, %arg6: memref<16x32xf32, #tpu.memory_space<vmem>>, %arg7: memref<32x16xf32, #tpu.memory_space<vmem>>, %arg8: memref<16x1xf32, #tpu.memory_space<vmem>>, %arg9: memref<2x16xf32, #tpu.memory_space<vmem>>, %arg10: memref<2x16xf32, #tpu.memory_space<vmem>>, %arg11: memref<16x40xf32, #tpu.memory_space<vmem>>, %arg12: memref<2x96x32xf32, #tpu.memory_space<vmem>>, %arg13: memref<2x1x32xf32, #tpu.memory_space<vmem>>, %arg14: memref<32x32xf32, #tpu.memory_space<vmem>>, %arg15: memref<1x32xf32, #tpu.memory_space<vmem>>, %arg16: memref<32x65xf32, #tpu.memory_space<vmem>>, %arg17: memref<1x65xf32, #tpu.memory_space<vmem>>, %arg18: memref<32x97xf32, #tpu.memory_space<vmem>>, %arg19: memref<1x97xf32, #tpu.memory_space<vmem>>, %arg20: memref<32x96xf32, #tpu.memory_space<vmem>>, %arg21: memref<1x96xf32, #tpu.memory_space<vmem>>, %arg22: memref<32x32xf32, #tpu.memory_space<vmem>>, %arg23: memref<32x33xf32, #tpu.memory_space<vmem>>, %arg24: memref<1x1xf32, #tpu.memory_space<vmem>>, %arg25: memref<1x32xf32, #tpu.memory_space<vmem>>, %arg26: memref<32x32xf32, #tpu.memory_space<vmem>>, %arg27: memref<1x32xf32, #tpu.memory_space<vmem>>, %arg28: memref<8x128xf32, #tpu.memory_space<vmem>>, %arg29: memref<2x32xf32, #tpu.memory_space<vmem>>, %arg30: memref<2x32xf32, #tpu.memory_space<vmem>>) attributes {dimension_semantics = [#tpu.dimension_semantics<arbitrary>], iteration_bounds = array<i64: 1>, scalar_prefetch = 0 : i64, scratch_operands = 0 : i64, tpu.core_type = #tpu.core_type<tc>, window_params = [{pipeline_mode = #tpu.pipeline_mode<synchronous>, transform_indices = @transform_0, window_bounds = array<i64: 4, 2, 32>}, {pipeline_mode = #tpu.pipeline_mode<synchronous>, transform_indices = @transform_1, window_bounds = array<i64: 4, 2, 32>}, {pipeline_mode = #tpu.pipeline_mode<synchronous>, transform_indices = @transform_2, window_bounds = array<i64: 4, 2, 16>}, {pipeline_mode = #tpu.pipeline_mode<synchronous>, transform_indices = @transform_3, window_bounds = array<i64: 4, 2, 1>}, {pipeline_mode = #tpu.pipeline_mode<synchronous>, transform_indices = @transform_4, window_bounds = array<i64: 4, 2, 1>}, {pipeline_mode = #tpu.pipeline_mode<synchronous>, transform_indices = @transform_5, window_bounds = array<i64: 16, 32>}, {pipeline_mode = #tpu.pipeline_mode<synchronous>, transform_indices = @transform_6, window_bounds = array<i64: 32, 16>}, {pipeline_mode = #tpu.pipeline_mode<synchronous>, transform_indices = @transform_7, window_bounds = array<i64: 16, 1>}, {pipeline_mode = #tpu.pipeline_mode<synchronous>, transform_indices = @transform_8, window_bounds = array<i64: 2, 16>}, {pipeline_mode = #tpu.pipeline_mode<synchronous>, transform_indices = @transform_9, window_bounds = array<i64: 2, 16>}, {pipeline_mode = #tpu.pipeline_mode<synchronous>, transform_indices = @transform_10, window_bounds = array<i64: 16, 40>}, {pipeline_mode = #tpu.pipeline_mode<synchronous>, transform_indices = @transform_11, window_bounds = array<i64: 2, 96, 32>}, {pipeline_mode = #tpu.pipeline_mode<synchronous>, transform_indices = @transform_12, window_bounds = array<i64: 2, 1, 32>}, {pipeline_mode = #tpu.pipeline_mode<synchronous>, transform_indices = @transform_13, window_bounds = array<i64: 32, 32>}, {pipeline_mode = #tpu.pipeline_mode<synchronous>, transform_indices = @transform_14, window_bounds = array<i64: 1, 32>}, {pipeline_mode = #tpu.pipeline_mode<synchronous>, transform_indices = @transform_15, window_bounds = array<i64: 32, 65>}, {pipeline_mode = #tpu.pipeline_mode<synchronous>, transform_indices = @transform_16, window_bounds = array<i64: 1, 65>}, {pipeline_mode = #tpu.pipeline_mode<synchronous>, transform_indices = @transform_17, window_bounds = array<i64: 32, 97>}, {pipeline_mode = #tpu.pipeline_mode<synchronous>, transform_indices = @transform_18, window_bounds = array<i64: 1, 97>}, {pipeline_mode = #tpu.pipeline_mode<synchronous>, transform_indices = @transform_19, window_bounds = array<i64: 32, 96>}, {pipeline_mode = #tpu.pipeline_mode<synchronous>, transform_indices = @transform_20, window_bounds = array<i64: 1, 96>}, {pipeline_mode = #tpu.pipeline_mode<synchronous>, transform_indices = @transform_21, window_bounds = array<i64: 32, 32>}, {pipeline_mode = #tpu.pipeline_mode<synchronous>, transform_indices = @transform_22, window_bounds = array<i64: 32, 33>}, {pipeline_mode = #tpu.pipeline_mode<synchronous>, transform_indices = @transform_23, window_bounds = array<i64: 1, 1>}, {pipeline_mode = #tpu.pipeline_mode<synchronous>, transform_indices = @transform_24, window_bounds = array<i64: 1, 32>}, {pipeline_mode = #tpu.pipeline_mode<synchronous>, transform_indices = @transform_25, window_bounds = array<i64: 32, 32>}, {pipeline_mode = #tpu.pipeline_mode<synchronous>, transform_indices = @transform_26, window_bounds = array<i64: 1, 32>}, {pipeline_mode = #tpu.pipeline_mode<synchronous>, transform_indices = @transform_27, window_bounds = array<i64: 8, 128>}, {pipeline_mode = #tpu.pipeline_mode<synchronous>, transform_indices = @transform_28, window_bounds = array<i64: 2, 32>}, {pipeline_mode = #tpu.pipeline_mode<synchronous>, transform_indices = @transform_29, window_bounds = array<i64: 2, 32>}]} {
    %c0 = arith.constant 0 : index
    %c0_0 = arith.constant 0 : index
    %0 = vector.load %arg8[%c0, %c0_0] : memref<16x1xf32, #tpu.memory_space<vmem>>, vector<16x1xf32>
    %c0_1 = arith.constant 0 : index
    %c0_2 = arith.constant 0 : index
    %1 = vector.load %arg7[%c0_1, %c0_2] : memref<32x16xf32, #tpu.memory_space<vmem>>, vector<32x16xf32>
    %c0_3 = arith.constant 0 : index
    %c0_4 = arith.constant 0 : index
    %2 = vector.load %arg6[%c0_3, %c0_4] : memref<16x32xf32, #tpu.memory_space<vmem>>, vector<16x32xf32>
    %cst = arith.constant dense<0.000000e+00> : vector<32x32xf32>
    %3 = tpu.matmul %1, %2, %cst {dimension_numbers = #tpu.dot_dimension_numbers<[1], [0], [0], [1], [0, 0, 1, 1], [], []>} : vector<32x16xf32>, vector<16x32xf32>, vector<32x32xf32> -> vector<32x32xf32>
    %4 = vector.extract_strided_slice %3 {offsets = [0, 0], sizes = [16, 32], strides = [1, 1]} : vector<32x32xf32> to vector<16x32xf32>
    %5 = vector.extract_strided_slice %3 {offsets = [16, 0], sizes = [16, 32], strides = [1, 1]} : vector<32x32xf32> to vector<16x32xf32>
    %6 = tpu.concatenate %2, %4, %5 in 1 : vector<16x32xf32>, vector<16x32xf32>, vector<16x32xf32> -> vector<16x96xf32>
    %c0_5 = arith.constant 0 : index
    %c0_6 = arith.constant 0 : index
    %c0_7 = arith.constant 0 : index
    %7 = vector.load %arg12[%c0_5, %c0_6, %c0_7] : memref<2x96x32xf32, #tpu.memory_space<vmem>>, vector<1x96x32xf32>
    %8 = vector.shape_cast %7 : vector<1x96x32xf32> to vector<96x32xf32>
    %cst_8 = arith.constant dense<0.000000e+00> : vector<16x32xf32>
    %9 = tpu.matmul %6, %8, %cst_8 {dimension_numbers = #tpu.dot_dimension_numbers<[1], [0], [0], [1], [0, 0, 1, 1], [], []>} : vector<16x96xf32>, vector<96x32xf32>, vector<16x32xf32> -> vector<16x32xf32>
    %c0_9 = arith.constant 0 : index
    %c0_10 = arith.constant 0 : index
    %c0_11 = arith.constant 0 : index
    %10 = vector.load %arg13[%c0_9, %c0_10, %c0_11] : memref<2x1x32xf32, #tpu.memory_space<vmem>>, vector<1x1x32xf32>
    %11 = vector.shape_cast %10 : vector<1x1x32xf32> to vector<1x32xf32>
    %12 = vector.broadcast %11 : vector<1x32xf32> to vector<16x32xf32>
    %13 = arith.addf %9, %12 : vector<16x32xf32>
    %cst_12 = arith.constant 0.000000e+00 : f32
    %14 = vector.broadcast %cst_12 : f32 to vector<16x32xf32>
    %15 = arith.maximumf %13, %14 : vector<16x32xf32>
    %16 = vector.broadcast %0 : vector<16x1xf32> to vector<16x32xf32>
    %17 = arith.mulf %15, %16 : vector<16x32xf32>
    %cst_13 = arith.constant dense<0.000000e+00> : vector<32x32xf32>
    %18 = tpu.matmul %1, %17, %cst_13 {dimension_numbers = #tpu.dot_dimension_numbers<[1], [0], [0], [1], [0, 0, 1, 1], [], []>} : vector<32x16xf32>, vector<16x32xf32>, vector<32x32xf32> -> vector<32x32xf32>
    %19 = vector.extract_strided_slice %18 {offsets = [0, 0], sizes = [16, 32], strides = [1, 1]} : vector<32x32xf32> to vector<16x32xf32>
    %20 = vector.extract_strided_slice %18 {offsets = [16, 0], sizes = [16, 32], strides = [1, 1]} : vector<32x32xf32> to vector<16x32xf32>
    %21 = tpu.concatenate %17, %19, %20 in 1 : vector<16x32xf32>, vector<16x32xf32>, vector<16x32xf32> -> vector<16x96xf32>
    %c1 = arith.constant 1 : index
    %c0_14 = arith.constant 0 : index
    %c0_15 = arith.constant 0 : index
    %22 = vector.load %arg12[%c1, %c0_14, %c0_15] : memref<2x96x32xf32, #tpu.memory_space<vmem>>, vector<1x96x32xf32>
    %23 = vector.shape_cast %22 : vector<1x96x32xf32> to vector<96x32xf32>
    %cst_16 = arith.constant dense<0.000000e+00> : vector<16x32xf32>
    %24 = tpu.matmul %21, %23, %cst_16 {dimension_numbers = #tpu.dot_dimension_numbers<[1], [0], [0], [1], [0, 0, 1, 1], [], []>} : vector<16x96xf32>, vector<96x32xf32>, vector<16x32xf32> -> vector<16x32xf32>
    %c1_17 = arith.constant 1 : index
    %c0_18 = arith.constant 0 : index
    %c0_19 = arith.constant 0 : index
    %25 = vector.load %arg13[%c1_17, %c0_18, %c0_19] : memref<2x1x32xf32, #tpu.memory_space<vmem>>, vector<1x1x32xf32>
    %26 = vector.shape_cast %25 : vector<1x1x32xf32> to vector<1x32xf32>
    %27 = vector.broadcast %26 : vector<1x32xf32> to vector<16x32xf32>
    %28 = arith.addf %24, %27 : vector<16x32xf32>
    %cst_20 = arith.constant 0.000000e+00 : f32
    %29 = vector.broadcast %cst_20 : f32 to vector<16x32xf32>
    %30 = arith.maximumf %28, %29 : vector<16x32xf32>
    %31 = vector.broadcast %0 : vector<16x1xf32> to vector<16x32xf32>
    %32 = arith.mulf %30, %31 : vector<16x32xf32>
    %c0_21 = arith.constant 0 : index
    %c0_22 = arith.constant 0 : index
    %33 = vector.load %arg9[%c0_21, %c0_22] : memref<2x16xf32, #tpu.memory_space<vmem>>, vector<2x16xf32>
    %cst_23 = arith.constant dense<0.000000e+00> : vector<2x32xf32>
    %34 = tpu.matmul %33, %32, %cst_23 {dimension_numbers = #tpu.dot_dimension_numbers<[1], [0], [0], [1], [0, 0, 1, 1], [], []>} : vector<2x16xf32>, vector<16x32xf32>, vector<2x32xf32> -> vector<2x32xf32>
    %c0_24 = arith.constant 0 : index
    %c0_25 = arith.constant 0 : index
    %35 = vector.load %arg30[%c0_24, %c0_25] : memref<2x32xf32, #tpu.memory_space<vmem>>, vector<2x32xf32>
    tpu.vector_store %arg30[%c0_24, %c0_25], %34 {strides = array<i32>} : memref<2x32xf32, #tpu.memory_space<vmem>>, vector<2x32xf32>,
    %c0_26 = arith.constant 0 : index
    %c0_27 = arith.constant 0 : index
    %36 = vector.load %arg14[%c0_26, %c0_27] : memref<32x32xf32, #tpu.memory_space<vmem>>, vector<32x32xf32>
    %cst_28 = arith.constant dense<0.000000e+00> : vector<2x32xf32>
    %37 = tpu.matmul %34, %36, %cst_28 {dimension_numbers = #tpu.dot_dimension_numbers<[1], [0], [0], [1], [0, 0, 1, 1], [], []>} : vector<2x32xf32>, vector<32x32xf32>, vector<2x32xf32> -> vector<2x32xf32>
    %c0_29 = arith.constant 0 : index
    %c0_30 = arith.constant 0 : index
    %38 = vector.load %arg15[%c0_29, %c0_30] : memref<1x32xf32, #tpu.memory_space<vmem>>, vector<1x32xf32>
    %39 = vector.broadcast %38 : vector<1x32xf32> to vector<2x32xf32>
    %40 = arith.addf %37, %39 : vector<2x32xf32>
    %c0_31 = arith.constant 0 : index
    %c0_32 = arith.constant 0 : index
    %41 = vector.load %arg16[%c0_31, %c0_32] : memref<32x65xf32, #tpu.memory_space<vmem>>, vector<32x65xf32>
    %cst_33 = arith.constant dense<0.000000e+00> : vector<16x65xf32>
    %42 = tpu.matmul %32, %41, %cst_33 {dimension_numbers = #tpu.dot_dimension_numbers<[1], [0], [0], [1], [0, 0, 1, 1], [], []>} : vector<16x32xf32>, vector<32x65xf32>, vector<16x65xf32> -> vector<16x65xf32>
    %c0_34 = arith.constant 0 : index
    %c0_35 = arith.constant 0 : index
    %43 = vector.load %arg17[%c0_34, %c0_35] : memref<1x65xf32, #tpu.memory_space<vmem>>, vector<1x65xf32>
    %44 = vector.broadcast %43 : vector<1x65xf32> to vector<16x65xf32>
    %45 = arith.addf %42, %44 : vector<16x65xf32>
    %c0_36 = arith.constant 0 : index
    %c0_37 = arith.constant 0 : index
    %46 = vector.load %arg11[%c0_36, %c0_37] : memref<16x40xf32, #tpu.memory_space<vmem>>, vector<16x40xf32>
    %47 = tpu.concatenate %32, %45, %46 in 1 : vector<16x32xf32>, vector<16x65xf32>, vector<16x40xf32> -> vector<16x137xf32>
    %c0_38 = arith.constant 0 : index
    %c0_39 = arith.constant 0 : index
    %48 = vector.load %arg22[%c0_38, %c0_39] : memref<32x32xf32, #tpu.memory_space<vmem>>, vector<32x32xf32>
    %cst_40 = arith.constant dense<0.000000e+00> : vector<32x16xf32>
    %49 = tpu.matmul %48, %32, %cst_40 {dimension_numbers = #tpu.dot_dimension_numbers<[1], [1], [0], [0], [0, 0, 1, 0], [], []>} : vector<32x32xf32>, vector<16x32xf32>, vector<32x16xf32> -> vector<32x16xf32>
    %c0_41 = arith.constant 0 : index
    %c0_42 = arith.constant 0 : index
    %50 = vector.load %arg23[%c0_41, %c0_42] : memref<32x33xf32, #tpu.memory_space<vmem>>, vector<32x33xf32>
    %51 = tpu.concatenate %49, %50 in 1 : vector<32x16xf32>, vector<32x33xf32> -> vector<32x49xf32>
    %c0_43 = arith.constant 0 : index
    %c0_44 = arith.constant 0 : index
    %52 = vector.load %arg10[%c0_43, %c0_44] : memref<2x16xf32, #tpu.memory_space<vmem>>, vector<2x16xf32>
    %c0_45 = arith.constant 0 : index
    %c0_46 = arith.constant 0 : index
    %53 = vector.load %arg18[%c0_45, %c0_46] : memref<32x97xf32, #tpu.memory_space<vmem>>, vector<32x97xf32>
    %c0_47 = arith.constant 0 : index
    %c0_48 = arith.constant 0 : index
    %54 = vector.load %arg19[%c0_47, %c0_48] : memref<1x97xf32, #tpu.memory_space<vmem>>, vector<1x97xf32>
    %c0_49 = arith.constant 0 : index
    %c0_50 = arith.constant 0 : index
    %55 = vector.load %arg20[%c0_49, %c0_50] : memref<32x96xf32, #tpu.memory_space<vmem>>, vector<32x96xf32>
    %c0_51 = arith.constant 0 : index
    %c0_52 = arith.constant 0 : index
    %56 = vector.load %arg21[%c0_51, %c0_52] : memref<1x96xf32, #tpu.memory_space<vmem>>, vector<1x96xf32>
    %c0_53 = arith.constant 0 : index
    %c0_54 = arith.constant 0 : index
    %57 = vector.load %arg24[%c0_53, %c0_54] : memref<1x1xf32, #tpu.memory_space<vmem>>, vector<1x1xf32>
    %c0_55 = arith.constant 0 : index
    %c0_56 = arith.constant 0 : index
    %58 = vector.load %arg25[%c0_55, %c0_56] : memref<1x32xf32, #tpu.memory_space<vmem>>, vector<1x32xf32>
    %c0_57 = arith.constant 0 : index
    %c0_58 = arith.constant 0 : index
    %59 = vector.load %arg26[%c0_57, %c0_58] : memref<32x32xf32, #tpu.memory_space<vmem>>, vector<32x32xf32>
    %c0_59 = arith.constant 0 : index
    %c0_60 = arith.constant 0 : index
    %60 = vector.load %arg27[%c0_59, %c0_60] : memref<1x32xf32, #tpu.memory_space<vmem>>, vector<1x32xf32>
    %cst_61 = arith.constant 0.000000e+00 : f32
    %61 = vector.broadcast %cst_61 : f32 to vector<2x32xf32>
    %c0_62 = arith.constant 0 : index
    %c0_63 = arith.constant 0 : index
    %c0_64 = arith.constant 0 : index
    %62 = vector.load %arg1[%c0_62, %c0_63, %c0_64] : memref<4x2x32xf32, #tpu.memory_space<vmem>>, vector<1x2x32xf32>
    %63 = vector.shape_cast %62 : vector<1x2x32xf32> to vector<2x32xf32>
    %64 = arith.addf %63, %61 : vector<2x32xf32>
    %cst_65 = arith.constant dense<0.000000e+00> : vector<2x97xf32>
    %65 = tpu.matmul %64, %53, %cst_65 {dimension_numbers = #tpu.dot_dimension_numbers<[1], [0], [0], [1], [0, 0, 1, 1], [], []>} : vector<2x32xf32>, vector<32x97xf32>, vector<2x97xf32> -> vector<2x97xf32>
    %66 = vector.broadcast %54 : vector<1x97xf32> to vector<2x97xf32>
    %67 = arith.addf %65, %66 : vector<2x97xf32>
    %cst_66 = arith.constant dense<0.000000e+00> : vector<2x96xf32>
    %68 = tpu.matmul %40, %55, %cst_66 {dimension_numbers = #tpu.dot_dimension_numbers<[1], [0], [0], [1], [0, 0, 1, 1], [], []>} : vector<2x32xf32>, vector<32x96xf32>, vector<2x96xf32> -> vector<2x96xf32>
    %69 = vector.broadcast %56 : vector<1x96xf32> to vector<2x96xf32>
    %70 = arith.addf %68, %69 : vector<2x96xf32>
    %71 = vector.extract_strided_slice %67 {offsets = [0, 0], sizes = [2, 32], strides = [1, 1]} : vector<2x97xf32> to vector<2x32xf32>
    %72 = vector.extract_strided_slice %70 {offsets = [0, 0], sizes = [2, 32], strides = [1, 1]} : vector<2x96xf32> to vector<2x32xf32>
    %73 = arith.addf %71, %72 : vector<2x32xf32>
    %74 = arith.negf %73 : vector<2x32xf32>
    %75 = math.exp %74 : vector<2x32xf32>
    %cst_67 = arith.constant 1.000000e+00 : f32
    %76 = vector.broadcast %cst_67 : f32 to vector<2x32xf32>
    %77 = arith.addf %76, %75 : vector<2x32xf32>
    %78 = arith.divf %76, %77 : vector<2x32xf32>
    %79 = vector.extract_strided_slice %67 {offsets = [0, 32], sizes = [2, 32], strides = [1, 1]} : vector<2x97xf32> to vector<2x32xf32>
    %80 = vector.extract_strided_slice %70 {offsets = [0, 32], sizes = [2, 32], strides = [1, 1]} : vector<2x96xf32> to vector<2x32xf32>
    %81 = arith.addf %79, %80 : vector<2x32xf32>
    %82 = arith.negf %81 : vector<2x32xf32>
    %83 = math.exp %82 : vector<2x32xf32>
    %cst_68 = arith.constant 1.000000e+00 : f32
    %84 = vector.broadcast %cst_68 : f32 to vector<2x32xf32>
    %85 = arith.addf %84, %83 : vector<2x32xf32>
    %86 = arith.divf %84, %85 : vector<2x32xf32>
    %87 = vector.extract_strided_slice %67 {offsets = [0, 64], sizes = [2, 32], strides = [1, 1]} : vector<2x97xf32> to vector<2x32xf32>
    %88 = vector.extract_strided_slice %70 {offsets = [0, 64], sizes = [2, 32], strides = [1, 1]} : vector<2x96xf32> to vector<2x32xf32>
    %89 = arith.mulf %78, %88 : vector<2x32xf32>
    %90 = arith.addf %87, %89 : vector<2x32xf32>
    %91 = math.tanh %90 : vector<2x32xf32>
    %cst_69 = arith.constant 1.000000e+00 : f32
    %92 = vector.broadcast %cst_69 : f32 to vector<2x32xf32>
    %93 = arith.subf %92, %86 : vector<2x32xf32>
    %94 = arith.mulf %93, %91 : vector<2x32xf32>
    %95 = arith.mulf %86, %40 : vector<2x32xf32>
    %96 = arith.addf %94, %95 : vector<2x32xf32>
    %97 = vector.extract_strided_slice %67 {offsets = [0, 96], sizes = [2, 1], strides = [1, 1]} : vector<2x97xf32> to vector<2x1xf32>
    %cst_70 = arith.constant dense<0.000000e+00> : vector<2x49xf32>
    %98 = tpu.matmul %96, %51, %cst_70 {dimension_numbers = #tpu.dot_dimension_numbers<[1], [0], [0], [1], [0, 0, 1, 1], [], []>} : vector<2x32xf32>, vector<32x49xf32>, vector<2x49xf32> -> vector<2x49xf32>
    %99 = vector.extract_strided_slice %98 {offsets = [0, 0], sizes = [2, 16], strides = [1, 1]} : vector<2x49xf32> to vector<2x16xf32>
    %100 = vector.extract_strided_slice %98 {offsets = [0, 16], sizes = [2, 32], strides = [1, 1]} : vector<2x49xf32> to vector<2x32xf32>
    %101 = vector.extract_strided_slice %98 {offsets = [0, 48], sizes = [2, 1], strides = [1, 1]} : vector<2x49xf32> to vector<2x1xf32>
    %cst_71 = arith.constant 0.000000e+00 : f32
    %102 = vector.broadcast %cst_71 : f32 to vector<2x16xf32>
    %103 = arith.cmpf ogt, %52, %102 : vector<2x16xf32>
    %cst_72 = arith.constant -1.000000e+09 : f32
    %104 = vector.broadcast %cst_72 : f32 to vector<2x16xf32>
    %105 = arith.select %103, %99, %104 : vector<2x16xi1>, vector<2x16xf32>
    %cst_73 = arith.constant dense<0xFF800000> : vector<2xf32>
    %106 = vector.multi_reduction <maximumf>, %105, %cst_73 [1] : vector<2x16xf32> to vector<2xf32>
    %107 = vector.shape_cast %106 : vector<2xf32> to vector<2x1xf32>
    %108 = vector.broadcast %107 : vector<2x1xf32> to vector<2x16xf32>
    %109 = arith.subf %105, %108 : vector<2x16xf32>
    %110 = math.exp %109 : vector<2x16xf32>
    %111 = arith.mulf %110, %52 : vector<2x16xf32>
    %cst_74 = arith.constant dense<0.000000e+00> : vector<2xf32>
    %112 = vector.multi_reduction <add>, %111, %cst_74 [1] : vector<2x16xf32> to vector<2xf32>
    %113 = vector.shape_cast %112 : vector<2xf32> to vector<2x1xf32>
    %cst_75 = arith.constant 9.99999971E-10 : f32
    %114 = vector.broadcast %cst_75 : f32 to vector<2x1xf32>
    %115 = arith.addf %113, %114 : vector<2x1xf32>
    %116 = tpu.reciprocal %115 {approx = true} : vector<2x1xf32> -> vector<2x1xf32>
    %117 = vector.broadcast %116 : vector<2x1xf32> to vector<2x16xf32>
    %118 = arith.mulf %111, %117 : vector<2x16xf32>
    %c0_76 = arith.constant 0 : index
    %c0_77 = arith.constant 0 : index
    %c0_78 = arith.constant 0 : index
    %119 = vector.load %arg3[%c0_76, %c0_77, %c0_78] : memref<4x2x16xf32, #tpu.memory_space<vmem>>, vector<1x2x16xf32>
    %120 = vector.shape_cast %119 : vector<1x2x16xf32> to vector<2x16xf32>
    %121 = arith.mulf %118, %120 : vector<2x16xf32>
    %cst_79 = arith.constant dense<0.000000e+00> : vector<2xf32>
    %122 = vector.multi_reduction <add>, %121, %cst_79 [1] : vector<2x16xf32> to vector<2xf32>
    %123 = vector.shape_cast %122 : vector<2xf32> to vector<2x1xf32>
    %cst_80 = arith.constant 9.99999971E-10 : f32
    %124 = vector.broadcast %cst_80 : f32 to vector<2x1xf32>
    %125 = arith.addf %123, %124 : vector<2x1xf32>
    %126 = tpu.reciprocal %125 {approx = true} : vector<2x1xf32> -> vector<2x1xf32>
    %127 = vector.broadcast %126 : vector<2x1xf32> to vector<2x16xf32>
    %128 = arith.mulf %121, %127 : vector<2x16xf32>
    %129 = tpu.concatenate %118, %128 in 0 : vector<2x16xf32>, vector<2x16xf32> -> vector<4x16xf32>
    %cst_81 = arith.constant dense<0.000000e+00> : vector<4x137xf32>
    %130 = tpu.matmul %129, %47, %cst_81 {dimension_numbers = #tpu.dot_dimension_numbers<[1], [0], [0], [1], [0, 0, 1, 1], [], []>} : vector<4x16xf32>, vector<16x137xf32>, vector<4x137xf32> -> vector<4x137xf32>
    %131 = vector.extract_strided_slice %130 {offsets = [0, 32], sizes = [2, 32], strides = [1, 1]} : vector<4x137xf32> to vector<2x32xf32>
    %132 = vector.extract_strided_slice %130 {offsets = [0, 64], sizes = [2, 1], strides = [1, 1]} : vector<4x137xf32> to vector<2x1xf32>
    %133 = vector.extract_strided_slice %130 {offsets = [0, 97], sizes = [2, 40], strides = [1, 1]} : vector<4x137xf32> to vector<2x40xf32>
    %134 = vector.extract_strided_slice %130 {offsets = [2, 65], sizes = [2, 32], strides = [1, 1]} : vector<4x137xf32> to vector<2x32xf32>
    %135 = arith.addf %132, %101 : vector<2x1xf32>
    %136 = arith.addf %135, %97 : vector<2x1xf32>
    %137 = vector.broadcast %57 : vector<1x1xf32> to vector<2x1xf32>
    %138 = arith.addf %136, %137 : vector<2x1xf32>
    %139 = arith.negf %138 : vector<2x1xf32>
    %140 = math.exp %139 : vector<2x1xf32>
    %cst_82 = arith.constant 1.000000e+00 : f32
    %141 = vector.broadcast %cst_82 : f32 to vector<2x1xf32>
    %142 = arith.addf %141, %140 : vector<2x1xf32>
    %143 = arith.divf %141, %142 : vector<2x1xf32>
    %144 = arith.addf %100, %131 : vector<2x32xf32>
    %145 = vector.broadcast %58 : vector<1x32xf32> to vector<2x32xf32>
    %146 = arith.addf %144, %145 : vector<2x32xf32>
    %147 = math.tanh %146 : vector<2x32xf32>
    %cst_83 = arith.constant dense<0.000000e+00> : vector<2x32xf32>
    %148 = tpu.matmul %147, %59, %cst_83 {dimension_numbers = #tpu.dot_dimension_numbers<[1], [0], [0], [1], [0, 0, 1, 1], [], []>} : vector<2x32xf32>, vector<32x32xf32>, vector<2x32xf32> -> vector<2x32xf32>
    %149 = vector.broadcast %60 : vector<1x32xf32> to vector<2x32xf32>
    %150 = arith.addf %148, %149 : vector<2x32xf32>
    %cst_84 = arith.constant dense<0xFF800000> : vector<2xf32>
    %151 = vector.multi_reduction <maximumf>, %150, %cst_84 [1] : vector<2x32xf32> to vector<2xf32>
    %152 = vector.shape_cast %151 : vector<2xf32> to vector<2x1xf32>
    %153 = vector.broadcast %152 : vector<2x1xf32> to vector<2x32xf32>
    %154 = arith.subf %150, %153 : vector<2x32xf32>
    %155 = math.exp %154 : vector<2x32xf32>
    %cst_85 = arith.constant dense<0.000000e+00> : vector<2xf32>
    %156 = vector.multi_reduction <add>, %155, %cst_85 [1] : vector<2x32xf32> to vector<2xf32>
    %157 = vector.shape_cast %156 : vector<2xf32> to vector<2x1xf32>
    %158 = tpu.reciprocal %157 {approx = true} : vector<2x1xf32> -> vector<2x1xf32>
    %159 = vector.broadcast %158 : vector<2x1xf32> to vector<2x32xf32>
    %160 = arith.mulf %155, %159 : vector<2x32xf32>
    %cst_86 = arith.constant 0.000000e+00 : f32
    %161 = vector.broadcast %cst_86 : f32 to vector<2x8xf32>
    %162 = tpu.concatenate %160, %161 in 1 : vector<2x32xf32>, vector<2x8xf32> -> vector<2x40xf32>
    %163 = vector.broadcast %143 : vector<2x1xf32> to vector<2x40xf32>
    %164 = arith.mulf %163, %162 : vector<2x40xf32>
    %cst_87 = arith.constant 1.000000e+00 : f32
    %165 = vector.broadcast %cst_87 : f32 to vector<2x1xf32>
    %166 = arith.subf %165, %143 : vector<2x1xf32>
    %167 = vector.broadcast %166 : vector<2x1xf32> to vector<2x40xf32>
    %168 = arith.mulf %167, %133 : vector<2x40xf32>
    %169 = arith.addf %164, %168 : vector<2x40xf32>
    %170 = vector.extract_strided_slice %118 {offsets = [0, 0], sizes = [1, 8], strides = [1, 1]} : vector<2x16xf32> to vector<1x8xf32>
    %171 = vector.extract_strided_slice %118 {offsets = [1, 8], sizes = [1, 8], strides = [1, 1]} : vector<2x16xf32> to vector<1x8xf32>
    %172 = tpu.concatenate %170, %171 in 0 : vector<1x8xf32>, vector<1x8xf32> -> vector<2x8xf32>
    %cst_88 = arith.constant 0.000000e+00 : f32
    %173 = vector.broadcast %cst_88 : f32 to vector<2x80xf32>
    %174 = tpu.concatenate %169, %172, %173 in 1 : vector<2x40xf32>, vector<2x8xf32>, vector<2x80xf32> -> vector<2x128xf32>
    %175 = vector.extract_strided_slice %174 {offsets = [0, 0], sizes = [1, 128], strides = [1, 1]} : vector<2x128xf32> to vector<1x128xf32>
    %c0_89 = arith.constant 0 : index
    %c0_90 = arith.constant 0 : index
    %176 = vector.load %arg28[%c0_89, %c0_90] : memref<8x128xf32, #tpu.memory_space<vmem>>, vector<1x128xf32>
    tpu.vector_store %arg28[%c0_89, %c0_90], %175 {strides = array<i32>} : memref<8x128xf32, #tpu.memory_space<vmem>>, vector<1x128xf32>,
    %177 = vector.extract_strided_slice %174 {offsets = [1, 0], sizes = [1, 128], strides = [1, 1]} : vector<2x128xf32> to vector<1x128xf32>
    %c4 = arith.constant 4 : index
    %c0_91 = arith.constant 0 : index
    %178 = vector.load %arg28[%c4, %c0_91] : memref<8x128xf32, #tpu.memory_space<vmem>>, vector<1x128xf32>
    tpu.vector_store %arg28[%c4, %c0_91], %177 {strides = array<i32>} : memref<8x128xf32, #tpu.memory_space<vmem>>, vector<1x128xf32>,
    %c0_92 = arith.constant 0 : index
    %c0_93 = arith.constant 0 : index
    %c0_94 = arith.constant 0 : index
    %179 = vector.load %arg2[%c0_92, %c0_93, %c0_94] : memref<4x2x32xf32, #tpu.memory_space<vmem>>, vector<1x2x32xf32>
    %180 = vector.shape_cast %179 : vector<1x2x32xf32> to vector<2x32xf32>
    %181 = vector.broadcast %143 : vector<2x1xf32> to vector<2x32xf32>
    %182 = arith.mulf %181, %180 : vector<2x32xf32>
    %cst_95 = arith.constant 1.000000e+00 : f32
    %183 = vector.broadcast %cst_95 : f32 to vector<2x1xf32>
    %184 = arith.subf %183, %143 : vector<2x1xf32>
    %185 = vector.broadcast %184 : vector<2x1xf32> to vector<2x32xf32>
    %186 = arith.mulf %185, %134 : vector<2x32xf32>
    %187 = arith.addf %182, %186 : vector<2x32xf32>
    %c0_96 = arith.constant 0 : index
    %c0_97 = arith.constant 0 : index
    %c0_98 = arith.constant 0 : index
    %188 = vector.load %arg4[%c0_96, %c0_97, %c0_98] : memref<4x2x1xf32, #tpu.memory_space<vmem>>, vector<1x2x1xf32>
    %189 = vector.shape_cast %188 : vector<1x2x1xf32> to vector<2x1xf32>
    %cst_99 = arith.constant 5.000000e-01 : f32
    %190 = vector.broadcast %cst_99 : f32 to vector<2x1xf32>
    %191 = arith.cmpf ogt, %189, %190 : vector<2x1xf32>
    %c0_100 = arith.constant 0 : index
    %c0_101 = arith.constant 0 : index
    %c0_102 = arith.constant 0 : index
    %192 = vector.load %arg5[%c0_100, %c0_101, %c0_102] : memref<4x2x1xf32, #tpu.memory_space<vmem>>, vector<1x2x1xf32>
    %193 = vector.shape_cast %192 : vector<1x2x1xf32> to vector<2x1xf32>
    %cst_103 = arith.constant 5.000000e-01 : f32
    %194 = vector.broadcast %cst_103 : f32 to vector<2x1xf32>
    %195 = arith.cmpf ogt, %193, %194 : vector<2x1xf32>
    %196 = vector.shape_cast %195 : vector<2x1xi1> to vector<2x1xi1>
    %197 = vector.broadcast %196 : vector<2x1xi1> to vector<2x32xi1>
    %198 = arith.select %197, %134, %187 : vector<2x32xi1>, vector<2x32xf32>
    %199 = vector.shape_cast %191 : vector<2x1xi1> to vector<2x1xi1>
    %200 = vector.broadcast %199 : vector<2x1xi1> to vector<2x32xi1>
    %201 = arith.select %200, %180, %198 : vector<2x32xi1>, vector<2x32xf32>
    %c1_104 = arith.constant 1 : index
    %c0_105 = arith.constant 0 : index
    %c0_106 = arith.constant 0 : index
    %202 = vector.load %arg1[%c1_104, %c0_105, %c0_106] : memref<4x2x32xf32, #tpu.memory_space<vmem>>, vector<1x2x32xf32>
    %203 = vector.shape_cast %202 : vector<1x2x32xf32> to vector<2x32xf32>
    %204 = arith.addf %203, %201 : vector<2x32xf32>
    %cst_107 = arith.constant dense<0.000000e+00> : vector<2x97xf32>
    %205 = tpu.matmul %204, %53, %cst_107 {dimension_numbers = #tpu.dot_dimension_numbers<[1], [0], [0], [1], [0, 0, 1, 1], [], []>} : vector<2x32xf32>, vector<32x97xf32>, vector<2x97xf32> -> vector<2x97xf32>
    %206 = vector.broadcast %54 : vector<1x97xf32> to vector<2x97xf32>
    %207 = arith.addf %205, %206 : vector<2x97xf32>
    %cst_108 = arith.constant dense<0.000000e+00> : vector<2x96xf32>
    %208 = tpu.matmul %96, %55, %cst_108 {dimension_numbers = #tpu.dot_dimension_numbers<[1], [0], [0], [1], [0, 0, 1, 1], [], []>} : vector<2x32xf32>, vector<32x96xf32>, vector<2x96xf32> -> vector<2x96xf32>
    %209 = vector.broadcast %56 : vector<1x96xf32> to vector<2x96xf32>
    %210 = arith.addf %208, %209 : vector<2x96xf32>
    %211 = vector.extract_strided_slice %207 {offsets = [0, 0], sizes = [2, 32], strides = [1, 1]} : vector<2x97xf32> to vector<2x32xf32>
    %212 = vector.extract_strided_slice %210 {offsets = [0, 0], sizes = [2, 32], strides = [1, 1]} : vector<2x96xf32> to vector<2x32xf32>
    %213 = arith.addf %211, %212 : vector<2x32xf32>
    %214 = arith.negf %213 : vector<2x32xf32>
    %215 = math.exp %214 : vector<2x32xf32>
    %cst_109 = arith.constant 1.000000e+00 : f32
    %216 = vector.broadcast %cst_109 : f32 to vector<2x32xf32>
    %217 = arith.addf %216, %215 : vector<2x32xf32>
    %218 = arith.divf %216, %217 : vector<2x32xf32>
    %219 = vector.extract_strided_slice %207 {offsets = [0, 32], sizes = [2, 32], strides = [1, 1]} : vector<2x97xf32> to vector<2x32xf32>
    %220 = vector.extract_strided_slice %210 {offsets = [0, 32], sizes = [2, 32], strides = [1, 1]} : vector<2x96xf32> to vector<2x32xf32>
    %221 = arith.addf %219, %220 : vector<2x32xf32>
    %222 = arith.negf %221 : vector<2x32xf32>
    %223 = math.exp %222 : vector<2x32xf32>
    %cst_110 = arith.constant 1.000000e+00 : f32
    %224 = vector.broadcast %cst_110 : f32 to vector<2x32xf32>
    %225 = arith.addf %224, %223 : vector<2x32xf32>
    %226 = arith.divf %224, %225 : vector<2x32xf32>
    %227 = vector.extract_strided_slice %207 {offsets = [0, 64], sizes = [2, 32], strides = [1, 1]} : vector<2x97xf32> to vector<2x32xf32>
    %228 = vector.extract_strided_slice %210 {offsets = [0, 64], sizes = [2, 32], strides = [1, 1]} : vector<2x96xf32> to vector<2x32xf32>
    %229 = arith.mulf %218, %228 : vector<2x32xf32>
    %230 = arith.addf %227, %229 : vector<2x32xf32>
    %231 = math.tanh %230 : vector<2x32xf32>
    %cst_111 = arith.constant 1.000000e+00 : f32
    %232 = vector.broadcast %cst_111 : f32 to vector<2x32xf32>
    %233 = arith.subf %232, %226 : vector<2x32xf32>
    %234 = arith.mulf %233, %231 : vector<2x32xf32>
    %235 = arith.mulf %226, %96 : vector<2x32xf32>
    %236 = arith.addf %234, %235 : vector<2x32xf32>
    %237 = vector.extract_strided_slice %207 {offsets = [0, 96], sizes = [2, 1], strides = [1, 1]} : vector<2x97xf32> to vector<2x1xf32>
    %cst_112 = arith.constant dense<0.000000e+00> : vector<2x49xf32>
    %238 = tpu.matmul %236, %51, %cst_112 {dimension_numbers = #tpu.dot_dimension_numbers<[1], [0], [0], [1], [0, 0, 1, 1], [], []>} : vector<2x32xf32>, vector<32x49xf32>, vector<2x49xf32> -> vector<2x49xf32>
    %239 = vector.extract_strided_slice %238 {offsets = [0, 0], sizes = [2, 16], strides = [1, 1]} : vector<2x49xf32> to vector<2x16xf32>
    %240 = vector.extract_strided_slice %238 {offsets = [0, 16], sizes = [2, 32], strides = [1, 1]} : vector<2x49xf32> to vector<2x32xf32>
    %241 = vector.extract_strided_slice %238 {offsets = [0, 48], sizes = [2, 1], strides = [1, 1]} : vector<2x49xf32> to vector<2x1xf32>
    %cst_113 = arith.constant 0.000000e+00 : f32
    %242 = vector.broadcast %cst_113 : f32 to vector<2x16xf32>
    %243 = arith.cmpf ogt, %52, %242 : vector<2x16xf32>
    %cst_114 = arith.constant -1.000000e+09 : f32
    %244 = vector.broadcast %cst_114 : f32 to vector<2x16xf32>
    %245 = arith.select %243, %239, %244 : vector<2x16xi1>, vector<2x16xf32>
    %cst_115 = arith.constant dense<0xFF800000> : vector<2xf32>
    %246 = vector.multi_reduction <maximumf>, %245, %cst_115 [1] : vector<2x16xf32> to vector<2xf32>
    %247 = vector.shape_cast %246 : vector<2xf32> to vector<2x1xf32>
    %248 = vector.broadcast %247 : vector<2x1xf32> to vector<2x16xf32>
    %249 = arith.subf %245, %248 : vector<2x16xf32>
    %250 = math.exp %249 : vector<2x16xf32>
    %251 = arith.mulf %250, %52 : vector<2x16xf32>
    %cst_116 = arith.constant dense<0.000000e+00> : vector<2xf32>
    %252 = vector.multi_reduction <add>, %251, %cst_116 [1] : vector<2x16xf32> to vector<2xf32>
    %253 = vector.shape_cast %252 : vector<2xf32> to vector<2x1xf32>
    %cst_117 = arith.constant 9.99999971E-10 : f32
    %254 = vector.broadcast %cst_117 : f32 to vector<2x1xf32>
    %255 = arith.addf %253, %254 : vector<2x1xf32>
    %256 = tpu.reciprocal %255 {approx = true} : vector<2x1xf32> -> vector<2x1xf32>
    %257 = vector.broadcast %256 : vector<2x1xf32> to vector<2x16xf32>
    %258 = arith.mulf %251, %257 : vector<2x16xf32>
    %c1_118 = arith.constant 1 : index
    %c0_119 = arith.constant 0 : index
    %c0_120 = arith.constant 0 : index
    %259 = vector.load %arg3[%c1_118, %c0_119, %c0_120] : memref<4x2x16xf32, #tpu.memory_space<vmem>>, vector<1x2x16xf32>
    %260 = vector.shape_cast %259 : vector<1x2x16xf32> to vector<2x16xf32>
    %261 = arith.mulf %258, %260 : vector<2x16xf32>
    %cst_121 = arith.constant dense<0.000000e+00> : vector<2xf32>
    %262 = vector.multi_reduction <add>, %261, %cst_121 [1] : vector<2x16xf32> to vector<2xf32>
    %263 = vector.shape_cast %262 : vector<2xf32> to vector<2x1xf32>
    %cst_122 = arith.constant 9.99999971E-10 : f32
    %264 = vector.broadcast %cst_122 : f32 to vector<2x1xf32>
    %265 = arith.addf %263, %264 : vector<2x1xf32>
    %266 = tpu.reciprocal %265 {approx = true} : vector<2x1xf32> -> vector<2x1xf32>
    %267 = vector.broadcast %266 : vector<2x1xf32> to vector<2x16xf32>
    %268 = arith.mulf %261, %267 : vector<2x16xf32>
    %269 = tpu.concatenate %258, %268 in 0 : vector<2x16xf32>, vector<2x16xf32> -> vector<4x16xf32>
    %cst_123 = arith.constant dense<0.000000e+00> : vector<4x137xf32>
    %270 = tpu.matmul %269, %47, %cst_123 {dimension_numbers = #tpu.dot_dimension_numbers<[1], [0], [0], [1], [0, 0, 1, 1], [], []>} : vector<4x16xf32>, vector<16x137xf32>, vector<4x137xf32> -> vector<4x137xf32>
    %271 = vector.extract_strided_slice %270 {offsets = [0, 32], sizes = [2, 32], strides = [1, 1]} : vector<4x137xf32> to vector<2x32xf32>
    %272 = vector.extract_strided_slice %270 {offsets = [0, 64], sizes = [2, 1], strides = [1, 1]} : vector<4x137xf32> to vector<2x1xf32>
    %273 = vector.extract_strided_slice %270 {offsets = [0, 97], sizes = [2, 40], strides = [1, 1]} : vector<4x137xf32> to vector<2x40xf32>
    %274 = vector.extract_strided_slice %270 {offsets = [2, 65], sizes = [2, 32], strides = [1, 1]} : vector<4x137xf32> to vector<2x32xf32>
    %275 = arith.addf %272, %241 : vector<2x1xf32>
    %276 = arith.addf %275, %237 : vector<2x1xf32>
    %277 = vector.broadcast %57 : vector<1x1xf32> to vector<2x1xf32>
    %278 = arith.addf %276, %277 : vector<2x1xf32>
    %279 = arith.negf %278 : vector<2x1xf32>
    %280 = math.exp %279 : vector<2x1xf32>
    %cst_124 = arith.constant 1.000000e+00 : f32
    %281 = vector.broadcast %cst_124 : f32 to vector<2x1xf32>
    %282 = arith.addf %281, %280 : vector<2x1xf32>
    %283 = arith.divf %281, %282 : vector<2x1xf32>
    %284 = arith.addf %240, %271 : vector<2x32xf32>
    %285 = vector.broadcast %58 : vector<1x32xf32> to vector<2x32xf32>
    %286 = arith.addf %284, %285 : vector<2x32xf32>
    %287 = math.tanh %286 : vector<2x32xf32>
    %cst_125 = arith.constant dense<0.000000e+00> : vector<2x32xf32>
    %288 = tpu.matmul %287, %59, %cst_125 {dimension_numbers = #tpu.dot_dimension_numbers<[1], [0], [0], [1], [0, 0, 1, 1], [], []>} : vector<2x32xf32>, vector<32x32xf32>, vector<2x32xf32> -> vector<2x32xf32>
    %289 = vector.broadcast %60 : vector<1x32xf32> to vector<2x32xf32>
    %290 = arith.addf %288, %289 : vector<2x32xf32>
    %cst_126 = arith.constant dense<0xFF800000> : vector<2xf32>
    %291 = vector.multi_reduction <maximumf>, %290, %cst_126 [1] : vector<2x32xf32> to vector<2xf32>
    %292 = vector.shape_cast %291 : vector<2xf32> to vector<2x1xf32>
    %293 = vector.broadcast %292 : vector<2x1xf32> to vector<2x32xf32>
    %294 = arith.subf %290, %293 : vector<2x32xf32>
    %295 = math.exp %294 : vector<2x32xf32>
    %cst_127 = arith.constant dense<0.000000e+00> : vector<2xf32>
    %296 = vector.multi_reduction <add>, %295, %cst_127 [1] : vector<2x32xf32> to vector<2xf32>
    %297 = vector.shape_cast %296 : vector<2xf32> to vector<2x1xf32>
    %298 = tpu.reciprocal %297 {approx = true} : vector<2x1xf32> -> vector<2x1xf32>
    %299 = vector.broadcast %298 : vector<2x1xf32> to vector<2x32xf32>
    %300 = arith.mulf %295, %299 : vector<2x32xf32>
    %cst_128 = arith.constant 0.000000e+00 : f32
    %301 = vector.broadcast %cst_128 : f32 to vector<2x8xf32>
    %302 = tpu.concatenate %300, %301 in 1 : vector<2x32xf32>, vector<2x8xf32> -> vector<2x40xf32>
    %303 = vector.broadcast %283 : vector<2x1xf32> to vector<2x40xf32>
    %304 = arith.mulf %303, %302 : vector<2x40xf32>
    %cst_129 = arith.constant 1.000000e+00 : f32
    %305 = vector.broadcast %cst_129 : f32 to vector<2x1xf32>
    %306 = arith.subf %305, %283 : vector<2x1xf32>
    %307 = vector.broadcast %306 : vector<2x1xf32> to vector<2x40xf32>
    %308 = arith.mulf %307, %273 : vector<2x40xf32>
    %309 = arith.addf %304, %308 : vector<2x40xf32>
    %310 = vector.extract_strided_slice %258 {offsets = [0, 0], sizes = [1, 8], strides = [1, 1]} : vector<2x16xf32> to vector<1x8xf32>
    %311 = vector.extract_strided_slice %258 {offsets = [1, 8], sizes = [1, 8], strides = [1, 1]} : vector<2x16xf32> to vector<1x8xf32>
    %312 = tpu.concatenate %310, %311 in 0 : vector<1x8xf32>, vector<1x8xf32> -> vector<2x8xf32>
    %cst_130 = arith.constant 0.000000e+00 : f32
    %313 = vector.broadcast %cst_130 : f32 to vector<2x80xf32>
    %314 = tpu.concatenate %309, %312, %313 in 1 : vector<2x40xf32>, vector<2x8xf32>, vector<2x80xf32> -> vector<2x128xf32>
    %315 = vector.extract_strided_slice %314 {offsets = [0, 0], sizes = [1, 128], strides = [1, 1]} : vector<2x128xf32> to vector<1x128xf32>
    %c1_131 = arith.constant 1 : index
    %c0_132 = arith.constant 0 : index
    %316 = vector.load %arg28[%c1_131, %c0_132] : memref<8x128xf32, #tpu.memory_space<vmem>>, vector<1x128xf32>
    tpu.vector_store %arg28[%c1_131, %c0_132], %315 {strides = array<i32>} : memref<8x128xf32, #tpu.memory_space<vmem>>, vector<1x128xf32>,
    %317 = vector.extract_strided_slice %314 {offsets = [1, 0], sizes = [1, 128], strides = [1, 1]} : vector<2x128xf32> to vector<1x128xf32>
    %c5 = arith.constant 5 : index
    %c0_133 = arith.constant 0 : index
    %318 = vector.load %arg28[%c5, %c0_133] : memref<8x128xf32, #tpu.memory_space<vmem>>, vector<1x128xf32>
    tpu.vector_store %arg28[%c5, %c0_133], %317 {strides = array<i32>} : memref<8x128xf32, #tpu.memory_space<vmem>>, vector<1x128xf32>,
    %c1_134 = arith.constant 1 : index
    %c0_135 = arith.constant 0 : index
    %c0_136 = arith.constant 0 : index
    %319 = vector.load %arg2[%c1_134, %c0_135, %c0_136] : memref<4x2x32xf32, #tpu.memory_space<vmem>>, vector<1x2x32xf32>
    %320 = vector.shape_cast %319 : vector<1x2x32xf32> to vector<2x32xf32>
    %321 = vector.broadcast %283 : vector<2x1xf32> to vector<2x32xf32>
    %322 = arith.mulf %321, %320 : vector<2x32xf32>
    %cst_137 = arith.constant 1.000000e+00 : f32
    %323 = vector.broadcast %cst_137 : f32 to vector<2x1xf32>
    %324 = arith.subf %323, %283 : vector<2x1xf32>
    %325 = vector.broadcast %324 : vector<2x1xf32> to vector<2x32xf32>
    %326 = arith.mulf %325, %274 : vector<2x32xf32>
    %327 = arith.addf %322, %326 : vector<2x32xf32>
    %c1_138 = arith.constant 1 : index
    %c0_139 = arith.constant 0 : index
    %c0_140 = arith.constant 0 : index
    %328 = vector.load %arg4[%c1_138, %c0_139, %c0_140] : memref<4x2x1xf32, #tpu.memory_space<vmem>>, vector<1x2x1xf32>
    %329 = vector.shape_cast %328 : vector<1x2x1xf32> to vector<2x1xf32>
    %cst_141 = arith.constant 5.000000e-01 : f32
    %330 = vector.broadcast %cst_141 : f32 to vector<2x1xf32>
    %331 = arith.cmpf ogt, %329, %330 : vector<2x1xf32>
    %c1_142 = arith.constant 1 : index
    %c0_143 = arith.constant 0 : index
    %c0_144 = arith.constant 0 : index
    %332 = vector.load %arg5[%c1_142, %c0_143, %c0_144] : memref<4x2x1xf32, #tpu.memory_space<vmem>>, vector<1x2x1xf32>
    %333 = vector.shape_cast %332 : vector<1x2x1xf32> to vector<2x1xf32>
    %cst_145 = arith.constant 5.000000e-01 : f32
    %334 = vector.broadcast %cst_145 : f32 to vector<2x1xf32>
    %335 = arith.cmpf ogt, %333, %334 : vector<2x1xf32>
    %336 = vector.shape_cast %335 : vector<2x1xi1> to vector<2x1xi1>
    %337 = vector.broadcast %336 : vector<2x1xi1> to vector<2x32xi1>
    %338 = arith.select %337, %274, %327 : vector<2x32xi1>, vector<2x32xf32>
    %339 = vector.shape_cast %331 : vector<2x1xi1> to vector<2x1xi1>
    %340 = vector.broadcast %339 : vector<2x1xi1> to vector<2x32xi1>
    %341 = arith.select %340, %320, %338 : vector<2x32xi1>, vector<2x32xf32>
    %c2 = arith.constant 2 : index
    %c0_146 = arith.constant 0 : index
    %c0_147 = arith.constant 0 : index
    %342 = vector.load %arg1[%c2, %c0_146, %c0_147] : memref<4x2x32xf32, #tpu.memory_space<vmem>>, vector<1x2x32xf32>
    %343 = vector.shape_cast %342 : vector<1x2x32xf32> to vector<2x32xf32>
    %344 = arith.addf %343, %341 : vector<2x32xf32>
    %cst_148 = arith.constant dense<0.000000e+00> : vector<2x97xf32>
    %345 = tpu.matmul %344, %53, %cst_148 {dimension_numbers = #tpu.dot_dimension_numbers<[1], [0], [0], [1], [0, 0, 1, 1], [], []>} : vector<2x32xf32>, vector<32x97xf32>, vector<2x97xf32> -> vector<2x97xf32>
    %346 = vector.broadcast %54 : vector<1x97xf32> to vector<2x97xf32>
    %347 = arith.addf %345, %346 : vector<2x97xf32>
    %cst_149 = arith.constant dense<0.000000e+00> : vector<2x96xf32>
    %348 = tpu.matmul %236, %55, %cst_149 {dimension_numbers = #tpu.dot_dimension_numbers<[1], [0], [0], [1], [0, 0, 1, 1], [], []>} : vector<2x32xf32>, vector<32x96xf32>, vector<2x96xf32> -> vector<2x96xf32>
    %349 = vector.broadcast %56 : vector<1x96xf32> to vector<2x96xf32>
    %350 = arith.addf %348, %349 : vector<2x96xf32>
    %351 = vector.extract_strided_slice %347 {offsets = [0, 0], sizes = [2, 32], strides = [1, 1]} : vector<2x97xf32> to vector<2x32xf32>
    %352 = vector.extract_strided_slice %350 {offsets = [0, 0], sizes = [2, 32], strides = [1, 1]} : vector<2x96xf32> to vector<2x32xf32>
    %353 = arith.addf %351, %352 : vector<2x32xf32>
    %354 = arith.negf %353 : vector<2x32xf32>
    %355 = math.exp %354 : vector<2x32xf32>
    %cst_150 = arith.constant 1.000000e+00 : f32
    %356 = vector.broadcast %cst_150 : f32 to vector<2x32xf32>
    %357 = arith.addf %356, %355 : vector<2x32xf32>
    %358 = arith.divf %356, %357 : vector<2x32xf32>
    %359 = vector.extract_strided_slice %347 {offsets = [0, 32], sizes = [2, 32], strides = [1, 1]} : vector<2x97xf32> to vector<2x32xf32>
    %360 = vector.extract_strided_slice %350 {offsets = [0, 32], sizes = [2, 32], strides = [1, 1]} : vector<2x96xf32> to vector<2x32xf32>
    %361 = arith.addf %359, %360 : vector<2x32xf32>
    %362 = arith.negf %361 : vector<2x32xf32>
    %363 = math.exp %362 : vector<2x32xf32>
    %cst_151 = arith.constant 1.000000e+00 : f32
    %364 = vector.broadcast %cst_151 : f32 to vector<2x32xf32>
    %365 = arith.addf %364, %363 : vector<2x32xf32>
    %366 = arith.divf %364, %365 : vector<2x32xf32>
    %367 = vector.extract_strided_slice %347 {offsets = [0, 64], sizes = [2, 32], strides = [1, 1]} : vector<2x97xf32> to vector<2x32xf32>
    %368 = vector.extract_strided_slice %350 {offsets = [0, 64], sizes = [2, 32], strides = [1, 1]} : vector<2x96xf32> to vector<2x32xf32>
    %369 = arith.mulf %358, %368 : vector<2x32xf32>
    %370 = arith.addf %367, %369 : vector<2x32xf32>
    %371 = math.tanh %370 : vector<2x32xf32>
    %cst_152 = arith.constant 1.000000e+00 : f32
    %372 = vector.broadcast %cst_152 : f32 to vector<2x32xf32>
    %373 = arith.subf %372, %366 : vector<2x32xf32>
    %374 = arith.mulf %373, %371 : vector<2x32xf32>
    %375 = arith.mulf %366, %236 : vector<2x32xf32>
    %376 = arith.addf %374, %375 : vector<2x32xf32>
    %377 = vector.extract_strided_slice %347 {offsets = [0, 96], sizes = [2, 1], strides = [1, 1]} : vector<2x97xf32> to vector<2x1xf32>
    %cst_153 = arith.constant dense<0.000000e+00> : vector<2x49xf32>
    %378 = tpu.matmul %376, %51, %cst_153 {dimension_numbers = #tpu.dot_dimension_numbers<[1], [0], [0], [1], [0, 0, 1, 1], [], []>} : vector<2x32xf32>, vector<32x49xf32>, vector<2x49xf32> -> vector<2x49xf32>
    %379 = vector.extract_strided_slice %378 {offsets = [0, 0], sizes = [2, 16], strides = [1, 1]} : vector<2x49xf32> to vector<2x16xf32>
    %380 = vector.extract_strided_slice %378 {offsets = [0, 16], sizes = [2, 32], strides = [1, 1]} : vector<2x49xf32> to vector<2x32xf32>
    %381 = vector.extract_strided_slice %378 {offsets = [0, 48], sizes = [2, 1], strides = [1, 1]} : vector<2x49xf32> to vector<2x1xf32>
    %cst_154 = arith.constant 0.000000e+00 : f32
    %382 = vector.broadcast %cst_154 : f32 to vector<2x16xf32>
    %383 = arith.cmpf ogt, %52, %382 : vector<2x16xf32>
    %cst_155 = arith.constant -1.000000e+09 : f32
    %384 = vector.broadcast %cst_155 : f32 to vector<2x16xf32>
    %385 = arith.select %383, %379, %384 : vector<2x16xi1>, vector<2x16xf32>
    %cst_156 = arith.constant dense<0xFF800000> : vector<2xf32>
    %386 = vector.multi_reduction <maximumf>, %385, %cst_156 [1] : vector<2x16xf32> to vector<2xf32>
    %387 = vector.shape_cast %386 : vector<2xf32> to vector<2x1xf32>
    %388 = vector.broadcast %387 : vector<2x1xf32> to vector<2x16xf32>
    %389 = arith.subf %385, %388 : vector<2x16xf32>
    %390 = math.exp %389 : vector<2x16xf32>
    %391 = arith.mulf %390, %52 : vector<2x16xf32>
    %cst_157 = arith.constant dense<0.000000e+00> : vector<2xf32>
    %392 = vector.multi_reduction <add>, %391, %cst_157 [1] : vector<2x16xf32> to vector<2xf32>
    %393 = vector.shape_cast %392 : vector<2xf32> to vector<2x1xf32>
    %cst_158 = arith.constant 9.99999971E-10 : f32
    %394 = vector.broadcast %cst_158 : f32 to vector<2x1xf32>
    %395 = arith.addf %393, %394 : vector<2x1xf32>
    %396 = tpu.reciprocal %395 {approx = true} : vector<2x1xf32> -> vector<2x1xf32>
    %397 = vector.broadcast %396 : vector<2x1xf32> to vector<2x16xf32>
    %398 = arith.mulf %391, %397 : vector<2x16xf32>
    %c2_159 = arith.constant 2 : index
    %c0_160 = arith.constant 0 : index
    %c0_161 = arith.constant 0 : index
    %399 = vector.load %arg3[%c2_159, %c0_160, %c0_161] : memref<4x2x16xf32, #tpu.memory_space<vmem>>, vector<1x2x16xf32>
    %400 = vector.shape_cast %399 : vector<1x2x16xf32> to vector<2x16xf32>
    %401 = arith.mulf %398, %400 : vector<2x16xf32>
    %cst_162 = arith.constant dense<0.000000e+00> : vector<2xf32>
    %402 = vector.multi_reduction <add>, %401, %cst_162 [1] : vector<2x16xf32> to vector<2xf32>
    %403 = vector.shape_cast %402 : vector<2xf32> to vector<2x1xf32>
    %cst_163 = arith.constant 9.99999971E-10 : f32
    %404 = vector.broadcast %cst_163 : f32 to vector<2x1xf32>
    %405 = arith.addf %403, %404 : vector<2x1xf32>
    %406 = tpu.reciprocal %405 {approx = true} : vector<2x1xf32> -> vector<2x1xf32>
    %407 = vector.broadcast %406 : vector<2x1xf32> to vector<2x16xf32>
    %408 = arith.mulf %401, %407 : vector<2x16xf32>
    %409 = tpu.concatenate %398, %408 in 0 : vector<2x16xf32>, vector<2x16xf32> -> vector<4x16xf32>
    %cst_164 = arith.constant dense<0.000000e+00> : vector<4x137xf32>
    %410 = tpu.matmul %409, %47, %cst_164 {dimension_numbers = #tpu.dot_dimension_numbers<[1], [0], [0], [1], [0, 0, 1, 1], [], []>} : vector<4x16xf32>, vector<16x137xf32>, vector<4x137xf32> -> vector<4x137xf32>
    %411 = vector.extract_strided_slice %410 {offsets = [0, 32], sizes = [2, 32], strides = [1, 1]} : vector<4x137xf32> to vector<2x32xf32>
    %412 = vector.extract_strided_slice %410 {offsets = [0, 64], sizes = [2, 1], strides = [1, 1]} : vector<4x137xf32> to vector<2x1xf32>
    %413 = vector.extract_strided_slice %410 {offsets = [0, 97], sizes = [2, 40], strides = [1, 1]} : vector<4x137xf32> to vector<2x40xf32>
    %414 = vector.extract_strided_slice %410 {offsets = [2, 65], sizes = [2, 32], strides = [1, 1]} : vector<4x137xf32> to vector<2x32xf32>
    %415 = arith.addf %412, %381 : vector<2x1xf32>
    %416 = arith.addf %415, %377 : vector<2x1xf32>
    %417 = vector.broadcast %57 : vector<1x1xf32> to vector<2x1xf32>
    %418 = arith.addf %416, %417 : vector<2x1xf32>
    %419 = arith.negf %418 : vector<2x1xf32>
    %420 = math.exp %419 : vector<2x1xf32>
    %cst_165 = arith.constant 1.000000e+00 : f32
    %421 = vector.broadcast %cst_165 : f32 to vector<2x1xf32>
    %422 = arith.addf %421, %420 : vector<2x1xf32>
    %423 = arith.divf %421, %422 : vector<2x1xf32>
    %424 = arith.addf %380, %411 : vector<2x32xf32>
    %425 = vector.broadcast %58 : vector<1x32xf32> to vector<2x32xf32>
    %426 = arith.addf %424, %425 : vector<2x32xf32>
    %427 = math.tanh %426 : vector<2x32xf32>
    %cst_166 = arith.constant dense<0.000000e+00> : vector<2x32xf32>
    %428 = tpu.matmul %427, %59, %cst_166 {dimension_numbers = #tpu.dot_dimension_numbers<[1], [0], [0], [1], [0, 0, 1, 1], [], []>} : vector<2x32xf32>, vector<32x32xf32>, vector<2x32xf32> -> vector<2x32xf32>
    %429 = vector.broadcast %60 : vector<1x32xf32> to vector<2x32xf32>
    %430 = arith.addf %428, %429 : vector<2x32xf32>
    %cst_167 = arith.constant dense<0xFF800000> : vector<2xf32>
    %431 = vector.multi_reduction <maximumf>, %430, %cst_167 [1] : vector<2x32xf32> to vector<2xf32>
    %432 = vector.shape_cast %431 : vector<2xf32> to vector<2x1xf32>
    %433 = vector.broadcast %432 : vector<2x1xf32> to vector<2x32xf32>
    %434 = arith.subf %430, %433 : vector<2x32xf32>
    %435 = math.exp %434 : vector<2x32xf32>
    %cst_168 = arith.constant dense<0.000000e+00> : vector<2xf32>
    %436 = vector.multi_reduction <add>, %435, %cst_168 [1] : vector<2x32xf32> to vector<2xf32>
    %437 = vector.shape_cast %436 : vector<2xf32> to vector<2x1xf32>
    %438 = tpu.reciprocal %437 {approx = true} : vector<2x1xf32> -> vector<2x1xf32>
    %439 = vector.broadcast %438 : vector<2x1xf32> to vector<2x32xf32>
    %440 = arith.mulf %435, %439 : vector<2x32xf32>
    %cst_169 = arith.constant 0.000000e+00 : f32
    %441 = vector.broadcast %cst_169 : f32 to vector<2x8xf32>
    %442 = tpu.concatenate %440, %441 in 1 : vector<2x32xf32>, vector<2x8xf32> -> vector<2x40xf32>
    %443 = vector.broadcast %423 : vector<2x1xf32> to vector<2x40xf32>
    %444 = arith.mulf %443, %442 : vector<2x40xf32>
    %cst_170 = arith.constant 1.000000e+00 : f32
    %445 = vector.broadcast %cst_170 : f32 to vector<2x1xf32>
    %446 = arith.subf %445, %423 : vector<2x1xf32>
    %447 = vector.broadcast %446 : vector<2x1xf32> to vector<2x40xf32>
    %448 = arith.mulf %447, %413 : vector<2x40xf32>
    %449 = arith.addf %444, %448 : vector<2x40xf32>
    %450 = vector.extract_strided_slice %398 {offsets = [0, 0], sizes = [1, 8], strides = [1, 1]} : vector<2x16xf32> to vector<1x8xf32>
    %451 = vector.extract_strided_slice %398 {offsets = [1, 8], sizes = [1, 8], strides = [1, 1]} : vector<2x16xf32> to vector<1x8xf32>
    %452 = tpu.concatenate %450, %451 in 0 : vector<1x8xf32>, vector<1x8xf32> -> vector<2x8xf32>
    %cst_171 = arith.constant 0.000000e+00 : f32
    %453 = vector.broadcast %cst_171 : f32 to vector<2x80xf32>
    %454 = tpu.concatenate %449, %452, %453 in 1 : vector<2x40xf32>, vector<2x8xf32>, vector<2x80xf32> -> vector<2x128xf32>
    %455 = vector.extract_strided_slice %454 {offsets = [0, 0], sizes = [1, 128], strides = [1, 1]} : vector<2x128xf32> to vector<1x128xf32>
    %c2_172 = arith.constant 2 : index
    %c0_173 = arith.constant 0 : index
    %456 = vector.load %arg28[%c2_172, %c0_173] : memref<8x128xf32, #tpu.memory_space<vmem>>, vector<1x128xf32>
    tpu.vector_store %arg28[%c2_172, %c0_173], %455 {strides = array<i32>} : memref<8x128xf32, #tpu.memory_space<vmem>>, vector<1x128xf32>,
    %457 = vector.extract_strided_slice %454 {offsets = [1, 0], sizes = [1, 128], strides = [1, 1]} : vector<2x128xf32> to vector<1x128xf32>
    %c6 = arith.constant 6 : index
    %c0_174 = arith.constant 0 : index
    %458 = vector.load %arg28[%c6, %c0_174] : memref<8x128xf32, #tpu.memory_space<vmem>>, vector<1x128xf32>
    tpu.vector_store %arg28[%c6, %c0_174], %457 {strides = array<i32>} : memref<8x128xf32, #tpu.memory_space<vmem>>, vector<1x128xf32>,
    %c2_175 = arith.constant 2 : index
    %c0_176 = arith.constant 0 : index
    %c0_177 = arith.constant 0 : index
    %459 = vector.load %arg2[%c2_175, %c0_176, %c0_177] : memref<4x2x32xf32, #tpu.memory_space<vmem>>, vector<1x2x32xf32>
    %460 = vector.shape_cast %459 : vector<1x2x32xf32> to vector<2x32xf32>
    %461 = vector.broadcast %423 : vector<2x1xf32> to vector<2x32xf32>
    %462 = arith.mulf %461, %460 : vector<2x32xf32>
    %cst_178 = arith.constant 1.000000e+00 : f32
    %463 = vector.broadcast %cst_178 : f32 to vector<2x1xf32>
    %464 = arith.subf %463, %423 : vector<2x1xf32>
    %465 = vector.broadcast %464 : vector<2x1xf32> to vector<2x32xf32>
    %466 = arith.mulf %465, %414 : vector<2x32xf32>
    %467 = arith.addf %462, %466 : vector<2x32xf32>
    %c2_179 = arith.constant 2 : index
    %c0_180 = arith.constant 0 : index
    %c0_181 = arith.constant 0 : index
    %468 = vector.load %arg4[%c2_179, %c0_180, %c0_181] : memref<4x2x1xf32, #tpu.memory_space<vmem>>, vector<1x2x1xf32>
    %469 = vector.shape_cast %468 : vector<1x2x1xf32> to vector<2x1xf32>
    %cst_182 = arith.constant 5.000000e-01 : f32
    %470 = vector.broadcast %cst_182 : f32 to vector<2x1xf32>
    %471 = arith.cmpf ogt, %469, %470 : vector<2x1xf32>
    %c2_183 = arith.constant 2 : index
    %c0_184 = arith.constant 0 : index
    %c0_185 = arith.constant 0 : index
    %472 = vector.load %arg5[%c2_183, %c0_184, %c0_185] : memref<4x2x1xf32, #tpu.memory_space<vmem>>, vector<1x2x1xf32>
    %473 = vector.shape_cast %472 : vector<1x2x1xf32> to vector<2x1xf32>
    %cst_186 = arith.constant 5.000000e-01 : f32
    %474 = vector.broadcast %cst_186 : f32 to vector<2x1xf32>
    %475 = arith.cmpf ogt, %473, %474 : vector<2x1xf32>
    %476 = vector.shape_cast %475 : vector<2x1xi1> to vector<2x1xi1>
    %477 = vector.broadcast %476 : vector<2x1xi1> to vector<2x32xi1>
    %478 = arith.select %477, %414, %467 : vector<2x32xi1>, vector<2x32xf32>
    %479 = vector.shape_cast %471 : vector<2x1xi1> to vector<2x1xi1>
    %480 = vector.broadcast %479 : vector<2x1xi1> to vector<2x32xi1>
    %481 = arith.select %480, %460, %478 : vector<2x32xi1>, vector<2x32xf32>
    %c3 = arith.constant 3 : index
    %c0_187 = arith.constant 0 : index
    %c0_188 = arith.constant 0 : index
    %482 = vector.load %arg1[%c3, %c0_187, %c0_188] : memref<4x2x32xf32, #tpu.memory_space<vmem>>, vector<1x2x32xf32>
    %483 = vector.shape_cast %482 : vector<1x2x32xf32> to vector<2x32xf32>
    %484 = arith.addf %483, %481 : vector<2x32xf32>
    %cst_189 = arith.constant dense<0.000000e+00> : vector<2x97xf32>
    %485 = tpu.matmul %484, %53, %cst_189 {dimension_numbers = #tpu.dot_dimension_numbers<[1], [0], [0], [1], [0, 0, 1, 1], [], []>} : vector<2x32xf32>, vector<32x97xf32>, vector<2x97xf32> -> vector<2x97xf32>
    %486 = vector.broadcast %54 : vector<1x97xf32> to vector<2x97xf32>
    %487 = arith.addf %485, %486 : vector<2x97xf32>
    %cst_190 = arith.constant dense<0.000000e+00> : vector<2x96xf32>
    %488 = tpu.matmul %376, %55, %cst_190 {dimension_numbers = #tpu.dot_dimension_numbers<[1], [0], [0], [1], [0, 0, 1, 1], [], []>} : vector<2x32xf32>, vector<32x96xf32>, vector<2x96xf32> -> vector<2x96xf32>
    %489 = vector.broadcast %56 : vector<1x96xf32> to vector<2x96xf32>
    %490 = arith.addf %488, %489 : vector<2x96xf32>
    %491 = vector.extract_strided_slice %487 {offsets = [0, 0], sizes = [2, 32], strides = [1, 1]} : vector<2x97xf32> to vector<2x32xf32>
    %492 = vector.extract_strided_slice %490 {offsets = [0, 0], sizes = [2, 32], strides = [1, 1]} : vector<2x96xf32> to vector<2x32xf32>
    %493 = arith.addf %491, %492 : vector<2x32xf32>
    %494 = arith.negf %493 : vector<2x32xf32>
    %495 = math.exp %494 : vector<2x32xf32>
    %cst_191 = arith.constant 1.000000e+00 : f32
    %496 = vector.broadcast %cst_191 : f32 to vector<2x32xf32>
    %497 = arith.addf %496, %495 : vector<2x32xf32>
    %498 = arith.divf %496, %497 : vector<2x32xf32>
    %499 = vector.extract_strided_slice %487 {offsets = [0, 32], sizes = [2, 32], strides = [1, 1]} : vector<2x97xf32> to vector<2x32xf32>
    %500 = vector.extract_strided_slice %490 {offsets = [0, 32], sizes = [2, 32], strides = [1, 1]} : vector<2x96xf32> to vector<2x32xf32>
    %501 = arith.addf %499, %500 : vector<2x32xf32>
    %502 = arith.negf %501 : vector<2x32xf32>
    %503 = math.exp %502 : vector<2x32xf32>
    %cst_192 = arith.constant 1.000000e+00 : f32
    %504 = vector.broadcast %cst_192 : f32 to vector<2x32xf32>
    %505 = arith.addf %504, %503 : vector<2x32xf32>
    %506 = arith.divf %504, %505 : vector<2x32xf32>
    %507 = vector.extract_strided_slice %487 {offsets = [0, 64], sizes = [2, 32], strides = [1, 1]} : vector<2x97xf32> to vector<2x32xf32>
    %508 = vector.extract_strided_slice %490 {offsets = [0, 64], sizes = [2, 32], strides = [1, 1]} : vector<2x96xf32> to vector<2x32xf32>
    %509 = arith.mulf %498, %508 : vector<2x32xf32>
    %510 = arith.addf %507, %509 : vector<2x32xf32>
    %511 = math.tanh %510 : vector<2x32xf32>
    %cst_193 = arith.constant 1.000000e+00 : f32
    %512 = vector.broadcast %cst_193 : f32 to vector<2x32xf32>
    %513 = arith.subf %512, %506 : vector<2x32xf32>
    %514 = arith.mulf %513, %511 : vector<2x32xf32>
    %515 = arith.mulf %506, %376 : vector<2x32xf32>
    %516 = arith.addf %514, %515 : vector<2x32xf32>
    %517 = vector.extract_strided_slice %487 {offsets = [0, 96], sizes = [2, 1], strides = [1, 1]} : vector<2x97xf32> to vector<2x1xf32>
    %cst_194 = arith.constant dense<0.000000e+00> : vector<2x49xf32>
    %518 = tpu.matmul %516, %51, %cst_194 {dimension_numbers = #tpu.dot_dimension_numbers<[1], [0], [0], [1], [0, 0, 1, 1], [], []>} : vector<2x32xf32>, vector<32x49xf32>, vector<2x49xf32> -> vector<2x49xf32>
    %519 = vector.extract_strided_slice %518 {offsets = [0, 0], sizes = [2, 16], strides = [1, 1]} : vector<2x49xf32> to vector<2x16xf32>
    %520 = vector.extract_strided_slice %518 {offsets = [0, 16], sizes = [2, 32], strides = [1, 1]} : vector<2x49xf32> to vector<2x32xf32>
    %521 = vector.extract_strided_slice %518 {offsets = [0, 48], sizes = [2, 1], strides = [1, 1]} : vector<2x49xf32> to vector<2x1xf32>
    %cst_195 = arith.constant 0.000000e+00 : f32
    %522 = vector.broadcast %cst_195 : f32 to vector<2x16xf32>
    %523 = arith.cmpf ogt, %52, %522 : vector<2x16xf32>
    %cst_196 = arith.constant -1.000000e+09 : f32
    %524 = vector.broadcast %cst_196 : f32 to vector<2x16xf32>
    %525 = arith.select %523, %519, %524 : vector<2x16xi1>, vector<2x16xf32>
    %cst_197 = arith.constant dense<0xFF800000> : vector<2xf32>
    %526 = vector.multi_reduction <maximumf>, %525, %cst_197 [1] : vector<2x16xf32> to vector<2xf32>
    %527 = vector.shape_cast %526 : vector<2xf32> to vector<2x1xf32>
    %528 = vector.broadcast %527 : vector<2x1xf32> to vector<2x16xf32>
    %529 = arith.subf %525, %528 : vector<2x16xf32>
    %530 = math.exp %529 : vector<2x16xf32>
    %531 = arith.mulf %530, %52 : vector<2x16xf32>
    %cst_198 = arith.constant dense<0.000000e+00> : vector<2xf32>
    %532 = vector.multi_reduction <add>, %531, %cst_198 [1] : vector<2x16xf32> to vector<2xf32>
    %533 = vector.shape_cast %532 : vector<2xf32> to vector<2x1xf32>
    %cst_199 = arith.constant 9.99999971E-10 : f32
    %534 = vector.broadcast %cst_199 : f32 to vector<2x1xf32>
    %535 = arith.addf %533, %534 : vector<2x1xf32>
    %536 = tpu.reciprocal %535 {approx = true} : vector<2x1xf32> -> vector<2x1xf32>
    %537 = vector.broadcast %536 : vector<2x1xf32> to vector<2x16xf32>
    %538 = arith.mulf %531, %537 : vector<2x16xf32>
    %c3_200 = arith.constant 3 : index
    %c0_201 = arith.constant 0 : index
    %c0_202 = arith.constant 0 : index
    %539 = vector.load %arg3[%c3_200, %c0_201, %c0_202] : memref<4x2x16xf32, #tpu.memory_space<vmem>>, vector<1x2x16xf32>
    %540 = vector.shape_cast %539 : vector<1x2x16xf32> to vector<2x16xf32>
    %541 = arith.mulf %538, %540 : vector<2x16xf32>
    %cst_203 = arith.constant dense<0.000000e+00> : vector<2xf32>
    %542 = vector.multi_reduction <add>, %541, %cst_203 [1] : vector<2x16xf32> to vector<2xf32>
    %543 = vector.shape_cast %542 : vector<2xf32> to vector<2x1xf32>
    %cst_204 = arith.constant 9.99999971E-10 : f32
    %544 = vector.broadcast %cst_204 : f32 to vector<2x1xf32>
    %545 = arith.addf %543, %544 : vector<2x1xf32>
    %546 = tpu.reciprocal %545 {approx = true} : vector<2x1xf32> -> vector<2x1xf32>
    %547 = vector.broadcast %546 : vector<2x1xf32> to vector<2x16xf32>
    %548 = arith.mulf %541, %547 : vector<2x16xf32>
    %549 = tpu.concatenate %538, %548 in 0 : vector<2x16xf32>, vector<2x16xf32> -> vector<4x16xf32>
    %cst_205 = arith.constant dense<0.000000e+00> : vector<4x137xf32>
    %550 = tpu.matmul %549, %47, %cst_205 {dimension_numbers = #tpu.dot_dimension_numbers<[1], [0], [0], [1], [0, 0, 1, 1], [], []>} : vector<4x16xf32>, vector<16x137xf32>, vector<4x137xf32> -> vector<4x137xf32>
    %551 = vector.extract_strided_slice %550 {offsets = [0, 32], sizes = [2, 32], strides = [1, 1]} : vector<4x137xf32> to vector<2x32xf32>
    %552 = vector.extract_strided_slice %550 {offsets = [0, 64], sizes = [2, 1], strides = [1, 1]} : vector<4x137xf32> to vector<2x1xf32>
    %553 = vector.extract_strided_slice %550 {offsets = [0, 97], sizes = [2, 40], strides = [1, 1]} : vector<4x137xf32> to vector<2x40xf32>
    %554 = arith.addf %552, %521 : vector<2x1xf32>
    %555 = arith.addf %554, %517 : vector<2x1xf32>
    %556 = vector.broadcast %57 : vector<1x1xf32> to vector<2x1xf32>
    %557 = arith.addf %555, %556 : vector<2x1xf32>
    %558 = arith.negf %557 : vector<2x1xf32>
    %559 = math.exp %558 : vector<2x1xf32>
    %cst_206 = arith.constant 1.000000e+00 : f32
    %560 = vector.broadcast %cst_206 : f32 to vector<2x1xf32>
    %561 = arith.addf %560, %559 : vector<2x1xf32>
    %562 = arith.divf %560, %561 : vector<2x1xf32>
    %563 = arith.addf %520, %551 : vector<2x32xf32>
    %564 = vector.broadcast %58 : vector<1x32xf32> to vector<2x32xf32>
    %565 = arith.addf %563, %564 : vector<2x32xf32>
    %566 = math.tanh %565 : vector<2x32xf32>
    %cst_207 = arith.constant dense<0.000000e+00> : vector<2x32xf32>
    %567 = tpu.matmul %566, %59, %cst_207 {dimension_numbers = #tpu.dot_dimension_numbers<[1], [0], [0], [1], [0, 0, 1, 1], [], []>} : vector<2x32xf32>, vector<32x32xf32>, vector<2x32xf32> -> vector<2x32xf32>
    %568 = vector.broadcast %60 : vector<1x32xf32> to vector<2x32xf32>
    %569 = arith.addf %567, %568 : vector<2x32xf32>
    %cst_208 = arith.constant dense<0xFF800000> : vector<2xf32>
    %570 = vector.multi_reduction <maximumf>, %569, %cst_208 [1] : vector<2x32xf32> to vector<2xf32>
    %571 = vector.shape_cast %570 : vector<2xf32> to vector<2x1xf32>
    %572 = vector.broadcast %571 : vector<2x1xf32> to vector<2x32xf32>
    %573 = arith.subf %569, %572 : vector<2x32xf32>
    %574 = math.exp %573 : vector<2x32xf32>
    %cst_209 = arith.constant dense<0.000000e+00> : vector<2xf32>
    %575 = vector.multi_reduction <add>, %574, %cst_209 [1] : vector<2x32xf32> to vector<2xf32>
    %576 = vector.shape_cast %575 : vector<2xf32> to vector<2x1xf32>
    %577 = tpu.reciprocal %576 {approx = true} : vector<2x1xf32> -> vector<2x1xf32>
    %578 = vector.broadcast %577 : vector<2x1xf32> to vector<2x32xf32>
    %579 = arith.mulf %574, %578 : vector<2x32xf32>
    %cst_210 = arith.constant 0.000000e+00 : f32
    %580 = vector.broadcast %cst_210 : f32 to vector<2x8xf32>
    %581 = tpu.concatenate %579, %580 in 1 : vector<2x32xf32>, vector<2x8xf32> -> vector<2x40xf32>
    %582 = vector.broadcast %562 : vector<2x1xf32> to vector<2x40xf32>
    %583 = arith.mulf %582, %581 : vector<2x40xf32>
    %cst_211 = arith.constant 1.000000e+00 : f32
    %584 = vector.broadcast %cst_211 : f32 to vector<2x1xf32>
    %585 = arith.subf %584, %562 : vector<2x1xf32>
    %586 = vector.broadcast %585 : vector<2x1xf32> to vector<2x40xf32>
    %587 = arith.mulf %586, %553 : vector<2x40xf32>
    %588 = arith.addf %583, %587 : vector<2x40xf32>
    %589 = vector.extract_strided_slice %538 {offsets = [0, 0], sizes = [1, 8], strides = [1, 1]} : vector<2x16xf32> to vector<1x8xf32>
    %590 = vector.extract_strided_slice %538 {offsets = [1, 8], sizes = [1, 8], strides = [1, 1]} : vector<2x16xf32> to vector<1x8xf32>
    %591 = tpu.concatenate %589, %590 in 0 : vector<1x8xf32>, vector<1x8xf32> -> vector<2x8xf32>
    %cst_212 = arith.constant 0.000000e+00 : f32
    %592 = vector.broadcast %cst_212 : f32 to vector<2x80xf32>
    %593 = tpu.concatenate %588, %591, %592 in 1 : vector<2x40xf32>, vector<2x8xf32>, vector<2x80xf32> -> vector<2x128xf32>
    %594 = vector.extract_strided_slice %593 {offsets = [0, 0], sizes = [1, 128], strides = [1, 1]} : vector<2x128xf32> to vector<1x128xf32>
    %c3_213 = arith.constant 3 : index
    %c0_214 = arith.constant 0 : index
    %595 = vector.load %arg28[%c3_213, %c0_214] : memref<8x128xf32, #tpu.memory_space<vmem>>, vector<1x128xf32>
    tpu.vector_store %arg28[%c3_213, %c0_214], %594 {strides = array<i32>} : memref<8x128xf32, #tpu.memory_space<vmem>>, vector<1x128xf32>,
    %596 = vector.extract_strided_slice %593 {offsets = [1, 0], sizes = [1, 128], strides = [1, 1]} : vector<2x128xf32> to vector<1x128xf32>
    %c7 = arith.constant 7 : index
    %c0_215 = arith.constant 0 : index
    %597 = vector.load %arg28[%c7, %c0_215] : memref<8x128xf32, #tpu.memory_space<vmem>>, vector<1x128xf32>
    tpu.vector_store %arg28[%c7, %c0_215], %596 {strides = array<i32>} : memref<8x128xf32, #tpu.memory_space<vmem>>, vector<1x128xf32>,
    %c0_216 = arith.constant 0 : index
    %c0_217 = arith.constant 0 : index
    %598 = vector.load %arg29[%c0_216, %c0_217] : memref<2x32xf32, #tpu.memory_space<vmem>>, vector<2x32xf32>
    tpu.vector_store %arg29[%c0_216, %c0_217], %516 {strides = array<i32>} : memref<2x32xf32, #tpu.memory_space<vmem>>, vector<2x32xf32>,
    return
  }
  func.func @transform_0(%arg0: i32) -> (i32, i32, i32) {
    %c0_i32 = arith.constant 0 : i32
    %c0_i32_0 = arith.constant 0 : i32
    %c0_i32_1 = arith.constant 0 : i32
    %c0_i32_2 = arith.constant 0 : i32
    return %c0_i32, %c0_i32_0, %c0_i32_1 : i32, i32, i32
  }
  func.func @transform_1(%arg0: i32) -> (i32, i32, i32) {
    %c0_i32 = arith.constant 0 : i32
    %c0_i32_0 = arith.constant 0 : i32
    %c0_i32_1 = arith.constant 0 : i32
    %c0_i32_2 = arith.constant 0 : i32
    return %c0_i32, %c0_i32_0, %c0_i32_1 : i32, i32, i32
  }
  func.func @transform_2(%arg0: i32) -> (i32, i32, i32) {
    %c0_i32 = arith.constant 0 : i32
    %c0_i32_0 = arith.constant 0 : i32
    %c0_i32_1 = arith.constant 0 : i32
    %c0_i32_2 = arith.constant 0 : i32
    return %c0_i32, %c0_i32_0, %c0_i32_1 : i32, i32, i32
  }
  func.func @transform_3(%arg0: i32) -> (i32, i32, i32) {
    %c0_i32 = arith.constant 0 : i32
    %c0_i32_0 = arith.constant 0 : i32
    %c0_i32_1 = arith.constant 0 : i32
    %c0_i32_2 = arith.constant 0 : i32
    return %c0_i32, %c0_i32_0, %c0_i32_1 : i32, i32, i32
  }
  func.func @transform_4(%arg0: i32) -> (i32, i32, i32) {
    %c0_i32 = arith.constant 0 : i32
    %c0_i32_0 = arith.constant 0 : i32
    %c0_i32_1 = arith.constant 0 : i32
    %c0_i32_2 = arith.constant 0 : i32
    return %c0_i32, %c0_i32_0, %c0_i32_1 : i32, i32, i32
  }
  func.func @transform_5(%arg0: i32) -> (i32, i32) {
    %c0_i32 = arith.constant 0 : i32
    %c0_i32_0 = arith.constant 0 : i32
    %c0_i32_1 = arith.constant 0 : i32
    return %c0_i32, %c0_i32_0 : i32, i32
  }
  func.func @transform_6(%arg0: i32) -> (i32, i32) {
    %c0_i32 = arith.constant 0 : i32
    %c0_i32_0 = arith.constant 0 : i32
    %c0_i32_1 = arith.constant 0 : i32
    return %c0_i32, %c0_i32_0 : i32, i32
  }
  func.func @transform_7(%arg0: i32) -> (i32, i32) {
    %c0_i32 = arith.constant 0 : i32
    %c0_i32_0 = arith.constant 0 : i32
    %c0_i32_1 = arith.constant 0 : i32
    return %c0_i32, %c0_i32_0 : i32, i32
  }
  func.func @transform_8(%arg0: i32) -> (i32, i32) {
    %c0_i32 = arith.constant 0 : i32
    %c0_i32_0 = arith.constant 0 : i32
    %c0_i32_1 = arith.constant 0 : i32
    return %c0_i32, %c0_i32_0 : i32, i32
  }
  func.func @transform_9(%arg0: i32) -> (i32, i32) {
    %c0_i32 = arith.constant 0 : i32
    %c0_i32_0 = arith.constant 0 : i32
    %c0_i32_1 = arith.constant 0 : i32
    return %c0_i32, %c0_i32_0 : i32, i32
  }
  func.func @transform_10(%arg0: i32) -> (i32, i32) {
    %c0_i32 = arith.constant 0 : i32
    %c0_i32_0 = arith.constant 0 : i32
    %c0_i32_1 = arith.constant 0 : i32
    return %c0_i32, %c0_i32_0 : i32, i32
  }
  func.func @transform_11(%arg0: i32) -> (i32, i32, i32) {
    %c0_i32 = arith.constant 0 : i32
    %c0_i32_0 = arith.constant 0 : i32
    %c0_i32_1 = arith.constant 0 : i32
    %c0_i32_2 = arith.constant 0 : i32
    return %c0_i32, %c0_i32_0, %c0_i32_1 : i32, i32, i32
  }
  func.func @transform_12(%arg0: i32) -> (i32, i32, i32) {
    %c0_i32 = arith.constant 0 : i32
    %c0_i32_0 = arith.constant 0 : i32
    %c0_i32_1 = arith.constant 0 : i32
    %c0_i32_2 = arith.constant 0 : i32
    return %c0_i32, %c0_i32_0, %c0_i32_1 : i32, i32, i32
  }
  func.func @transform_13(%arg0: i32) -> (i32, i32) {
    %c0_i32 = arith.constant 0 : i32
    %c0_i32_0 = arith.constant 0 : i32
    %c0_i32_1 = arith.constant 0 : i32
    return %c0_i32, %c0_i32_0 : i32, i32
  }
  func.func @transform_14(%arg0: i32) -> (i32, i32) {
    %c0_i32 = arith.constant 0 : i32
    %c0_i32_0 = arith.constant 0 : i32
    %c0_i32_1 = arith.constant 0 : i32
    return %c0_i32, %c0_i32_0 : i32, i32
  }
  func.func @transform_15(%arg0: i32) -> (i32, i32) {
    %c0_i32 = arith.constant 0 : i32
    %c0_i32_0 = arith.constant 0 : i32
    %c0_i32_1 = arith.constant 0 : i32
    return %c0_i32, %c0_i32_0 : i32, i32
  }
  func.func @transform_16(%arg0: i32) -> (i32, i32) {
    %c0_i32 = arith.constant 0 : i32
    %c0_i32_0 = arith.constant 0 : i32
    %c0_i32_1 = arith.constant 0 : i32
    return %c0_i32, %c0_i32_0 : i32, i32
  }
  func.func @transform_17(%arg0: i32) -> (i32, i32) {
    %c0_i32 = arith.constant 0 : i32
    %c0_i32_0 = arith.constant 0 : i32
    %c0_i32_1 = arith.constant 0 : i32
    return %c0_i32, %c0_i32_0 : i32, i32
  }
  func.func @transform_18(%arg0: i32) -> (i32, i32) {
    %c0_i32 = arith.constant 0 : i32
    %c0_i32_0 = arith.constant 0 : i32
    %c0_i32_1 = arith.constant 0 : i32
    return %c0_i32, %c0_i32_0 : i32, i32
  }
  func.func @transform_19(%arg0: i32) -> (i32, i32) {
    %c0_i32 = arith.constant 0 : i32
    %c0_i32_0 = arith.constant 0 : i32
    %c0_i32_1 = arith.constant 0 : i32
    return %c0_i32, %c0_i32_0 : i32, i32
  }
  func.func @transform_20(%arg0: i32) -> (i32, i32) {
    %c0_i32 = arith.constant 0 : i32
    %c0_i32_0 = arith.constant 0 : i32
    %c0_i32_1 = arith.constant 0 : i32
    return %c0_i32, %c0_i32_0 : i32, i32
  }
  func.func @transform_21(%arg0: i32) -> (i32, i32) {
    %c0_i32 = arith.constant 0 : i32
    %c0_i32_0 = arith.constant 0 : i32
    %c0_i32_1 = arith.constant 0 : i32
    return %c0_i32, %c0_i32_0 : i32, i32
  }
  func.func @transform_22(%arg0: i32) -> (i32, i32) {
    %c0_i32 = arith.constant 0 : i32
    %c0_i32_0 = arith.constant 0 : i32
    %c0_i32_1 = arith.constant 0 : i32
    return %c0_i32, %c0_i32_0 : i32, i32
  }
  func.func @transform_23(%arg0: i32) -> (i32, i32) {
    %c0_i32 = arith.constant 0 : i32
    %c0_i32_0 = arith.constant 0 : i32
    %c0_i32_1 = arith.constant 0 : i32
    return %c0_i32, %c0_i32_0 : i32, i32
  }
  func.func @transform_24(%arg0: i32) -> (i32, i32) {
    %c0_i32 = arith.constant 0 : i32
    %c0_i32_0 = arith.constant 0 : i32
    %c0_i32_1 = arith.constant 0 : i32
    return %c0_i32, %c0_i32_0 : i32, i32
  }
  func.func @transform_25(%arg0: i32) -> (i32, i32) {
    %c0_i32 = arith.constant 0 : i32
    %c0_i32_0 = arith.constant 0 : i32
    %c0_i32_1 = arith.constant 0 : i32
    return %c0_i32, %c0_i32_0 : i32, i32
  }
  func.func @transform_26(%arg0: i32) -> (i32, i32) {
    %c0_i32 = arith.constant 0 : i32
    %c0_i32_0 = arith.constant 0 : i32
    %c0_i32_1 = arith.constant 0 : i32
    return %c0_i32, %c0_i32_0 : i32, i32
  }
  func.func @transform_27(%arg0: i32) -> (i32, i32) {
    %c0_i32 = arith.constant 0 : i32
    %c0_i32_0 = arith.constant 0 : i32
    %c0_i32_1 = arith.constant 0 : i32
    return %c0_i32, %c0_i32_0 : i32, i32
  }
  func.func @transform_28(%arg0: i32) -> (i32, i32) {
    %c0_i32 = arith.constant 0 : i32
    %c0_i32_0 = arith.constant 0 : i32
    %c0_i32_1 = arith.constant 0 : i32
    return %c0_i32, %c0_i32_0 : i32, i32
  }
  func.func @transform_29(%arg0: i32) -> (i32, i32) {
    %c0_i32 = arith.constant 0 : i32
    %c0_i32_0 = arith.constant 0 : i32
    %c0_i32_1 = arith.constant 0 : i32
    return %c0_i32, %c0_i32_0 : i32, i32
  }
}

</mosaic_0001>

<bundles_post_ra>
// kernel: eq.21
= control target key start
LH: loop header
LB: loop body
LE: loop exit
PB: predicated region body
PF: predicated region fallthrough
CT: control target
= control target key end

     0   :  { %vm7_vm0 = vcmask 64512   ;;  %vm13_vm1 = vcmask 130112   ;;  %s39_s0 = inlined_call_operand.vmem [shape: s32[2,8], index: 0, kind: input, shape index: {}]   ;;  %s40_s1 = inlined_call_operand.vmem [shape: s32[16], index: 1, kind: output, shape index: {}]  }
   0x1   :  { %v4_v0 = vld [vmem:[%s39_s0] sm:$0x3]  ;;  %s22_s0 = smov 8  }
   0x2   :  { %5 = vst [vmem:[#allocation1] sm:$0x3] %v4_v0 }
   0x9   :  { %v10_v1 = vld [vmem:[#allocation1 + $0x1] sm:$0x1]   ;;  %v6_v2 = vld [vmem:[#allocation1] sm:$0x1]  }
   0xa   :  { %11 = vrot.lane.b32.xlu0 %v10_v1, %s22_s0  ;;  %8 = vst.msk [vmem:[#allocation0] sm:$0x1] %vm7_vm0, %v6_v2  }
  0x7c   :  { %v12_v3 = vpop.permute.xlu0 %11  }
  0x7d   :  { %14 = vst.msk [vmem:[#allocation0] sm:$0x1] %vm13_vm1, %v12_v3  }
  0x84   :  { %v18_v4 = vld [vmem:[#allocation0] sm:$0x1] }
  0x85   :  { %20 = vst [vmem:[%s40_s1] sm:$0x1] %v18_v4 }

// kernel: seq2seq_forward.1
= control target key start
LH: loop header
LB: loop body
LE: loop exit
PB: predicated region body
PF: predicated region fallthrough
CT: control target
= control target key end

     0   :  { %s4079_s6 = smov 1   ;;  %s4080_s10 = smov 2   ;;  %s4937_s0 = inlined_call_operand.smem [shape: u32[30], index: -1, kind: input, shape index: {}] }
   0x1   :  { %s4133_s5 = sld [smem:[%s4937_s0]]   ;;  %s4081_s14 = smov 3  }
   0x2   :  { %s4138_s9 = sld [smem:[%s4937_s0 + %s4079_s6]]   ;;  %s4082_s18 = smov 4  }
   0x3   :  { %s4143_s13 = sld [smem:[%s4937_s0 + %s4080_s10]]   ;;  %s4083_s22 = smov 5  }
   0x4   :  { %s4148_s17 = sld [smem:[%s4937_s0 + %s4081_s14]]   ;;  %s4084_s26 = smov 6  }
   0x5   :  { %s4153_s21 = sld [smem:[%s4937_s0 + %s4082_s18]]   ;;  %s4085_s30 = smov 7  }
   0x6   :  { %s4158_s25 = sld [smem:[%s4937_s0 + %s4083_s22]]   ;;  %s4086_s4 = smov 8  }
   0x7   :  { %s4163_s29 = sld [smem:[%s4937_s0 + %s4084_s26]]   ;;  %s4087_s10 = smov 9  }
   0x8   :  { %4945 = sst [smem:[#allocation9_spill]] %s4138_s9  ;;  %s4088_s15 = smov 10  }
   0x9   :  { %4946 = sst [smem:[#allocation10_spill]] %s4143_s13  ;;  %s4089_s20 = smov 11  }
   0xa   :  { %4947 = sst [smem:[#allocation11_spill]] %s4148_s17  ;;  %s4090_s26 = smov 12  }
   0xb   :  { %4948 = sst [smem:[#allocation12_spill]] %s4153_s21  ;;  %s4091_s1 = smov 13  }
   0xc   :  { %s4168_s3 = sld [smem:[%s4937_s0 + %s4085_s30]]   ;;  %s4092_s7 = smov 14  }
   0xd   :  { %s4173_s8 = sld [smem:[%s4937_s0 + %s4086_s4]]   ;;  %s4094_s22 = smov 16  }
   0xe   :  { %s4178_s14 = sld [smem:[%s4937_s0 + %s4087_s10]]   ;;  %s4095_s28 = smov 17  }
   0xf   :  { %s4183_s19 = sld [smem:[%s4937_s0 + %s4088_s15]]   ;;  %s4093_s15 = smov 15  }
  0x10   :  { %s4188_s24 = sld [smem:[%s4937_s0 + %s4089_s20]]   ;;  %s4102_s23 = smov 24  }
  0x11   :  { %s4193_s30 = sld [smem:[%s4937_s0 + %s4090_s26]]   ;;  %s4104_s10 = smov 26  }
  0x12   :  { %s4198_s6 = sld [smem:[%s4937_s0 + %s4091_s1]]   ;;  %s4103_s1 = smov 25  }
  0x13   :  { %s4203_s12 = sld [smem:[%s4937_s0 + %s4092_s7]]   ;;  %s4096_s7 = smov 18  }
  0x14   :  { %4949 = sst [smem:[#allocation13_spill]] %s4178_s14  ;;  %s4105_s16 = smov 27  }
  0x15   :  { %4950 = sst [smem:[#allocation14_spill]] %s4183_s19 }
  0x16   :  { %s4208_s20 = sld [smem:[%s4937_s0 + %s4093_s15]]   ;;  %s4097_s15 = smov 19  }
  0x17   :  { %s4213_s27 = sld [smem:[%s4937_s0 + %s4094_s22]]   ;;  %s4098_s22 = smov 20  }
  0x18   :  { %s4218_s4 = sld [smem:[%s4937_s0 + %s4095_s28]]   ;;  %s4099_s28 = smov 21  }
  0x19   :  { %4951 = sst [smem:[#allocation15_spill]] %s4203_s12 }
  0x1a   :  { %s4223_s9 = sld [smem:[%s4937_s0 + %s4096_s7]]   ;;  %s4100_s7 = smov 22  }
  0x1b   :  { %s4228_s17 = sld [smem:[%s4937_s0 + %s4097_s15]]   ;;  %s4101_s15 = smov 23  }
  0x1c   :  { %s4233_s21 = sld [smem:[%s4937_s0 + %s4098_s22]]  }
  0x1d   :  { %s4238_s13 = sld [smem:[%s4937_s0 + %s4099_s28]]  }
  0x1e   :  { %s4243_s19 = sld [smem:[%s4937_s0 + %s4100_s7]]  }
  0x1f   :  { %s3154_s14 = sld [smem:[%s4937_s0 + %s4101_s15]]  }
  0x20   :  { %4952 = sst [smem:[#allocation16_spill]] %s4223_s9 }
  0x21   :  { %s4251_s9 = sld [smem:[%s4937_s0 + %s4102_s23]]   ;;  %s4106_s23 = smov 28  }
  0x22   :  { %4953 = sst [smem:[#allocation17_spill]] %s4233_s21 }
  0x23   :  { %s4256_s21 = sld [smem:[%s4937_s0 + %s4103_s1]]   ;;  %s4107_s1 = smov 29  }
  0x24   :  { %4954 = sst [smem:[#allocation18_spill]] %s4243_s19 }
  0x25   :  { %s4261_s19 = sld [smem:[%s4937_s0 + %s4104_s10]]   ;;  %v65_v0 = vstv %s3154_s14 }
  0x26   :  { %s4266_s12 = sld [smem:[%s4937_s0 + %s4105_s16]]   ;;  %66 = vst [vmem:[#allocation2] sm:$0x1] %v65_v0 }
  0x27   :  { %4955 = sst [smem:[#allocation19_spill]] %s4251_s9 }
  0x28   :  { %s4271_s9 = sld [smem:[%s4937_s0 + %s4106_s23]]  }
  0x29   :  { %4956 = sst [smem:[#allocation20_spill]] %s4256_s21 }
  0x2a   :  { %s4276_s21 = sld [smem:[%s4937_s0 + %s4107_s1]]  }
  0x2b   :  { %67 = vsyncpa [#allocation4], 0  ;;  %v4279_v1 = vld [vmem:[%s4158_s25] sm:$0xff]  ;;  %v4282_v2 = vld [vmem:[%s4158_s25 + $0x8] sm:$0xff]  ;;  %vm131_vm0 = vcmask 130048  }
  0x2c   :  { %v125_v3 = vld [vmem:[%s4163_s29] sm:$0xff]  ;;  %v3674_v4 = vpack.c.bf16 %v4282_v2, %v4279_v1 }
  0x2d   :  { %3389 = vmatprep.mubr.msk.f32.mxu1 %vm131_vm0, %v125_v3  ;;  %3426 = vmatprep.mubr.msk.f32.mxu0 %vm131_vm0, %v125_v3 }
  0x2e   :  { %68 = vsyncpa [#allocation6], 0  ;;  %3675 = vmatprep.subr.bf16.mxu1 %v3674_v4  ;;  %v4290_v5 = vld [vmem:[%s4163_s29 + $0x8] sm:$0xff]  ;;  %v4293_v6 = vld [vmem:[%s4163_s29 + $0x10] sm:$0xff]  ;;  %v4108_v26 = vmov 0   ;;  %s4109_s0 = smov 32  }
  0x2f   :  { %3677 = vmatpush3.bf16.msra.mxu1 %v3674_v4  ;;  %v4300_v7 = vld [vmem:[%s4163_s29 + $0x18] sm:$0xff]  ;;  %v251_v8 = vld [vmem:[%s4188_s24] sm:$0xff]  ;;  %v252_v9 = vld [vmem:[%s4188_s24 + $0x8] sm:$0xff]  ;;  %3912 = vset.pattern.permute.xlu1 %v4108_v26  ;;  %s4110_s25 = smov 64   ;;  %vm245_vm1 = vcmask 261120   ;;  %vm248_vm2 = vcmask 523264  }
  0x30   :  { %v253_v10 = vld [vmem:[%s4188_s24 + $0x10] sm:$0xff]  ;;  %v3678_v11 = vpack.c.bf16 %v252_v9, %v251_v8  ;;  %v254_v12 = vld [vmem:[%s4188_s24 + $0x18] sm:$0xff]  ;;  %v255_v14 = vld [vmem:[%s4188_s24 + $0x20] sm:$0xff]  ;;  %3911 = vset.pattern.permute.xlu0 %v4108_v26  ;;  %vm270_vm3 = vcmask 785408   ;;  %vm4112_vm4 = vmmov 0   ;;  %vm651_vm6 = vcmask 254976  }
  0x31   :  { %v3682_v13 = vpack.c.bf16 %v254_v12, %v253_v10  ;;  %v256_v15 = vld [vmem:[%s4188_s24 + $0x28] sm:$0xff]  ;;  %v257_v17 = vld [vmem:[%s4188_s24 + $0x30] sm:$0xff]  ;;  %v258_v18 = vld [vmem:[%s4188_s24 + $0x38] sm:$0xff]  ;;  %s4959_s29 = sld [smem:[#allocation15_spill]]  ;;  %s4115_s14 = smov 96   ;;  %vm1261_vm8 = vcmask 123904  }
  0x32   :  { %3390 = vmatmul.mubr.msk.f32.vlgmr.msra.gmra.mrb[0].mxu1 %vm131_vm0, %v4290_v5  ;;  %3679 = vmatprep.subr.bf16.mxu1 %v3678_v11  ;;  %v3686_v16 = vpack.c.bf16 %v256_v15, %v255_v14  ;;  %v3690_v19 = vpack.c.bf16 %v258_v18, %v257_v17  ;;  %v259_v20 = vld [vmem:[%s4188_s24 + $0x40] sm:$0xff]  ;;  %v260_v21 = vld [vmem:[%s4188_s24 + $0x48] sm:$0xff]  ;;  %v261_v23 = vld [vmem:[%s4188_s24 + $0x50] sm:$0xff]  ;;  %vm849_vm9 = vcmask 793600   ;;  %vm1286_vm10 = vcmask 1041408   ;;  %s4117_s10 = smov 112  }
  0x33   :  { %3392 = vmatprep.mubr.msk.f32.mxu1 %vm131_vm0, %v4293_v6  ;;  %3681 = vmatpush3.bf16.msra.mxu1 %v3678_v11  ;;  %v3694_v22 = vpack.c.bf16 %v260_v21, %v259_v20  ;;  %v262_v24 = vld [vmem:[%s4188_s24 + $0x58] sm:$0xff]  ;;  %v123_v31 = vld [vmem:[%s4168_s3] sm:$0xff]  ;;  %v124_v32 = vld [vmem:[%s4168_s3 + $0x8] sm:$0xff]  ;;  %s4962_s3 = sld [smem:[#allocation18_spill]]  ;;  %s4968_s7 = sld [smem:[#allocation12_spill]] }
  0x34   :  { %3683 = vmatprep.subr.bf16.mxu1 %v3682_v13  ;;  %v3698_v25 = vpack.c.bf16 %v262_v24, %v261_v23  ;;  %v3165_v41 = vld [vmem:[%s4193_s30] ss:$0 sm:$0xff]  ;;  %v3173_v54 = vld [vmem:[%s4188_s24 + $0x68] sm:$0xff]  ;;  %v3174_v55 = vld [vmem:[%s4188_s24 + $0x70] sm:$0xff]  ;;  %s4969_s11 = sld [smem:[#allocation11_spill]]  ;;  %s4119_s16 = smov 63  }
  0x35   :  { %v3172_v53 = vld [vmem:[%s4188_s24 + $0x60] sm:$0xff]  ;;  %v3175_v57 = vld [vmem:[%s4188_s24 + $0x78] sm:$0xff]  ;;  %v3177_v60 = vld [vmem:[%s4188_s24 + $0x88] sm:$0xff]  ;;  %s4970_s15 = sld [smem:[#allocation9_spill]]  ;;  %s4122_s18 = smov 40  }
  0x36   :  { %3393 = vmatmul.mubr.msk.f32.gmra.mrb[2].mxu1 %vm131_vm0, %v4300_v7  ;;  %v3706_v56 = vpack.c.bf16 %v3173_v54, %v3172_v53  ;;  %v3710_v58 = vpack.c.bf16 %v3175_v57, %v3174_v55  ;;  %v3176_v59 = vld [vmem:[%s4188_s24 + $0x80] sm:$0xff]  ;;  %v3178_v62 = vld [vmem:[%s4188_s24 + $0x90] sm:$0xff]  ;;  %v3179_v63 = vld [vmem:[%s4188_s24 + $0x98] sm:$0xff]  ;;  %s4123_s23 = smov [#allocation3]   ;;  %s4124_s26 = smov [#allocation5]  }
  0x37   :  { %3685 = vmatpush3.bf16.msra.mxu1 %v3682_v13  ;;  %v3714_v61 = vpack.c.bf16 %v3177_v60, %v3176_v59  ;;  %v3718_v0 = vpack.c.bf16 %v3179_v63, %v3178_v62  ;;  %v3182_v4 = vld [vmem:[%s4188_s24 + $0xb0] sm:$0xff]  ;;  %v738_v20 = vld [vmem:[%s4208_s20 + $0x8] sm:$0xff]  ;;  %v740_v23 = vld [vmem:[%s4208_s20 + $0x18] sm:$0xff]  ;;  %s3108_s22 = sshll.u32 %s4123_s23, 4  ;;  %s3118_s1 = sshll.u32 %s4124_s26, 4  ;;  %s3109_s22 = int_to_ptr.vmem [resolvable:$true] %s3108_s22  ;;  %s3119_s1 = int_to_ptr.vmem [resolvable:$true] %s3118_s1 }
  0x38   :  { %3687 = vmatprep.subr.bf16.mxu1 %v3686_v16  ;;  %vm4402_vm5 = vmpackc.low %vm245_vm1, %vm245_vm1  ;;  %v852_v54 = vld [vmem:[%s4238_s13] sm:$0xff]  ;;  %v984_v59 = vld [vmem:[%s4228_s17 + $0x8] sm:$0xff]  ;;  %s4031_s28 = scalar_lea.vmem %s3109_s22, 32  ;;  %p4036_p1 = scmp.lt.s32.totalorder %s3109_s22, %s3109_s22 }
  0x39   :  { %v853_v60 = vld [vmem:[%s4238_s13 + $0x8] sm:$0xff]  ;;  %v854_v62 = vld [vmem:[%s4238_s13 + $0x10] sm:$0xff]  ;;  %v855_v63 = vld [vmem:[%s4238_s13 + $0x18] sm:$0xff]  ;;  %s4960_s13 = sld [smem:[#allocation17_spill]]  ;;  %p4032_p0 = scmp.ne.s32.totalorder %s3109_s22, %s4031_s28 }
  0x3a   :  { %p4037_p2 = scmp.lt.s32.totalorder %s4031_s28, %s4031_s28 }
  0x3b   :  { %3689 = vmatpush3.bf16.msra.mxu1 %v3686_v16 }
  0x3c   :  { %3691 = vmatprep.subr.bf16.mxu1 %v3690_v19  ;;  %p4038_p3 = por %p4037_p2, %p4036_p1 }
  0x3e   :  { %p4039_p4 = pnand %p4038_p3, %p4032_p0 }
  0x3f   :  { %3693 = vmatpush3.bf16.msra.mxu1 %v3690_v19  ;;  %v737_v19 = vld [vmem:[%s4208_s20] sm:$0xff] }
  0x40   :  { %3695 = vmatprep.subr.bf16.mxu1 %v3694_v22  ;;  %v3739_v21 = vpack.c.bf16 %v738_v20, %v737_v19 }
  0x43   :  { %3697 = vmatpush3.bf16.msra.mxu1 %v3694_v22  ;;  %v739_v22 = vld [vmem:[%s4208_s20 + $0x10] sm:$0xff]  ;;  %s4116_s20 = smov 97  }
  0x44   :  { %3699 = vmatprep.subr.bf16.mxu1 %v3698_v25  ;;  %v3743_v24 = vpack.c.bf16 %v740_v23, %v739_v22 }
  0x47   :  { %3701 = vmatpush3.bf16.msra.mxu1 %v3698_v25  ;;  %v4111_v25 = vmov 0.0|0.0  }
  0x48   :  { %3730 = vmatprep.subr.bf16.mxu1 %v4111_v25 }
 0x105   :  { %v3391_v27 = vpop.f32.mrb[0].mxu1 }
 0x106   :  { %v210_v28 = vpop.f32.mrb[1].mxu1 }
 0x107   :  { %231 = vrot.lane.b32.xlu0 %v210_v28, %s4109_s0  ;;  %v3185_v28 = vld [vmem:[%s4193_s30 + $0x1] ss:$0 sm:$0xff]  ;;  %s4964_s30 = sld [smem:[#allocation14_spill]] }
 0x109   :  { %v3394_v29 = vpop.f32.mrb[2].mxu1 }
 0x10a   :  { %v220_v30 = vpop.f32.mrb[3].mxu1 }
 0x10b   :  { %233 = vrot.lane.b32.xlu0 %v3391_v27, %s4109_s0  ;;  %239 = vrot.lane.b32.xlu1 %v220_v30, %s4110_s25  ;;  %v4113_v27 = vmov 0.0  }
 0x10f   :  { %241 = vrot.lane.b32.xlu1 %v3394_v29, %s4110_s25  ;;  %356 = vperm.xlu0 %3911, %v123_v31  }
 0x113   :  { %361 = vperm.xlu1 %3912, %v124_v32  }
 0x179   :  { %v232_v33 = vpop.permute.xlu0 %231 }
 0x17a   :  { %v246_v34 = vsel %vm245_vm1, %v4279_v1, %v232_v33  ;;  %v3180_v1 = vld [vmem:[%s4188_s24 + $0xa0] sm:$0xff] }
 0x17d   :  { %v240_v35 = vpop.permute.xlu1 %239  ;;  %v234_v36 = vpop.permute.xlu0 %233 }
 0x17e   :  { %v249_v37 = vsel %vm248_vm2, %v246_v34, %v240_v35  ;;  %v247_v38 = vsel %vm245_vm1, %v4282_v2, %v234_v36  ;;  %v3181_v2 = vld [vmem:[%s4188_s24 + $0xa8] sm:$0xff] }
 0x17f   :  { %3419 = vmatprep.mubr.msk.f32.mxu1 %vm270_vm3, %v249_v37  ;;  %v3722_v3 = vpack.c.bf16 %v3181_v2, %v3180_v1  ;;  %v653_v37 = vld [vmem:[%s4198_s6] sm:$0xff]  ;;  %v986_v1 = vld [vmem:[%s4228_s17 + $0x18] sm:$0xff]  ;;  %v980_v2 = vld [vmem:[%s4218_s4 + $0x10] sm:$0xff] }
 0x181   :  { %v242_v39 = vpop.permute.xlu1 %241 }
 0x182   :  { %v250_v40 = vsel %vm248_vm2, %v247_v38, %v242_v39  ;;  %v654_v38 = vld [vmem:[%s4198_s6 + $0x8] sm:$0xff] }
 0x183   :  { %3420 = vmatmul.mubr.msk.f32.vlgmr.msra.gmra.mrb[4].mxu1 %vm270_vm3, %v250_v40  ;;  %v577_v40 = vld [vmem:[%s4173_s8] sm:$0x3]  ;;  %s4114_s8 = smov 16  }
 0x184   :  { %3463 = vmatprep.mubr.msk.f32.mxu1 %vm4112_vm4, %v4113_v27 }
 0x18e   :  { %v4335_v48 = vpop.permute.xlu0 %356 }
 0x192   :  { %v4333_v46 = vpop.permute.xlu1 %361 }
 0x256   :  { %v3421_v42 = vpop.f32.mrb[4].mxu1 }
 0x257   :  { %v349_v43 = vadd.f32 %v3421_v42, %v3165_v41  ;;  %v343_v44 = vpop.f32.mrb[5].mxu1  ;;  %v655_v42 = vld [vmem:[%s4198_s6 + $0x10] sm:$0xff] }
 0x258   :  { %v344_v45 = vadd.f32 %v3165_v41, %v343_v44  ;;  %v3734_v41 = vpack.c.bf16 %v654_v38, %v653_v37 }
 0x259   :  { %v353_v47 = vmax.f32 %v349_v43, 0.0  ;;  %v656_v43 = vld [vmem:[%s4198_s6 + $0x18] sm:$0xff]  ;;  %s4965_s6 = sld [smem:[#allocation10_spill]] }
 0x25a   :  { %v352_v49 = vmax.f32 %v344_v45, 0.0  ;;  %v3737_v44 = vpack.c.bf16 %v656_v43, %v655_v42 }
 0x25b   :  { %v365_v50 = vmul.f32 %v4333_v46, %v353_v47  ;;  %v979_v47 = vld [vmem:[%s4218_s4 + $0x8] sm:$0xff] }
 0x25c   :  { %v364_v51 = vmul.f32 %v4335_v48, %v352_v49  ;;  %v3191_v49 = vld [vmem:[%s4213_s27] ss:$0 sm:$0xff]  ;;  %s4966_s27 = sld [smem:[#allocation19_spill]] }
 0x25e   :  { %v3702_v52 = vpack.c.bf16 %v365_v50, %v364_v51 }
 0x260   :  { %3703 = vmatprep.subr.bf16.mxu0 %v3702_v52 }
 0x261   :  { %3705 = vmatpush3.bf16.msra.mxu0 %v3702_v52 }
 0x262   :  { %3707 = vmatprep.subr.bf16.mxu0 %v3706_v56 }
 0x264   :  { %3427 = vmatmul.mubr.msk.f32.vlgmr.msra.gmra.mrb[0].mxu0 %vm131_vm0, %v4290_v5  ;;  %v3183_v5 = vld [vmem:[%s4188_s24 + $0xb8] sm:$0xff]  ;;  %s4963_s24 = sld [smem:[#allocation13_spill]] }
 0x265   :  { %3429 = vmatprep.mubr.msk.f32.mxu0 %vm131_vm0, %v4293_v6  ;;  %3709 = vmatpush3.bf16.msra.mxu0 %v3706_v56  ;;  %v3726_v6 = vpack.c.bf16 %v3183_v5, %v3182_v4  ;;  %v981_v4 = vld [vmem:[%s4218_s4 + $0x18] sm:$0xff] }
 0x266   :  { %3711 = vmatprep.subr.bf16.mxu0 %v3710_v58  ;;  %v4448_v5 = vpack.c.bf16 %v981_v4, %v980_v2 }
 0x268   :  { %3430 = vmatmul.mubr.msk.f32.gmra.mrb[2].mxu0 %vm131_vm0, %v4300_v7 }
 0x269   :  { %3713 = vmatpush3.bf16.msra.mxu0 %v3710_v58  ;;  %v983_v58 = vld [vmem:[%s4228_s17] sm:$0xff] }
 0x26a   :  { %3715 = vmatprep.subr.bf16.mxu0 %v3714_v61 }
 0x26d   :  { %3717 = vmatpush3.bf16.msra.mxu0 %v3714_v61  ;;  %v4431_v61 = vpack.c.bf16 %v984_v59, %v983_v58 }
 0x26e   :  { %3719 = vmatprep.subr.bf16.mxu0 %v3718_v0 }
 0x271   :  { %3721 = vmatpush3.bf16.msra.mxu0 %v3718_v0  ;;  %v985_v0 = vld [vmem:[%s4228_s17 + $0x10] sm:$0xff]  ;;  %s4961_s17 = sld [smem:[#allocation16_spill]] }
 0x272   :  { %3723 = vmatprep.subr.bf16.mxu0 %v3722_v3 }
 0x275   :  { %3725 = vmatpush3.bf16.msra.mxu0 %v3722_v3  ;;  %v4445_v3 = vpack.c.bf16 %v986_v1, %v985_v0 }
 0x276   :  { %3727 = vmatprep.subr.bf16.mxu0 %v3726_v6 }
 0x279   :  { %3729 = vmatpush3.bf16.msra.mxu0 %v3726_v6  ;;  %v995_v6 = vld [vmem:[%s4133_s5] sm:$0x3] }
 0x27a   :  { %3740 = vmatprep.subr.bf16.mxu0 %v3739_v21 }
 0x337   :  { %v3428_v7 = vpop.f32.mrb[0].mxu0 }
 0x338   :  { %455 = vrot.lane.b32.xlu0 %v3428_v7, %s4109_s0  ;;  %v432_v8 = vpop.f32.mrb[1].mxu0  ;;  %v3189_v7 = vld [vmem:[%s4959_s29] ss:$0 sm:$0xff] }
 0x339   :  { %453 = vrot.lane.b32.xlu1 %v432_v8, %s4109_s0 }
 0x33b   :  { %v3431_v9 = vpop.f32.mrb[2].mxu0 }
 0x33c   :  { %463 = vrot.lane.b32.xlu0 %v3431_v9, %s4110_s25  ;;  %v442_v10 = vpop.f32.mrb[3].mxu0 }
 0x33d   :  { %461 = vrot.lane.b32.xlu1 %v442_v10, %s4110_s25 }
 0x3aa   :  { %v456_v11 = vpop.permute.xlu0 %455 }
 0x3ab   :  { %v454_v12 = vpop.permute.xlu1 %453  ;;  %v468_v16 = vsel %vm245_vm1, %v365_v50, %v456_v11 }
 0x3ac   :  { %v467_v14 = vsel %vm245_vm1, %v364_v51, %v454_v12 }
 0x3ae   :  { %v464_v13 = vpop.permute.xlu0 %463 }
 0x3af   :  { %v462_v15 = vpop.permute.xlu1 %461  ;;  %v470_v18 = vsel %vm248_vm2, %v468_v16, %v464_v13 }
 0x3b0   :  { %v469_v17 = vsel %vm248_vm2, %v467_v14, %v462_v15 }
 0x3b1   :  { %3456 = vmatprep.mubr.msk.f32.mxu0 %vm270_vm3, %v469_v17  ;;  %v4461_v17 = vld [vmem:[%s4960_s13] ss:$0 sm:$0xff] }
 0x3b2   :  { %3457 = vmatmul.mubr.msk.f32.vlgmr.msra.gmra.mrb[4].mxu0 %vm270_vm3, %v470_v18 }
 0x3b3   :  { %3742 = vmatpush3.bf16.msra.mxu0 %v3739_v21  ;;  %v4466_v21 = vld [vmem:[%s4961_s17] ss:$0 sm:$0xff] }
 0x3b4   :  { %3744 = vmatprep.subr.bf16.mxu0 %v3743_v24 }
 0x3b7   :  { %3746 = vmatpush3.bf16.msra.mxu0 %v3743_v24 }
 0x3b8   :  { %3753 = vmatprep.subr.bf16.mxu0 %v4111_v25 }
 0x485   :  { %v3458_v29 = vpop.f32.mrb[4].mxu0 }
 0x486   :  { %v570_v30 = vadd.f32 %v3458_v29, %v3185_v28  ;;  %v564_v31 = vpop.f32.mrb[5].mxu0 }
 0x487   :  { %v565_v32 = vadd.f32 %v3185_v28, %v564_v31 }
 0x488   :  { %v574_v33 = vmax.f32 %v570_v30, 0.0 }
 0x489   :  { %v573_v34 = vmax.f32 %v565_v32, 0.0 }
 0x48a   :  { %v4377_v35 = vmul.f32 %v574_v33, %v4333_v46  ;;  %v978_v46 = vld [vmem:[%s4218_s4] sm:$0xff]  ;;  %v955_v33 = vld [vmem:[%s4962_s3 + $0x10] sm:$0xff]  ;;  %s4967_s4 = sld [smem:[#allocation20_spill]] }
 0x48b   :  { %v4380_v36 = vmul.f32 %v573_v34, %v4335_v48  ;;  %v4410_v48 = vpack.c.bf16 %v979_v47, %v978_v46  ;;  %v956_v34 = vld [vmem:[%s4962_s3 + $0x18] sm:$0xff]  ;;  %v953_v46 = vld [vmem:[%s4962_s3] sm:$0xff]  ;;  %v954_v47 = vld [vmem:[%s4962_s3 + $0x8] sm:$0xff] }
 0x48c   :  { %v3918_v37 = vpack.i.bf16 %v956_v34, %v955_v33 }
 0x48d   :  { %3485 = vmatprep.mubr.msk.f32.mxu0 %vm245_vm1, %v4380_v36  ;;  %v3731_v39 = vpack.c.bf16 %v4377_v35, %v4380_v36 }
 0x48e   :  { %3486 = vmatmul.mubr.msk.f32.vlgmr.msra.gmra.mrb[6].mxu0 %vm245_vm1, %v4377_v35 }
 0x48f   :  { %3732 = vmatpush3.bf16.msra.mxu1 %v3731_v39  ;;  %3506 = vmatprep.mubr.msk.f32.mxu0 %vm4112_vm4, %v4113_v27 }
 0x490   :  { %3733 = vmatprep.subr.bf16.mxu1 %v4111_v25  ;;  %3755 = vmatpush3.bf16.msra.mxu0 %v4410_v48 }
 0x491   :  { %3756 = vmatprep.subr.bf16.mxu0 %v4111_v25 }
 0x492   :  { %3464 = vmatmul.mubr.msk.f32.vlgmr.msra.gmra.mrb[6].mxu1 %vm131_vm0, %v577_v40 }
 0x493   :  { %3735 = vmatpush3.bf16.msra.mxu1 %v3734_v41  ;;  %3474 = vmatprep.mubr.msk.f32.mxu1 %vm4112_vm4, %v4113_v27 }
 0x494   :  { %3736 = vmatprep.subr.bf16.mxu1 %v4111_v25  ;;  %3758 = vmatpush3.bf16.msra.mxu0 %v4448_v5 }
 0x495   :  { %3765 = vmatprep.subr.bf16.mxu0 %v4111_v25 }
 0x497   :  { %3738 = vmatpush3.bf16.msra.mxu1 %v3737_v44  ;;  %3507 = vmatmul.mubr.msk.f32.vlgmr.msra.gmra.mrb[8].mxu0 %vm245_vm1, %v995_v6  ;;  %v4509_v6 = vld [vmem:[%s4963_s24] sm:$0x3] }
 0x498   :  { %3749 = vmatprep.subr.msk.bf16.mxu1 %vm4402_vm5, %v3731_v39  ;;  %3528 = vmatprep.mubr.msk.f32.mxu0 %vm4112_vm4, %v4113_v27  ;;  %vm1259_vm7 = vcmp.gt.f32.partialorder %v4509_v6, 0.0 }
 0x561   :  { %v3487_v50 = vpop.f32.mrb[6].mxu0 }
 0x562   :  { %v4415_v51 = vadd.f32 %v3487_v50, %v3191_v49  ;;  %v820_v52 = vpop.f32.mrb[7].mxu0 }
 0x563   :  { %v4417_v53 = vadd.f32 %v3191_v49, %v820_v52  ;;  %v3913_v52 = vpack.i.bf16 %v954_v47, %v953_v46 }
 0x565   :  { %v3923_v55 = vpack.i.bf16 %v4415_v51, %v4417_v53  ;;  %v647_v56 = vpop.f32.mrb[6].mxu1 }
 0x566   :  { %v3465_v57 = vpop.f32.mrb[7].mxu1  ;;  %3475 = vmatmul.mubr.msk.f32.vlgmr.msra.gmra.mrb[8].mxu1 %vm245_vm1, %v647_v56  ;;  %652 = vst.msk [vmem:[#allocation5] sm:$0x3] %vm651_vm6, %v647_v56 }
 0x567   :  { %3752 = vmatpush3.bf16.xpose.msk.msra.mxu1 %vm4402_vm5, %v3731_v39  ;;  %3492 = vmatprep.mubr.msk.f32.mxu1 %vm245_vm1, %v852_v54 }
 0x568   :  { %3759 = vmatprep.subr.bf16.mxu1 %v4111_v25 }
 0x56a   :  { %v1072_v15 = vpop.f32.mrb[8].mxu0 }
 0x56b   :  { %v3508_v16 = vpop.f32.mrb[9].mxu0  ;;  %v4469_v22 = vadd.f32 %v4466_v21, %v1072_v15 }
 0x56e   :  { %3493 = vmatmul.mubr.msk.f32.vlgmr.msra.gmra.mrb[10].mxu1 %vm245_vm1, %v853_v60 }
 0x56f   :  { %3761 = vmatpush3.bf16.msra.mxu1 %v4431_v61  ;;  %3495 = vmatprep.mubr.msk.f32.mxu1 %vm245_vm1, %v854_v62 }
 0x570   :  { %3762 = vmatprep.subr.bf16.mxu1 %v4111_v25 }
 0x572   :  { %3496 = vmatmul.mubr.msk.f32.gmra.mrb[12].mxu1 %vm245_vm1, %v855_v63 }
 0x573   :  { %3517 = vmatprep.mubr.msk.f32.mxu1 %vm4112_vm4, %v4113_v27  ;;  %3764 = vmatpush3.bf16.msra.mxu1 %v4445_v3 }
 0x639   :  { %v733_v8 = vpop.f32.mrb[8].mxu1 }
 0x63a   :  { %v734_v9 = vadd.f32 %v3189_v7, %v733_v8  ;;  %v3476_v10 = vpop.f32.mrb[9].mxu1 }
 0x63c   :  { %3518 = vmatmul.mubr.msk.f32.vlgmr.msra.gmra.mrb[14].mxu1 %vm245_vm1, %v734_v9 }
 0x63d   :  { %1355 = vmatprep.mubr.f32.mxu1 %v4113_v27 }
 0x641   :  { %v3494_v11 = vpop.f32.mrb[10].mxu1 }
 0x642   :  { %v934_v12 = vpop.f32.mrb[11].mxu1 }
 0x645   :  { %v3497_v13 = vpop.f32.mrb[12].mxu1 }
 0x646   :  { %v944_v14 = vpop.f32.mrb[13].mxu1 }
 0x70f   :  { %v1151_v18 = vpop.f32.mrb[14].mxu1 }
 0x710   :  { %v1152_v19 = vadd.f32 %v4461_v17, %v1151_v18  ;;  %v3519_v20 = vpop.f32.mrb[15].mxu1  ;;  %v829_v18 = vld [vmem:[%s4964_s30] sm:$0xff] }
 0x712   :  { %1163 = vrot.lane.b32.xlu1 %v1152_v19, %s4110_s25  ;;  %v1155_v23 = vadd.f32 %v1152_v19, %v4469_v22  ;;  %v830_v19 = vld [vmem:[%s4964_s30 + $0x8] sm:$0xff] }
 0x713   :  { %v3928_v20 = vpack.i.bf16 %v830_v19, %v829_v18 }
 0x714   :  { %v3204_v24 = vmul.f32 -1.442695, %v1155_v23 }
 0x716   :  { %3943 = vpow2.f32 %v3204_v24 }
 0x720   :  { %v3944_v28 = vpop.eup %3943 }
 0x721   :  { %v1159_v29 = vadd.f32 1.0, %v3944_v28 }
 0x723   :  { %3945 = vrcp.f32 %v1159_v29  ;;  %v1275_v29 = vld [vmem:[%s4965_s6] sm:$0x3] }
 0x72d   :  { %v3946_v30 = vpop.eup %3945 }
 0x72e   :  { %v1173_v54 = vsub.f32 1.0, %v3946_v30 }
 0x784   :  { %v1164_v31 = vpop.permute.xlu1 %1163 }
 0x785   :  { %v1166_v32 = vmul.f32 %v3946_v30, %v1164_v31 }
 0x787   :  { %1168 = vrot.lane.b32.xlu0 %v1166_v32, %s4110_s25 }
 0x78b   :  { %1179 = vrot.lane.b32.xlu0 %v734_v9, %s4109_s0 }
 0x78f   :  { %3919 = vrot.lane.b32.xlu0 %v3918_v37, %s4114_s8 }
 0x7f9   :  { %v1169_v38 = vpop.permute.xlu0 %1168 }
 0x7fa   :  { %v1171_v39 = vadd.f32 %v1169_v38, %v4469_v22 }
 0x7fc   :  { %3947 = vtanh.f32 %v1171_v39  ;;  %v3209_v39 = vld [vmem:[%s4966_s27] ss:$0 sm:$0xff] }
 0x7fd   :  { %v1180_v40 = vpop.permute.xlu0 %1179 }
 0x7fe   :  { %v1182_v57 = vmul.f32 %v3946_v30, %v1180_v40 }
 0x801   :  { %v3920_v41 = vpop.permute.xlu0 %3919 }
 0x802   :  { %v3922_v42 = vunpack.i.h.bf16 %v3920_v41  ;;  %v3921_v43 = vunpack.i.l.bf16 %v3920_v41 }
 0x804   :  { %v976_v44 = vsel %vm131_vm0, %v3497_v13, %v3922_v42  ;;  %v975_v45 = vsel %vm131_vm0, %v944_v14, %v3921_v43 }
 0x805   :  { %v4482_v49 = vpack.c.bf16 %v976_v44, %v975_v45 }
 0x806   :  { %v3948_v50 = vpop.eup %3947 }
 0x807   :  { %1175 = vrot.lane.b32.xlu1 %v3948_v50, %s4115_s14 }
 0x80b   :  { %3914 = vrot.lane.b32.xlu1 %v3913_v52, %s4114_s8 }
 0x879   :  { %v1176_v56 = vpop.permute.xlu1 %1175 }
 0x87a   :  { %v1178_v58 = vmul.f32 %v1176_v56, %v1173_v54  ;;  %v3207_v54 = vld [vmem:[#allocation2] ss:$0 sm:$0xff]  ;;  %v4118_v56 = vmov 64  }
 0x87b   :  { %3933 = vset.pattern.permute.xlu1 %v4118_v56  ;;  %3934 = vset.pattern.permute.xlu0 %v4118_v56 }
 0x87c   :  { %v4486_v59 = vadd.f32 %v1182_v57, %v1178_v58  ;;  %v990_v57 = vld [vmem:[%s4967_s4] sm:$0xff]  ;;  %v991_v58 = vld [vmem:[%s4967_s4 + $0x8] sm:$0xff] }
 0x87d   :  { %v3915_v60 = vpop.permute.xlu1 %3914 }
 0x87e   :  { %v3917_v62 = vunpack.i.h.bf16 %v3915_v60  ;;  %v3916_v63 = vunpack.i.l.bf16 %v3915_v60  ;;  %1185 = vrot.lane.b32.xlu1 %v4486_v59, %s4115_s14  ;;  %v992_v60 = vld [vmem:[%s4967_s4 + $0x10] sm:$0xff] }
 0x880   :  { %v974_v0 = vsel %vm131_vm0, %v3494_v11, %v3917_v62  ;;  %v973_v1 = vsel %vm131_vm0, %v934_v12, %v3916_v63  ;;  %v4565_v62 = vpack.c.bf16 %v991_v58, %v990_v57  ;;  %v993_v63 = vld [vmem:[%s4967_s4 + $0x18] sm:$0xff] }
 0x881   :  { %v4492_v2 = vpack.c.bf16 %v974_v0, %v973_v1  ;;  %v4569_v0 = vpack.c.bf16 %v993_v63, %v992_v60 }
 0x883   :  { %3767 = vmatpush3.bf16.msra.mxu0 %v4492_v2 }
 0x884   :  { %3768 = vmatprep.subr.bf16.mxu0 %v4111_v25 }
 0x887   :  { %3770 = vmatpush3.bf16.msra.mxu0 %v4482_v49 }
 0x888   :  { %3781 = vmatprep.subr.bf16.mxu0 %v4111_v25 }
 0x8f0   :  { %v4498_v4 = vpop.permute.xlu1 %1185 }
 0x8f1   :  { %3529 = vmatmul.mubr.msk.f32.vlgmr.msra.gmra.mrb[10].mxu0 %vm245_vm1, %v4498_v4 }
 0x8f2   :  { %3783 = vmatpush3.bf16.msra.mxu0 %v4410_v48  ;;  %3550 = vmatprep.mubr.msk.f32.mxu0 %vm4112_vm4, %v4113_v27 }
 0x8f3   :  { %3784 = vmatprep.subr.bf16.mxu0 %v4111_v25 }
 0x8f6   :  { %3786 = vmatpush3.bf16.msra.mxu0 %v4448_v5 }
 0x8f7   :  { %3793 = vmatprep.subr.bf16.mxu0 %v4111_v25 }
 0x9c4   :  { %v4512_v7 = vpop.f32.mrb[10].mxu0 }
 0x9c5   :  { %v3530_v8 = vpop.f32.mrb[11].mxu0  ;;  %v1260_v9 = vsel %vm1259_vm7, %v4512_v7, -1e+09 }
 0x9c6   :  { %v1262_v10 = vsel %vm1261_vm8, %v1260_v9, -inf }
 0x9c7   :  { %1263 = vmax.xlane.f32.xlu0 %v1262_v10 }
 0xa54   :  { %v1264_v11 = vpop.xlane.xlu0 %1263 }
 0xa55   :  { %v1265_v12 = vsub.f32 %v1260_v9, %v1264_v11 }
 0xa57   :  { %v1266_v13 = vmul.f32 1.442695, %v1265_v12 }
 0xa59   :  { %3949 = vpow2.f32 %v1266_v13 }
 0xa63   :  { %v3950_v14 = vpop.eup %3949 }
 0xa64   :  { %v1268_v15 = vmul.f32 %v3950_v14, %v4509_v6 }
 0xa66   :  { %v1269_v16 = vsel %vm1261_vm8, %v1268_v15, 0.0 }
 0xa67   :  { %1270 = vadd.xlane.f32.xlu1 %v1269_v16 }
 0xa78   :  { %3929 = vrot.lane.b32.xlu1 %v3928_v20, %s4116_s20 }
 0xaf4   :  { %v1271_v23 = vpop.xlane.xlu1 %1270 }
 0xaf5   :  { %v1272_v24 = vadd.f32 1e-09, %v1271_v23  ;;  %v1545_v23 = vld [vmem:[%s4968_s7] sm:$0x3] }
 0xaf6   :  { %vm1546_vm11 = vcmp.gt.f32.partialorder %v1545_v23, 0.5 }
 0xaf7   :  { %3951 = vrcp.f32 %v1272_v24 }
 0xaf8   :  { %v3930_v33 = vpop.permute.xlu1 %3929 }
 0xaf9   :  { %v3932_v34 = vunpack.i.h.bf16 %v3930_v33  ;;  %v3931_v37 = vunpack.i.l.bf16 %v3930_v33 }
 0xafb   :  { %v4531_v38 = vpack.c.bf16 %v3932_v34, %v3931_v37 }
 0xafd   :  { %3772 = vmatprep.subr.bf16.mxu1 %v4531_v38 }
 0xb01   :  { %v3952_v28 = vpop.eup %3951 }
 0xb02   :  { %v4523_v30 = vmul.f32 %v3952_v28, %v1268_v15 }
 0xb04   :  { %v1276_v31 = vmul.f32 %v1275_v29, %v4523_v30  ;;  %v1543_v29 = vld [vmem:[%s4969_s11] sm:$0x3] }
 0xb05   :  { %vm1544_vm12 = vcmp.gt.f32.partialorder %v1543_v29, 0.5 }
 0xb06   :  { %v1277_v32 = vsel %vm1261_vm8, %v1276_v31, 0.0  ;;  %v1553_v33 = vsel %vm1544_vm12, 1, %v4108_v26 }
 0xb07   :  { %1278 = vadd.xlane.f32.xlu0 %v1277_v32 }
 0xb1d   :  { %3924 = vrot.lane.b32.xlu0 %v3923_v55, %s4109_s0 }
 0xb21   :  { %1397 = vrot.lane.b32.xlu0 %v3209_v39, %s4114_s8 }
 0xb25   :  { %1368 = vrot.lane.b32.xlu0 %v4469_v22, %s4115_s14 }
 0xb94   :  { %v1279_v40 = vpop.xlane.xlu0 %1278 }
 0xb95   :  { %v1280_v41 = vadd.f32 1e-09, %v1279_v40 }
 0xb97   :  { %3953 = vrcp.f32 %v1280_v41 }
 0xb98   :  { %v3925_v42 = vpop.permute.xlu0 %3924 }
 0xb99   :  { %v3927_v43 = vunpack.i.h.bf16 %v3925_v42  ;;  %v3926_v44 = vunpack.i.l.bf16 %v3925_v42  ;;  %v1535_v42 = vld [vmem:[%s4970_s15] sm:$0x3] }
 0xb9b   :  { %v848_v51 = vsel %vm245_vm1, %v4377_v35, %v3927_v43  ;;  %v847_v53 = vsel %vm245_vm1, %v4380_v36, %v3926_v44 }
 0xb9c   :  { %v851_v55 = vsel %vm849_vm9, %v848_v51, %v3932_v34  ;;  %v850_v45 = vsel %vm849_vm9, %v847_v53, %v3931_v37  ;;  %v4574_v1 = vpop.permute.xlu0 %1397 }
 0xb9d   :  { %v4542_v46 = vpack.c.bf16 %v851_v55, %v850_v45  ;;  %v3212_v45 = vld [vmem:[%s4133_s5 + $0x2] sm:$0x3] }
 0xb9f   :  { %3774 = vmatpush1.bf16.msra.mxu1 %v4542_v46 }
 0xba0   :  { %3775 = vmatprep.subr.bf16.mxu1 %v4111_v25  ;;  %v1369_v13 = vpop.permute.xlu0 %1368 }
 0xba1   :  { %v3954_v22 = vpop.eup %3953 }
 0xba2   :  { %v1282_v47 = vmul.f32 %v3954_v22, %v1276_v31  ;;  %v1547_v31 = vsel %vm1546_vm11, 1, %v4108_v26 }
 0xba4   :  { %v1284_v50 = vrot.slane %v1282_v47, 6 }
 0xba6   :  { %v1287_v35 = vsel %vm1286_vm10, %v4523_v30, %v1284_v50 }
 0xba7   :  { %3206 = vmatmul.mubr.msk.f32.vlgmr.msra.gmra.mrb[16].mxu1 %vm131_vm0, %v1287_v35 }
 0xba8   :  { %3539 = vmatprep.mubr.msk.f32.mxu1 %vm4112_vm4, %v4113_v27  ;;  %3777 = vmatpush3.bf16.msra.mxu1 %v4565_v62 }
 0xba9   :  { %3778 = vmatprep.subr.bf16.mxu1 %v4111_v25 }
 0xbac   :  { %3780 = vmatpush3.bf16.msra.mxu1 %v4569_v0 }
 0xbad   :  { %3787 = vmatprep.subr.bf16.mxu1 %v4111_v25 }
 0xc7a   :  { %v4551_v36 = vpop.f32.mrb[16].mxu1 }
 0xc7b   :  { %1388 = vrot.lane.b32.xlu1 %v4551_v36, %s4117_s10  ;;  %v4555_v52 = vpop.f32.mrb[17].mxu1  ;;  %v1537_v32 = vrot.slane %v4551_v36, 2 }
 0xc7f   :  { %1363 = vrot.lane.b32.xlu1 %v4512_v7, %s4114_s8 }
 0xc83   :  { %1377 = vrot.lane.b32.xlu1 %v3207_v54, %s4110_s25 }
 0xced   :  { %v1389_v8 = vpop.permute.xlu1 %1388 }
 0xcee   :  { %v1391_v9 = vadd.f32 %v1389_v8, %v4512_v7 }
 0xcf0   :  { %v1400_v10 = vadd.f32 %v4574_v1, %v1391_v9 }
 0xcf1   :  { %v1364_v11 = vpop.permute.xlu1 %1363 }
 0xcf2   :  { %3955 = vtanh.f32 %v1400_v10  ;;  %v1366_v12 = vadd.f32 %v1364_v11, %v4551_v36 }
 0xcf4   :  { %v1371_v14 = vadd.f32 %v1369_v13, %v1366_v12 }
 0xcf5   :  { %v4579_v15 = vpop.permute.xlu1 %1377 }
 0xcf6   :  { %v1380_v16 = vadd.f32 %v4579_v15, %v1371_v14 }
 0xcf8   :  { %v3208_v18 = vmul.f32 -1.442695, %v1380_v16 }
 0xcfa   :  { %3957 = vpow2.f32 %v3208_v18 }
 0xcfc   :  { %v3956_v19 = vpop.eup %3955 }
 0xcfd   :  { %1409 = vrot.lane.b32.xlu0 %v3956_v19, %s4117_s10 }
 0xd04   :  { %v3958_v7 = vpop.eup %3957 }
 0xd05   :  { %v1384_v20 = vadd.f32 1.0, %v3958_v7 }
 0xd07   :  { %3959 = vrcp.f32 %v1384_v20 }
 0xd11   :  { %v3960_v24 = vpop.eup %3959 }
 0xd12   :  { %1497 = vperm.xlu1 %3933, %v3960_v24   ;;  %v1501_v28 = vsub.f32 1.0, %v3960_v24 }
 0xd14   :  { %1504 = vperm.xlu0 %3934, %v1501_v28  }
 0xd16   :  { %3935 = vset.pattern.permute.xlu1 %v4108_v26 }
 0xd17   :  { %1549 = vperm.xlu1 %3935, %v1547_v31  }
 0xd18   :  { %1538 = vrot.lane.b32.xlu0 %v1537_v32, %s4119_s16 }
 0xd1b   :  { %1555 = vperm.xlu1 %3935, %v1553_v33  }
 0xd1f   :  { %3936 = vset.pattern.permute.xlu1 %v4118_v56 }
 0xd6f   :  { %v1410_v34 = vpop.permute.xlu0 %1409 }
 0xd70   :  { %3540 = vmatmul.mubr.msk.f32.vlgmr.msra.gmra.mrb[18].mxu1 %vm245_vm1, %v1410_v34 }
 0xd71   :  { %3789 = vmatpush3.bf16.msra.mxu1 %v4431_v61  ;;  %3561 = vmatprep.mubr.msk.f32.mxu1 %vm4112_vm4, %v4113_v27 }
 0xd72   :  { %3790 = vmatprep.subr.bf16.mxu1 %v4111_v25 }
 0xd75   :  { %3792 = vmatpush3.bf16.msra.mxu1 %v4445_v3 }
 0xd76   :  { %3800 = vmatprep.subr.bf16.mxu1 %v4531_v38 }
 0xd78   :  { %3562 = vmatmul.mubr.msk.f32.vlgmr.msra.gmra.mrb[20].mxu1 %vm245_vm1, %v4498_v4 }
 0xd79   :  { %3802 = vmatpush1.bf16.msra.mxu1 %v4542_v46  ;;  %1900 = vmatprep.mubr.f32.mxu1 %v4113_v27 }
 0xd7a   :  { %3809 = vmatprep.subr.bf16.mxu1 %v4111_v25 }
 0xd91   :  { %v4603_v37 = vpop.permute.xlu1 %1497 }
 0xd92   :  { %v1536_v4 = vmul.f32 %v1535_v42, %v4603_v37 }
 0xd93   :  { %v1505_v39 = vpop.permute.xlu0 %1504 }
 0xd94   :  { %v4606_v40 = vmul.f32 %v1505_v39, %v4551_v36  ;;  %v4609_v41 = vmul.f32 %v1505_v39, %v4555_v52 }
 0xd96   :  { %v1550_v43 = vpop.permute.xlu1 %1549 }
 0xd97   :  { %v1539_v44 = vpop.permute.xlu0 %1538  ;;  %vm1551_vm13 = vcmp.eq.s32.totalorder %v1550_v43, 1 }
 0xd98   :  { %v1541_v51 = vmul.f32 %v1539_v44, %v1505_v39 }
 0xd9a   :  { %v1542_v53 = vadd.f32 %v1541_v51, %v1536_v4  ;;  %v1556_v55 = vpop.permute.xlu1 %1555 }
 0xd9b   :  { %vm1557_vm14 = vcmp.eq.s32.totalorder %v1556_v55, 1 }
 0xd9c   :  { %v1552_v22 = vsel %vm1551_vm13, %v1539_v44, %v1542_v53 }
 0xd9d   :  { %v1558_v47 = vsel %vm1557_vm14, %v1535_v42, %v1552_v22 }
 0xd9e   :  { %v1561_v50 = vadd.f32 %v3212_v45, %v1558_v47  ;;  %v3217_v45 = vld [vmem:[%s4965_s6 + $0x2] sm:$0x3] }
 0xda0   :  { %3551 = vmatmul.mubr.msk.f32.vlgmr.msra.gmra.mrb[12].mxu0 %vm245_vm1, %v1561_v50 }
 0xda1   :  { %3795 = vmatpush3.bf16.msra.mxu0 %v4492_v2  ;;  %3572 = vmatprep.mubr.msk.f32.mxu0 %vm4112_vm4, %v4113_v27 }
 0xda2   :  { %3796 = vmatprep.subr.bf16.mxu0 %v4111_v25 }
 0xda5   :  { %3798 = vmatpush3.bf16.msra.mxu0 %v4482_v49 }
 0xda6   :  { %3803 = vmatprep.subr.bf16.mxu0 %v4111_v25 }
 0xe43   :  { %v4621_v35 = vpop.f32.mrb[18].mxu1 }
 0xe44   :  { %v3541_v36 = vpop.f32.mrb[19].mxu1 }
 0xe4b   :  { %v1701_v52 = vpop.f32.mrb[20].mxu1 }
 0xe4c   :  { %v1702_v54 = vadd.f32 %v4461_v17, %v1701_v52  ;;  %v3563_v57 = vpop.f32.mrb[21].mxu1 }
 0xe4e   :  { %1713 = vrot.lane.b32.xlu1 %v1702_v54, %s4110_s25 }
 0xe73   :  { %v1631_v58 = vpop.f32.mrb[12].mxu0 }
 0xe74   :  { %v3552_v60 = vpop.f32.mrb[13].mxu0  ;;  %v4626_v63 = vadd.f32 %v4466_v21, %v1631_v58 }
 0xe76   :  { %v1705_v8 = vadd.f32 %v1702_v54, %v4626_v63 }
 0xe78   :  { %v3215_v9 = vmul.f32 -1.442695, %v1705_v8 }
 0xe7a   :  { %3961 = vpow2.f32 %v3215_v9 }
 0xe84   :  { %v3962_v10 = vpop.eup %3961 }
 0xe85   :  { %v1709_v11 = vadd.f32 1.0, %v3962_v10 }
 0xe87   :  { %3963 = vrcp.f32 %v1709_v11 }
 0xe91   :  { %v3964_v12 = vpop.eup %3963 }
 0xe92   :  { %v1723_v7 = vsub.f32 1.0, %v3964_v12  ;;  %v1729_v23 = vmul.f32 %v3964_v12, %v4486_v59 }
 0xec0   :  { %v1714_v13 = vpop.permute.xlu1 %1713 }
 0xec1   :  { %v1716_v14 = vmul.f32 %v3964_v12, %v1714_v13 }
 0xec3   :  { %1718 = vrot.lane.b32.xlu0 %v1716_v14, %s4110_s25 }
 0xf35   :  { %v1719_v16 = vpop.permute.xlu0 %1718 }
 0xf36   :  { %v1721_v18 = vadd.f32 %v1719_v16, %v4626_v63 }
 0xf38   :  { %3965 = vtanh.f32 %v1721_v18 }
 0xf42   :  { %v3966_v19 = vpop.eup %3965 }
 0xf43   :  { %1725 = vrot.lane.b32.xlu1 %v3966_v19, %s4115_s14 }
 0xfb5   :  { %v1726_v20 = vpop.permute.xlu1 %1725 }
 0xfb6   :  { %v1728_v24 = vmul.f32 %v1726_v20, %v1723_v7 }
 0xfb8   :  { %v4633_v28 = vadd.f32 %v1729_v23, %v1728_v24  ;;  %v3223_v24 = vld [vmem:[%s4968_s7 + $0x2] sm:$0x3] }
 0xfb9   :  { %vm2068_vm15 = vcmp.gt.f32.partialorder %v3223_v24, 0.5 }
 0xfba   :  { %1732 = vrot.lane.b32.xlu0 %v4633_v28, %s4115_s14 }
0x102c   :  { %v4637_v29 = vpop.permute.xlu0 %1732 }
0x102d   :  { %3573 = vmatmul.mubr.msk.f32.vlgmr.msra.gmra.mrb[14].mxu0 %vm245_vm1, %v4637_v29 }
0x102e   :  { %3805 = vmatpush3.bf16.msra.mxu0 %v4565_v62  ;;  %3583 = vmatprep.mubr.msk.f32.mxu0 %vm4112_vm4, %v4113_v27 }
0x102f   :  { %3806 = vmatprep.subr.bf16.mxu0 %v4111_v25 }
0x1032   :  { %3808 = vmatpush3.bf16.msra.mxu0 %v4569_v0 }
0x1033   :  { %3815 = vmatprep.subr.bf16.mxu0 %v4111_v25 }
0x1100   :  { %v1802_v59 = vpop.f32.mrb[14].mxu0 }
0x1101   :  { %v3574_v31 = vpop.f32.mrb[15].mxu0  ;;  %v1806_v32 = vsel %vm1259_vm7, %v1802_v59, -1e+09 }
0x1102   :  { %v1807_v33 = vsel %vm1261_vm8, %v1806_v32, -inf }
0x1103   :  { %1808 = vmax.xlane.f32.xlu1 %v1807_v33  ;;  %v2069_v33 = vsel %vm2068_vm15, 1, %v4108_v26 }
0x1190   :  { %v1809_v34 = vpop.xlane.xlu1 %1808 }
0x1191   :  { %v1810_v39 = vsub.f32 %v1806_v32, %v1809_v34 }
0x1193   :  { %v1811_v42 = vmul.f32 1.442695, %v1810_v39 }
0x1195   :  { %3967 = vpow2.f32 %v1811_v42 }
0x119f   :  { %v3968_v43 = vpop.eup %3967 }
0x11a0   :  { %v1813_v44 = vmul.f32 %v3968_v43, %v4509_v6 }
0x11a2   :  { %v1814_v4 = vsel %vm1261_vm8, %v1813_v44, 0.0 }
0x11a3   :  { %1815 = vadd.xlane.f32.xlu0 %v1814_v4 }
0x1230   :  { %v1816_v51 = vpop.xlane.xlu0 %1815 }
0x1231   :  { %v1817_v53 = vadd.f32 1e-09, %v1816_v51 }
0x1233   :  { %3969 = vrcp.f32 %v1817_v53 }
0x123d   :  { %v3970_v55 = vpop.eup %3969 }
0x123e   :  { %v4653_v22 = vmul.f32 %v3970_v55, %v1813_v44  ;;  %v3221_v55 = vld [vmem:[%s4970_s15 + $0x2] sm:$0x3] }
0x1240   :  { %v1822_v47 = vmul.f32 %v3217_v45, %v4653_v22 }
0x1242   :  { %v1823_v50 = vsel %vm1261_vm8, %v1822_v47, 0.0 }
0x1243   :  { %1824 = vadd.xlane.f32.xlu0 %v1823_v50 }
0x1259   :  { %1908 = vrot.lane.b32.xlu0 %v1802_v59, %s4114_s8 }
0x12d0   :  { %v1825_v36 = vpop.xlane.xlu0 %1824 }
0x12d1   :  { %v1826_v52 = vadd.f32 1e-09, %v1825_v36 }
0x12d3   :  { %3971 = vrcp.f32 %v1826_v52  ;;  %v3224_v52 = vld [vmem:[%s4133_s5 + $0x4] sm:$0x3] }
0x12d4   :  { %v1909_v12 = vpop.permute.xlu0 %1908 }
0x12dd   :  { %v3972_v54 = vpop.eup %3971 }
0x12de   :  { %v1828_v57 = vmul.f32 %v3972_v54, %v1822_v47 }
0x12e0   :  { %v1830_v58 = vrot.slane %v1828_v57, 6 }
0x12e2   :  { %v1832_v60 = vsel %vm1286_vm10, %v4653_v22, %v1830_v58 }
0x12e3   :  { %3218 = vmatmul.mubr.msk.f32.vlgmr.msra.gmra.mrb[22].mxu1 %vm131_vm0, %v1832_v60 }
0x12e4   :  { %3811 = vmatpush3.bf16.msra.mxu1 %v4410_v48  ;;  %3594 = vmatprep.mubr.msk.f32.mxu1 %vm4112_vm4, %v4113_v27 }
0x12e5   :  { %3812 = vmatprep.subr.bf16.mxu1 %v4111_v25 }
0x12e8   :  { %3814 = vmatpush3.bf16.msra.mxu1 %v4448_v5 }
0x12e9   :  { %3821 = vmatprep.subr.bf16.mxu1 %v4111_v25 }
0x13b6   :  { %v1902_v8 = vpop.f32.mrb[22].mxu1 }
0x13b7   :  { %1925 = vrot.lane.b32.xlu1 %v1902_v8, %s4117_s10  ;;  %v1904_v9 = vpop.f32.mrb[23].mxu1  ;;  %v1911_v14 = vadd.f32 %v1909_v12, %v1902_v8  ;;  %v2057_v39 = vrot.slane %v1902_v8, 2 }
0x13bb   :  { %1913 = vrot.lane.b32.xlu1 %v4626_v63, %s4115_s14 }
0x1429   :  { %v1926_v10 = vpop.permute.xlu1 %1925 }
0x142a   :  { %v1928_v11 = vadd.f32 %v1926_v10, %v1802_v59  ;;  %v3222_v59 = vld [vmem:[%s4969_s11 + $0x2] sm:$0x3] }
0x142b   :  { %vm2065_vm2 = vcmp.gt.f32.partialorder %v3222_v59, 0.5 }
0x142c   :  { %v1929_v13 = vadd.f32 %v1928_v11, %v4574_v1  ;;  %v2075_v34 = vsel %vm2065_vm2, 1, %v4108_v26 }
0x142d   :  { %v1914_v16 = vpop.permute.xlu1 %1913 }
0x142e   :  { %3973 = vtanh.f32 %v1929_v13  ;;  %v1916_v18 = vadd.f32 %v1914_v16, %v1911_v14 }
0x1430   :  { %v1917_v19 = vadd.f32 %v1916_v18, %v4579_v15 }
0x1432   :  { %v3219_v7 = vmul.f32 -1.442695, %v1917_v19 }
0x1434   :  { %3975 = vpow2.f32 %v3219_v7 }
0x1438   :  { %v3974_v20 = vpop.eup %3973 }
0x1439   :  { %1932 = vrot.lane.b32.xlu1 %v3974_v20, %s4117_s10 }
0x143e   :  { %v3976_v23 = vpop.eup %3975 }
0x143f   :  { %v1921_v63 = vadd.f32 1.0, %v3976_v23 }
0x1441   :  { %3977 = vrcp.f32 %v1921_v63 }
0x144b   :  { %v3978_v31 = vpop.eup %3977 }
0x144c   :  { %2020 = vperm.xlu0 %3934, %v3978_v31   ;;  %v2024_v32 = vsub.f32 1.0, %v3978_v31 }
0x144e   :  { %2027 = vperm.xlu1 %3936, %v2024_v32  }
0x1450   :  { %3937 = vset.pattern.permute.xlu0 %v4108_v26 }
0x1451   :  { %2071 = vperm.xlu0 %3937, %v2069_v33  }
0x1452   :  { %3938 = vset.pattern.permute.xlu1 %v4108_v26 }
0x1453   :  { %2077 = vperm.xlu1 %3938, %v2075_v34  }
0x1455   :  { %3940 = vset.pattern.permute.xlu0 %v4118_v56 }
0x1457   :  { %2058 = vrot.lane.b32.xlu1 %v2057_v39, %s4119_s16 }
0x1458   :  { %3939 = vset.pattern.permute.xlu1 %v4118_v56 }
0x14ab   :  { %v1933_v42 = vpop.permute.xlu1 %1932 }
0x14ac   :  { %3584 = vmatmul.mubr.msk.f32.vlgmr.msra.gmra.mrb[16].mxu0 %vm245_vm1, %v1933_v42 }
0x14ad   :  { %3817 = vmatpush3.bf16.msra.mxu0 %v4431_v61  ;;  %3605 = vmatprep.mubr.msk.f32.mxu0 %vm4112_vm4, %v4113_v27 }
0x14ae   :  { %3818 = vmatprep.subr.bf16.mxu0 %v4111_v25 }
0x14b1   :  { %3820 = vmatpush3.bf16.msra.mxu0 %v4445_v3 }
0x14b2   :  { %3828 = vmatprep.subr.bf16.mxu0 %v4531_v38 }
0x14b4   :  { %3606 = vmatmul.mubr.msk.f32.vlgmr.msra.gmra.mrb[18].mxu0 %vm245_vm1, %v4637_v29 }
0x14b5   :  { %3830 = vmatpush1.bf16.msra.mxu0 %v4542_v46  ;;  %2422 = vmatprep.mubr.f32.mxu0 %v4113_v27 }
0x14b6   :  { %3837 = vmatprep.subr.bf16.mxu0 %v4111_v25 }
0x14cb   :  { %v4698_v51 = vpop.permute.xlu0 %2020 }
0x14cc   :  { %v2056_v29 = vmul.f32 %v3221_v55, %v4698_v51 }
0x14cd   :  { %v2028_v43 = vpop.permute.xlu1 %2027 }
0x14ce   :  { %v4694_v44 = vmul.f32 %v2028_v43, %v1902_v8  ;;  %v4696_v4 = vmul.f32 %v2028_v43, %v1904_v9 }
0x14d0   :  { %v2072_v45 = vpop.permute.xlu0 %2071 }
0x14d1   :  { %vm2073_vm3 = vcmp.eq.s32.totalorder %v2072_v45, 1 }
0x14d2   :  { %v2078_v53 = vpop.permute.xlu1 %2077 }
0x14d3   :  { %vm2079_vm5 = vcmp.eq.s32.totalorder %v2078_v53, 1 }
0x14d6   :  { %v2059_v47 = vpop.permute.xlu1 %2058 }
0x14d7   :  { %v2061_v50 = vmul.f32 %v2059_v47, %v2028_v43 }
0x14d9   :  { %v2062_v36 = vadd.f32 %v2061_v50, %v2056_v29 }
0x14db   :  { %v2074_v54 = vsel %vm2073_vm3, %v2059_v47, %v2062_v36 }
0x14dc   :  { %v2080_v57 = vsel %vm2079_vm5, %v3221_v55, %v2074_v54 }
0x14dd   :  { %v2083_v58 = vadd.f32 %v3224_v52, %v2080_v57 }
0x14df   :  { %3595 = vmatmul.mubr.msk.f32.vlgmr.msra.gmra.mrb[24].mxu1 %vm245_vm1, %v2083_v58 }
0x14e0   :  { %3823 = vmatpush3.bf16.msra.mxu1 %v4492_v2  ;;  %3616 = vmatprep.mubr.msk.f32.mxu1 %vm4112_vm4, %v4113_v27 }
0x14e1   :  { %3824 = vmatprep.subr.bf16.mxu1 %v4111_v25 }
0x14e4   :  { %3826 = vmatpush3.bf16.msra.mxu1 %v4482_v49 }
0x14e5   :  { %3831 = vmatprep.subr.bf16.mxu1 %v4111_v25 }
0x157f   :  { %v4710_v60 = vpop.f32.mrb[16].mxu0 }
0x1580   :  { %v3585_v8 = vpop.f32.mrb[17].mxu0 }
0x1587   :  { %v2223_v9 = vpop.f32.mrb[18].mxu0 }
0x1588   :  { %v2224_v10 = vadd.f32 %v4461_v17, %v2223_v9  ;;  %v3607_v11 = vpop.f32.mrb[19].mxu0  ;;  %v3229_v9 = vld [vmem:[%s4965_s6 + $0x4] sm:$0x3] }
0x158a   :  { %2235 = vrot.lane.b32.xlu0 %v2224_v10, %s4110_s25 }
0x15b2   :  { %v2153_v12 = vpop.f32.mrb[24].mxu1 }
0x15b3   :  { %v3596_v13 = vpop.f32.mrb[25].mxu1  ;;  %v2154_v14 = vadd.f32 %v4466_v21, %v2153_v12 }
0x15b5   :  { %v2227_v16 = vadd.f32 %v2224_v10, %v2154_v14 }
0x15b7   :  { %v3227_v18 = vmul.f32 -1.442695, %v2227_v16 }
0x15b9   :  { %3979 = vpow2.f32 %v3227_v18 }
0x15c3   :  { %v3980_v19 = vpop.eup %3979 }
0x15c4   :  { %v2231_v7 = vadd.f32 1.0, %v3980_v19 }
0x15c6   :  { %3981 = vrcp.f32 %v2231_v7 }
0x15d0   :  { %v3982_v20 = vpop.eup %3981 }
0x15d1   :  { %v2245_v32 = vsub.f32 1.0, %v3982_v20  ;;  %v2251_v34 = vmul.f32 %v3982_v20, %v4633_v28 }
0x15fc   :  { %v2236_v23 = vpop.permute.xlu0 %2235 }
0x15fd   :  { %v2238_v63 = vmul.f32 %v3982_v20, %v2236_v23 }
0x15ff   :  { %2240 = vrot.lane.b32.xlu1 %v2238_v63, %s4110_s25 }
0x1671   :  { %v2241_v24 = vpop.permute.xlu1 %2240 }
0x1672   :  { %v2243_v59 = vadd.f32 %v2241_v24, %v2154_v14 }
0x1674   :  { %3983 = vtanh.f32 %v2243_v59 }
0x167e   :  { %v3984_v31 = vpop.eup %3983 }
0x167f   :  { %2247 = vrot.lane.b32.xlu0 %v3984_v31, %s4115_s14 }
0x16f1   :  { %v2248_v33 = vpop.permute.xlu0 %2247 }
0x16f2   :  { %v2250_v39 = vmul.f32 %v2248_v33, %v2245_v32 }
0x16f4   :  { %v4718_v42 = vadd.f32 %v2251_v34, %v2250_v39  ;;  %v3235_v39 = vld [vmem:[%s4968_s7 + $0x4] sm:$0x3] }
0x16f5   :  { %vm2590_vm9 = vcmp.gt.f32.partialorder %v3235_v39, 0.5 }
0x16f6   :  { %2254 = vrot.lane.b32.xlu1 %v4718_v42, %s4115_s14 }
0x1768   :  { %v4722_v43 = vpop.permute.xlu1 %2254 }
0x1769   :  { %3617 = vmatmul.mubr.msk.f32.vlgmr.msra.gmra.mrb[26].mxu1 %vm245_vm1, %v4722_v43 }
0x176a   :  { %3833 = vmatpush3.bf16.msra.mxu1 %v4565_v62  ;;  %3627 = vmatprep.mubr.msk.f32.mxu1 %vm4112_vm4, %v4113_v27 }
0x176b   :  { %3834 = vmatprep.subr.bf16.mxu1 %v4111_v25 }
0x176e   :  { %3836 = vmatpush3.bf16.msra.mxu1 %v4569_v0 }
0x176f   :  { %3843 = vmatprep.subr.bf16.mxu1 %v4111_v25 }
0x183c   :  { %v4732_v28 = vpop.f32.mrb[26].mxu1 }
0x183d   :  { %v3618_v53 = vpop.f32.mrb[27].mxu1  ;;  %v2328_v55 = vsel %vm1259_vm7, %v4732_v28, -1e+09 }
0x183e   :  { %v2329_v45 = vsel %vm1261_vm8, %v2328_v55, -inf  ;;  %v3234_v53 = vld [vmem:[%s4969_s11 + $0x4] sm:$0x3] }
0x183f   :  { %2330 = vmax.xlane.f32.xlu0 %v2329_v45  ;;  %vm2587_vm11 = vcmp.gt.f32.partialorder %v3234_v53, 0.5 }
0x1840   :  { %v2597_v45 = vsel %vm2587_vm11, 1, %v4108_v26 }
0x18cc   :  { %v2331_v47 = vpop.xlane.xlu0 %2330 }
0x18cd   :  { %v2332_v29 = vsub.f32 %v2328_v55, %v2331_v47  ;;  %v2591_v55 = vsel %vm2590_vm9, 1, %v4108_v26 }
0x18cf   :  { %v2333_v50 = vmul.f32 1.442695, %v2332_v29 }
0x18d1   :  { %3985 = vpow2.f32 %v2333_v50 }
0x18db   :  { %v3986_v36 = vpop.eup %3985 }
0x18dc   :  { %v2335_v52 = vmul.f32 %v3986_v36, %v4509_v6 }
0x18de   :  { %v2336_v54 = vsel %vm1261_vm8, %v2335_v52, 0.0 }
0x18df   :  { %2337 = vadd.xlane.f32.xlu1 %v2336_v54 }
0x18f0   :  { %2430 = vrot.lane.b32.xlu1 %v4732_v28, %s4114_s8 }
0x18f4   :  { %2435 = vrot.lane.b32.xlu1 %v2154_v14, %s4115_s14 }
0x196c   :  { %v2338_v57 = vpop.xlane.xlu1 %2337 }
0x196d   :  { %v2339_v58 = vadd.f32 1e-09, %v2338_v57 }
0x196f   :  { %3987 = vrcp.f32 %v2339_v58 }
0x1970   :  { %v2431_v20 = vpop.permute.xlu1 %2430 }
0x1974   :  { %v2436_v59 = vpop.permute.xlu1 %2435 }
0x1979   :  { %v3988_v8 = vpop.eup %3987 }
0x197a   :  { %v4744_v10 = vmul.f32 %v3988_v8, %v2335_v52  ;;  %v3233_v8 = vld [vmem:[%s4970_s15 + $0x4] sm:$0x3] }
0x197c   :  { %v2344_v11 = vmul.f32 %v3229_v9, %v4744_v10 }
0x197e   :  { %v2345_v12 = vsel %vm1261_vm8, %v2344_v11, 0.0 }
0x197f   :  { %2346 = vadd.xlane.f32.xlu0 %v2345_v12 }
0x1a0c   :  { %v2347_v13 = vpop.xlane.xlu0 %2346 }
0x1a0d   :  { %v2348_v16 = vadd.f32 1e-09, %v2347_v13 }
0x1a0f   :  { %3989 = vrcp.f32 %v2348_v16 }
0x1a19   :  { %v3990_v18 = vpop.eup %3989 }
0x1a1a   :  { %v2350_v19 = vmul.f32 %v3990_v18, %v2344_v11 }
0x1a1c   :  { %v2352_v7 = vrot.slane %v2350_v19, 6 }
0x1a1e   :  { %v2354_v14 = vsel %vm1286_vm10, %v4744_v10, %v2352_v7 }
0x1a1f   :  { %3230 = vmatmul.mubr.msk.f32.vlgmr.msra.gmra.mrb[20].mxu0 %vm131_vm0, %v2354_v14 }
0x1a20   :  { %3839 = vmatpush3.bf16.msra.mxu0 %v4410_v48  ;;  %3638 = vmatprep.mubr.msk.f32.mxu0 %vm4112_vm4, %v4113_v27 }
0x1a21   :  { %3840 = vmatprep.subr.bf16.mxu0 %v4111_v25 }
0x1a24   :  { %3842 = vmatpush3.bf16.msra.mxu0 %v4448_v5 }
0x1a25   :  { %3849 = vmatprep.subr.bf16.mxu0 %v4111_v25 }
0x1af2   :  { %v2424_v23 = vpop.f32.mrb[20].mxu0 }
0x1af3   :  { %v2433_v63 = vadd.f32 %v2431_v20, %v2424_v23  ;;  %2447 = vrot.lane.b32.xlu0 %v2424_v23, %s4117_s10  ;;  %v2426_v24 = vpop.f32.mrb[21].mxu0  ;;  %v2579_v54 = vrot.slane %v2424_v23, 2 }
0x1af5   :  { %v2438_v31 = vadd.f32 %v2436_v59, %v2433_v63 }
0x1af7   :  { %v2439_v48 = vadd.f32 %v2438_v31, %v4579_v15 }
0x1af9   :  { %v3231_v32 = vmul.f32 -1.442695, %v2439_v48 }
0x1afb   :  { %3991 = vpow2.f32 %v3231_v32 }
0x1b05   :  { %v3992_v33 = vpop.eup %3991 }
0x1b06   :  { %v2443_v34 = vadd.f32 1.0, %v3992_v33 }
0x1b08   :  { %3993 = vrcp.f32 %v2443_v34 }
0x1b12   :  { %v3994_v5 = vpop.eup %3993 }
0x1b13   :  { %2542 = vperm.xlu1 %3939, %v3994_v5   ;;  %v2546_v52 = vsub.f32 1.0, %v3994_v5 }
0x1b17   :  { %3941 = vset.pattern.permute.xlu1 %v4108_v26 }
0x1b18   :  { %2593 = vperm.xlu1 %3941, %v2591_v55  }
0x1b1c   :  { %2599 = vperm.xlu1 %3941, %v2597_v45  }
0x1b20   :  { %3942 = vset.pattern.permute.xlu1 %v4118_v56 }
0x1b65   :  { %v2448_v47 = vpop.permute.xlu0 %2447 }
0x1b66   :  { %v2450_v29 = vadd.f32 %v2448_v47, %v4732_v28 }
0x1b68   :  { %v2451_v50 = vadd.f32 %v2450_v29, %v4574_v1 }
0x1b6a   :  { %3995 = vtanh.f32 %v2451_v50 }
0x1b74   :  { %v3996_v36 = vpop.eup %3995 }
0x1b75   :  { %2454 = vrot.lane.b32.xlu0 %v3996_v36, %s4117_s10 }
0x1b79   :  { %2549 = vperm.xlu0 %3940, %v2546_v52  }
0x1b7d   :  { %2580 = vrot.lane.b32.xlu0 %v2579_v54, %s4119_s16 }
0x1b92   :  { %v4780_v26 = vpop.permute.xlu1 %2542 }
0x1be7   :  { %v2455_v57 = vpop.permute.xlu0 %2454 }
0x1be8   :  { %3628 = vmatmul.mubr.msk.f32.vlgmr.msra.gmra.mrb[28].mxu1 %vm245_vm1, %v2455_v57 }
0x1be9   :  { %3845 = vmatpush3.bf16.msra.mxu1 %v4431_v61  ;;  %3649 = vmatprep.mubr.msk.f32.mxu1 %vm4112_vm4, %v4113_v27  ;;  %v2594_v61 = vpop.permute.xlu1 %2593 }
0x1bea   :  { %3846 = vmatprep.subr.bf16.mxu1 %v4111_v25  ;;  %vm2595_vm12 = vcmp.eq.s32.totalorder %v2594_v61, 1 }
0x1bed   :  { %3848 = vmatpush3.bf16.msra.mxu1 %v4445_v3  ;;  %v2600_v9 = vpop.permute.xlu1 %2599 }
0x1bee   :  { %3856 = vmatprep.subr.bf16.mxu1 %v4531_v38  ;;  %v2578_v38 = vmul.f32 %v3233_v8, %v4780_v26  ;;  %vm2601_vm13 = vcmp.eq.s32.totalorder %v2600_v9, 1 }
0x1bf0   :  { %3650 = vmatmul.mubr.msk.f32.vlgmr.msra.gmra.mrb[30].mxu1 %vm245_vm1, %v4722_v43 }
0x1bf1   :  { %3858 = vmatpush1.bf16.msra.mxu1 %v4542_v46  ;;  %2944 = vmatprep.mubr.f32.mxu1 %v4113_v27  ;;  %v3236_v46 = vld [vmem:[%s4133_s5 + $0x6] sm:$0x3]  ;;  %s4120_s5 = smov 31  }
0x1bf8   :  { %v2550_v56 = vpop.permute.xlu0 %2549 }
0x1bf9   :  { %v4782_v28 = vmul.f32 %v2550_v56, %v2424_v23  ;;  %v4784_v58 = vmul.f32 %v2550_v56, %v2426_v24 }
0x1bfc   :  { %v2581_v3 = vpop.permute.xlu0 %2580 }
0x1bfd   :  { %v2583_v11 = vmul.f32 %v2581_v3, %v2550_v56 }
0x1bff   :  { %v2584_v43 = vadd.f32 %v2583_v11, %v2578_v38 }
0x1c01   :  { %v2596_v12 = vsel %vm2595_vm12, %v2581_v3, %v2584_v43 }
0x1c02   :  { %v2602_v13 = vsel %vm2601_vm13, %v3233_v8, %v2596_v12  ;;  %v3241_v8 = vld [vmem:[%s4965_s6 + $0x6] sm:$0x3] }
0x1c03   :  { %v2605_v16 = vadd.f32 %v3236_v46, %v2602_v13 }
0x1c05   :  { %3639 = vmatmul.mubr.msk.f32.vlgmr.msra.gmra.mrb[22].mxu0 %vm245_vm1, %v2605_v16 }
0x1c06   :  { %3851 = vmatpush3.bf16.msra.mxu0 %v4492_v2  ;;  %3660 = vmatprep.mubr.msk.f32.mxu0 %vm4112_vm4, %v4113_v27 }
0x1c07   :  { %3852 = vmatprep.subr.bf16.mxu0 %v4111_v25 }
0x1c0a   :  { %3854 = vmatpush3.bf16.msra.mxu0 %v4482_v49 }
0x1c0b   :  { %3859 = vmatprep.subr.bf16.mxu0 %v4111_v25 }
0x1cbb   :  { %v4796_v18 = vpop.f32.mrb[28].mxu1 }
0x1cbc   :  { %v3629_v19 = vpop.f32.mrb[29].mxu1 }
0x1cc3   :  { %v2745_v7 = vpop.f32.mrb[30].mxu1 }
0x1cc4   :  { %v2746_v14 = vadd.f32 %v4461_v17, %v2745_v7  ;;  %v3651_v20 = vpop.f32.mrb[31].mxu1  ;;  %v3210_v7 = vld [vmem:[%s4261_s19] ss:$0 sm:$0xff]  ;;  %s4121_s19 = smov 120  }
0x1cc6   :  { %2757 = vrot.lane.b32.xlu1 %v2746_v14, %s4110_s25 }
0x1cd8   :  { %v2675_v23 = vpop.f32.mrb[22].mxu0 }
0x1cd9   :  { %v3640_v2 = vpop.f32.mrb[23].mxu0  ;;  %v2676_v63 = vadd.f32 %v4466_v21, %v2675_v23 }
0x1cdb   :  { %v2749_v24 = vadd.f32 %v2746_v14, %v2676_v63  ;;  %v2003_v14 = vadd.f32 %v3210_v7, %v4710_v60 }
0x1cdd   :  { %v3239_v59 = vmul.f32 -1.442695, %v2749_v24  ;;  %v2006_v20 = vsel %vm651_vm6, %v2003_v14, -inf }
0x1cdf   :  { %3997 = vpow2.f32 %v3239_v59 }
0x1ce9   :  { %v3998_v31 = vpop.eup %3997 }
0x1cea   :  { %v2753_v49 = vadd.f32 1.0, %v3998_v31  ;;  %v1480_v31 = vadd.f32 %v3210_v7, %v4621_v35 }
0x1cec   :  { %3999 = vrcp.f32 %v2753_v49  ;;  %v4840_v49 = vadd.f32 %v3210_v7, %v4796_v18 }
0x1cee   :  { %v2528_v60 = vsel %vm651_vm6, %v4840_v49, -inf }
0x1cf6   :  { %v4000_v48 = vpop.eup %3999 }
0x1cf7   :  { %v2767_v5 = vsub.f32 1.0, %v4000_v48  ;;  %v2773_v21 = vmul.f32 %v4000_v48, %v4718_v42 }
0x1d38   :  { %v2758_v32 = vpop.permute.xlu1 %2757 }
0x1d39   :  { %v2760_v33 = vmul.f32 %v4000_v48, %v2758_v32 }
0x1d3b   :  { %2762 = vrot.lane.b32.xlu0 %v2760_v33, %s4110_s25 }
0x1dad   :  { %v2763_v34 = vpop.permute.xlu0 %2762 }
0x1dae   :  { %v2765_v17 = vadd.f32 %v2763_v34, %v2676_v63 }
0x1db0   :  { %4001 = vtanh.f32 %v2765_v17 }
0x1dba   :  { %v4002_v39 = vpop.eup %4001 }
0x1dbb   :  { %2769 = vrot.lane.b32.xlu1 %v4002_v39, %s4115_s14 }
0x1e2d   :  { %v2770_v53 = vpop.permute.xlu1 %2769 }
0x1e2e   :  { %v2772_v55 = vmul.f32 %v2770_v53, %v2767_v5 }
0x1e30   :  { %v2774_v45 = vadd.f32 %v2773_v21, %v2772_v55 }
0x1e32   :  { %2776 = vrot.lane.b32.xlu0 %v2774_v45, %s4115_s14 }
0x1ea4   :  { %v2777_v47 = vpop.permute.xlu0 %2776 }
0x1ea5   :  { %3661 = vmatmul.mubr.msk.f32.vlgmr.msra.gmra.mrb[24].mxu0 %vm245_vm1, %v2777_v47  ;;  %3099 = vst.msk [vmem:[#allocation3] sm:$0x3] %vm651_vm6, %v2777_v47 }
0x1ea6   :  { %3861 = vmatpush3.bf16.msra.mxu0 %v4565_v62  ;;  %3671 = vmatprep.mubr.msk.f32.mxu0 %vm4112_vm4, %v4113_v27  ;;  %vm1515_vm4 = vcmask 252928  }
0x1ea7   :  { %3862 = vmatprep.subr.bf16.mxu0 %v4111_v25 }
0x1eaa   :  { %3864 = vmatpush3.bf16.msra.mxu0 %v4569_v0 }
0x1f78   :  { %v2846_v29 = vpop.f32.mrb[24].mxu0 }
0x1f79   :  { %v3662_v42 = vpop.f32.mrb[25].mxu0  ;;  %v2850_v50 = vsel %vm1259_vm7, %v2846_v29, -1e+09  ;;  %vm1529_vm7 = vcmask 326656  }
0x1f7a   :  { %v2851_v36 = vsel %vm1261_vm8, %v2850_v50, -inf }
0x1f7b   :  { %2852 = vmax.xlane.f32.xlu1 %v2851_v36 }
0x2008   :  { %v2853_v52 = vpop.xlane.xlu1 %2852 }
0x2009   :  { %v2854_v54 = vsub.f32 %v2850_v50, %v2853_v52 }
0x200b   :  { %v2855_v57 = vmul.f32 1.442695, %v2854_v54 }
0x200d   :  { %4003 = vpow2.f32 %v2855_v57 }
0x2017   :  { %v4004_v62 = vpop.eup %4003 }
0x2018   :  { %v2857_v27 = vmul.f32 %v4004_v62, %v4509_v6 }
0x201a   :  { %v2858_v25 = vsel %vm1261_vm8, %v2857_v27, 0.0 }
0x201b   :  { %2859 = vadd.xlane.f32.xlu0 %v2858_v25 }
0x20a8   :  { %v2860_v0 = vpop.xlane.xlu0 %2859 }
0x20a9   :  { %v2861_v61 = vadd.f32 1e-09, %v2860_v0 }
0x20ab   :  { %4005 = vrcp.f32 %v2861_v61 }
0x20b5   :  { %v4006_v56 = vpop.eup %4005 }
0x20b6   :  { %v4818_v3 = vmul.f32 %v4006_v56, %v2857_v27 }
0x20b8   :  { %v2866_v9 = vmul.f32 %v3241_v8, %v4818_v3 }
0x20ba   :  { %v2867_v38 = vsel %vm1261_vm8, %v2866_v9, 0.0  ;;  %vm1531_vm8 = vcmask 392192  }
0x20bb   :  { %2868 = vadd.xlane.f32.xlu0 %v2867_v38 }
0x2148   :  { %v2869_v11 = vpop.xlane.xlu0 %2868 }
0x2149   :  { %v2870_v43 = vadd.f32 1e-09, %v2869_v11 }
0x214b   :  { %4007 = vrcp.f32 %v2870_v43 }
0x2155   :  { %v4008_v6 = vpop.eup %4007 }
0x2156   :  { %v2872_v46 = vmul.f32 %v4008_v6, %v2866_v9 }
0x2158   :  { %v2874_v12 = vrot.slane %v2872_v46, 6 }
0x215a   :  { %v2876_v13 = vsel %vm1286_vm10, %v4818_v3, %v2874_v12 }
0x215b   :  { %3242 = vmatmul.mubr.msk.f32.vlgmr.msra.gmra.mrb[32].mxu1 %vm131_vm0, %v2876_v13  ;;  %vm1523_vm0 = vcmask 1040384  }
0x222e   :  { %v4825_v16 = vpop.f32.mrb[32].mxu1 }
0x222f   :  { %2969 = vrot.lane.b32.xlu1 %v4825_v16, %s4117_s10  ;;  %v4829_v19 = vpop.f32.mrb[33].mxu1 }
0x2233   :  { %2952 = vrot.lane.b32.xlu1 %v2846_v29, %s4114_s8 }
0x2237   :  { %2957 = vrot.lane.b32.xlu1 %v2676_v63, %s4115_s14  ;;  %v1483_v63 = vsel %vm651_vm6, %v1480_v31, -inf }
0x225b   :  { %2007 = vmax.xlane.f32.xlu1 %v2006_v20 }
0x22a1   :  { %v2970_v23 = vpop.permute.xlu1 %2969 }
0x22a2   :  { %v2972_v2 = vadd.f32 %v2970_v23, %v2846_v29 }
0x22a4   :  { %v2973_v24 = vadd.f32 %v2972_v2, %v4574_v1 }
0x22a5   :  { %v2953_v18 = vpop.permute.xlu1 %2952 }
0x22a6   :  { %4009 = vtanh.f32 %v2973_v24  ;;  %v2955_v53 = vadd.f32 %v2953_v18, %v4825_v16 }
0x22a9   :  { %v2958_v17 = vpop.permute.xlu1 %2957 }
0x22aa   :  { %v2960_v21 = vadd.f32 %v2958_v17, %v2955_v53 }
0x22ac   :  { %v2961_v45 = vadd.f32 %v2960_v21, %v4579_v15 }
0x22ae   :  { %v3243_v47 = vmul.f32 -1.442695, %v2961_v45 }
0x22b0   :  { %v4010_v59 = vpop.eup %4009 }
0x22b1   :  { %2976 = vrot.lane.b32.xlu0 %v4010_v59, %s4117_s10 }
0x22d0   :  { %1484 = vmax.xlane.f32.xlu0 %v1483_v63 }
0x22d4   :  { %2529 = vmax.xlane.f32.xlu0 %v2528_v60 }
0x22e8   :  { %v2008_v39 = vpop.xlane.xlu1 %2007 }
0x22e9   :  { %v2009_v5 = vsub.f32 %v2003_v14, %v2008_v39 }
0x22eb   :  { %v2010_v55 = vmul.f32 1.442695, %v2009_v5 }
0x2323   :  { %v2977_v48 = vpop.permute.xlu0 %2976 }
0x2324   :  { %3672 = vmatmul.mubr.msk.f32.vlgmr.msra.gmra.mrb[26].mxu0 %vm245_vm1, %v2977_v48 }
0x235d   :  { %v1485_v1 = vpop.xlane.xlu0 %1484 }
0x235e   :  { %v1486_v32 = vsub.f32 %v1480_v31, %v1485_v1 }
0x2360   :  { %v1487_v33 = vmul.f32 1.442695, %v1486_v32 }
0x2362   :  { %4011 = vpow2.f32 %v1487_v33 }
0x2363   :  { %4013 = vpow2.f32 %v2010_v55 }
0x2364   :  { %4015 = vpow2.f32 %v3243_v47 }
0x236c   :  { %v4012_v34 = vpop.eup %4011 }
0x236d   :  { %v1489_v35 = vsel %vm651_vm6, %v4012_v34, 0.0  ;;  %v4853_v29 = vpop.eup %4013 }
0x236e   :  { %1490 = vadd.xlane.f32.xlu1 %v1489_v35  ;;  %v4016_v42 = vpop.eup %4015 }
0x236f   :  { %v2965_v50 = vadd.f32 1.0, %v4016_v42 }
0x2371   :  { %4017 = vrcp.f32 %v2965_v50 }
0x237b   :  { %v4018_v36 = vpop.eup %4017 }
0x237f   :  { %1513 = vrot.lane.b32.xlu1 %v4609_v41, %s4120_s5  ;;  %v2012_v41 = vsel %vm651_vm6, %v4853_v29, 0.0 }
0x2383   :  { %1520 = vrot.lane.b32.xlu1 %v4523_v30, %s4121_s19 }
0x23a7   :  { %2013 = vadd.xlane.f32.xlu1 %v2012_v41 }
0x23b8   :  { %2556 = vrot.lane.b32.xlu1 %v4782_v28, %s4120_s5 }
0x23bc   :  { %3064 = vperm.xlu1 %3942, %v4018_v36  }
0x23c0   :  { %2558 = vrot.lane.b32.xlu1 %v4784_v58, %s4120_s5  ;;  %v3068_v58 = vsub.f32 1.0, %v4018_v36 }
0x23f7   :  { %v3046_v15 = vpop.f32.mrb[26].mxu0 }
0x23f8   :  { %v3047_v52 = vadd.f32 %v3210_v7, %v3046_v15  ;;  %v3673_v54 = vpop.f32.mrb[27].mxu0 }
0x23fa   :  { %v3050_v57 = vsel %vm651_vm6, %v3047_v52, -inf }
0x23fb   :  { %3051 = vmax.xlane.f32.xlu0 %v3050_v57  ;;  %v1491_v62 = vpop.xlane.xlu1 %1490 }
0x23fc   :  { %4019 = vrcp.f32 %v1491_v62 }
0x23ff   :  { %v1514_v27 = vpop.permute.xlu1 %1513 }
0x2403   :  { %v1521_v25 = vpop.permute.xlu1 %1520 }
0x2404   :  { %v1524_v28 = vsel %vm1523_vm0, %v4523_v30, %v1521_v25 }
0x2406   :  { %v4020_v30 = vpop.eup %4019 }
0x2407   :  { %v1493_v0 = vmul.f32 %v4020_v30, %v4012_v34 }
0x2409   :  { %v1494_v56 = vsel %vm245_vm1, %v1493_v0, 0.0 }
0x240a   :  { %v1500_v9 = vmul.f32 %v4603_v37, %v1494_v56 }
0x2411   :  { %1511 = vrot.lane.b32.xlu0 %v4606_v40, %s4120_s5  ;;  %v2530_v40 = vpop.xlane.xlu0 %2529 }
0x2412   :  { %v2531_v14 = vsub.f32 %v4840_v49, %v2530_v40 }
0x2414   :  { %v2532_v20 = vmul.f32 1.442695, %v2531_v14 }
0x2415   :  { %1526 = vrot.lane.b32.xlu0 %v1524_v28, %s4122_s18 }
0x2416   :  { %4021 = vpow2.f32 %v2532_v20 }
0x2419   :  { %3071 = vperm.xlu0 %3940, %v3068_v58  }
0x241d   :  { %2042 = vrot.lane.b32.xlu0 %v4653_v22, %s4121_s19 }
0x2420   :  { %v4893_v2 = vpop.eup %4021 }
0x2421   :  { %2564 = vrot.lane.b32.xlu0 %v4744_v10, %s4121_s19 }
0x2425   :  { %3086 = vrot.lane.b32.xlu0 %v4818_v3, %s4121_s19 }
0x2429   :  { %2034 = vrot.lane.b32.xlu0 %v4694_v44, %s4120_s5 }
0x242d   :  { %2036 = vrot.lane.b32.xlu0 %v4696_v4, %s4120_s5 }
0x2488   :  { %v3052_v61 = vpop.xlane.xlu0 %3051 }
0x2489   :  { %v3053_v23 = vsub.f32 %v3047_v52, %v3052_v61 }
0x248c   :  { %v1512_v8 = vpop.permute.xlu0 %1511 }
0x248d   :  { %v1516_v38 = vsel %vm1515_vm4, %v1512_v8, %v1514_v27 }
0x248e   :  { %v1518_v11 = vadd.f32 %v1516_v38, %v1500_v9 }
0x2490   :  { %v1527_v44 = vpop.permute.xlu0 %1526 }
0x2491   :  { %v1530_v4 = vsel %vm1529_vm7, %v1518_v11, %v1527_v44 }
0x2492   :  { %v1532_v43 = vsel %vm1531_vm8, %v1530_v4, 0.0 }
0x2493   :  { %1533 = vst [vmem:[%s4266_s12] sm:$0x1] %v1532_v43  ;;  %1534 = vst [vmem:[%s4266_s12 + $0x3] sm:$0x2] %v1532_v43 }
0x2498   :  { %v3072_v6 = vpop.permute.xlu0 %3071 }
0x2499   :  { %v3075_v46 = vmul.f32 %v3072_v6, %v4829_v19  ;;  %v3054_v19 = vmul.f32 1.442695, %v3053_v23  ;;  %v3074_v59 = vmul.f32 %v3072_v6, %v4825_v16 }
0x249b   :  { %3080 = vrot.lane.b32.xlu1 %v3075_v46, %s4120_s5  ;;  %4023 = vpow2.f32 %v3054_v19 }
0x249c   :  { %v2043_v12 = vpop.permute.xlu0 %2042 }
0x249d   :  { %v2045_v37 = vsel %vm1523_vm0, %v4653_v22, %v2043_v12  ;;  %v2534_v22 = vsel %vm651_vm6, %v4893_v2, 0.0 }
0x249e   :  { %2047 = vrot.lane.b32.xlu0 %v2045_v37, %s4122_s18 }
0x24a0   :  { %v2565_v13 = vpop.permute.xlu0 %2564 }
0x24a1   :  { %v2567_v7 = vsel %vm1523_vm0, %v4744_v10, %v2565_v13 }
0x24a2   :  { %2569 = vrot.lane.b32.xlu1 %v2567_v7, %s4122_s18 }
0x24a4   :  { %v3087_v31 = vpop.permute.xlu0 %3086 }
0x24a5   :  { %v4897_v24 = vpop.eup %4023  ;;  %v3089_v49 = vsel %vm1523_vm0, %v4818_v3, %v3087_v31 }
0x24a6   :  { %v3056_v10 = vsel %vm651_vm6, %v4897_v24, 0.0 }
0x24bd   :  { %2535 = vadd.xlane.f32.xlu0 %v2534_v22 }
0x24c6   :  { %3057 = vadd.xlane.f32.xlu1 %v3056_v10 }
0x24d3   :  { %3078 = vrot.lane.b32.xlu0 %v3074_v59, %s4120_s5 }
0x24d7   :  { %3091 = vrot.lane.b32.xlu1 %v3089_v49, %s4122_s18 }
0x24d8   :  { %4042 = shalt.err (!%p4039_p4)
}
0x24d9   :  { %s4043_s2 = scalar_lea.hbm %s4271_s9, 32 }
0x24da   :  { %p4044_p5 = scmp.ne.s32.totalorder %s4271_s9, %s4043_s2  ;;  %p4047_p6 = scmp.lt.u32.totalorder %s4043_s2, %s4271_s9 }
0x24dc   :  { %p4049_p7 = pnand %p4047_p6, %p4044_p5 }
0x24de   :  { %4052 = shalt.err (!%p4049_p7)
}
0x24df   :  { %3111 = dma.vmem_to_hbm [thread:$0]  %s3109_s22, 32, %s4271_s9, [#allocation4]  }
0x24e0   :  { %s4053_s0 = scalar_lea.vmem %s3119_s1, 32  ;;  %p4058_p9 = scmp.lt.s32.totalorder %s3119_s1, %s3119_s1 }
0x24e1   :  { %p4054_p8 = scmp.ne.s32.totalorder %s3119_s1, %s4053_s0  ;;  %p4059_p10 = scmp.lt.s32.totalorder %s4053_s0, %s4053_s0 }
0x24e3   :  { %p4060_p11 = por %p4059_p10, %p4058_p9 }
0x24e5   :  { %p4061_p12 = pnand %p4060_p11, %p4054_p8 }
0x24e7   :  { %4064 = shalt.err (!%p4061_p12)
}
0x24e8   :  { %s4065_s25 = scalar_lea.hbm %s4276_s21, 32 }
0x24e9   :  { %p4066_p13 = scmp.ne.s32.totalorder %s4276_s21, %s4065_s25  ;;  %p4069_p0 = scmp.lt.u32.totalorder %s4065_s25, %s4276_s21 }
0x24eb   :  { %p4071_p1 = pnand %p4069_p0, %p4066_p13 }
0x24ed   :  { %4074 = shalt.err (!%p4071_p1)
}
0x24ee   :  { %3121 = dma.vmem_to_hbm [thread:$0]  %s3119_s1, 32, %s4276_s21, [#allocation6]   ;;  %v2014_v3 = vpop.xlane.xlu1 %2013  ;;  %v2035_v63 = vpop.permute.xlu0 %2034 }
0x24ef   :  { %4025 = vrcp.f32 %v2014_v3 }
0x24f2   :  { %v2037_v48 = vpop.permute.xlu0 %2036  ;;  %v2557_v39 = vpop.permute.xlu1 %2556 }
0x24f3   :  { %v2038_v32 = vsel %vm1515_vm4, %v2035_v63, %v2037_v48 }
0x24f6   :  { %v3065_v5 = vpop.permute.xlu1 %3064 }
0x24f9   :  { %v4026_v16 = vpop.eup %4025 }
0x24fa   :  { %v2016_v60 = vmul.f32 %v4026_v16, %v4853_v29  ;;  %v2559_v53 = vpop.permute.xlu1 %2558 }
0x24fb   :  { %v2560_v50 = vsel %vm1515_vm4, %v2557_v39, %v2559_v53 }
0x24fc   :  { %v2017_v1 = vsel %vm245_vm1, %v2016_v60, 0.0 }
0x24fd   :  { %v2023_v33 = vmul.f32 %v4698_v51, %v2017_v1 }
0x24ff   :  { %v2040_v34 = vadd.f32 %v2038_v32, %v2023_v33 }
0x250d   :  { %v3081_v55 = vpop.permute.xlu1 %3080 }
0x2510   :  { %v2048_v35 = vpop.permute.xlu0 %2047 }
0x2511   :  { %v2050_v18 = vsel %vm1529_vm7, %v2040_v34, %v2048_v35 }
0x2512   :  { %v2051_v17 = vsel %vm1531_vm8, %v2050_v18, 0.0 }
0x2513   :  { %2052 = vst [vmem:[%s4266_s12 + $0x1] sm:$0x1] %v2051_v17  ;;  %2053 = vst [vmem:[%s4266_s12 + $0x4] sm:$0x2] %v2051_v17 }
0x2514   :  { %v2570_v45 = vpop.permute.xlu1 %2569 }
0x254a   :  { %v2536_v21 = vpop.xlane.xlu0 %2535 }
0x254b   :  { %4027 = vrcp.f32 %v2536_v21 }
0x254e   :  { %v3079_v62 = vpop.permute.xlu0 %3078 }
0x2553   :  { %v3058_v47 = vpop.xlane.xlu1 %3057 }
0x2554   :  { %4029 = vrcp.f32 %v3058_v47 }
0x2555   :  { %v4028_v51 = vpop.eup %4027 }
0x2556   :  { %v2538_v29 = vmul.f32 %v4028_v51, %v4893_v2 }
0x2557   :  { %v3092_v58 = vpop.permute.xlu1 %3091 }
0x2558   :  { %v2539_v41 = vsel %vm245_vm1, %v2538_v29, 0.0 }
0x2559   :  { %v2545_v42 = vmul.f32 %v4780_v26, %v2539_v41  ;;  %v3082_v26 = vsel %vm1515_vm4, %v3079_v62, %v3081_v55 }
0x255b   :  { %v2562_v36 = vadd.f32 %v2560_v50, %v2545_v42 }
0x255d   :  { %v2572_v15 = vsel %vm1529_vm7, %v2562_v36, %v2570_v45 }
0x255e   :  { %v4030_v52 = vpop.eup %4029  ;;  %v2573_v54 = vsel %vm1531_vm8, %v2572_v15, 0.0 }
0x255f   :  { %2574 = vst [vmem:[%s4266_s12 + $0x2] sm:$0x1] %v2573_v54  ;;  %2575 = vst [vmem:[%s4266_s12 + $0x5] sm:$0x2] %v2573_v54  ;;  %v3060_v57 = vmul.f32 %v4030_v52, %v4897_v24 }
0x2561   :  { %v3061_v27 = vsel %vm245_vm1, %v3060_v57, 0.0 }
0x2562   :  { %v3067_v25 = vmul.f32 %v3065_v5, %v3061_v27 }
0x2564   :  { %v3084_v28 = vadd.f32 %v3082_v26, %v3067_v25 }
0x2566   :  { %v3094_v30 = vsel %vm1529_vm7, %v3084_v28, %v3092_v58 }
0x2567   :  { %v3095_v40 = vsel %vm1531_vm8, %v3094_v30, 0.0 }
0x2568   :  { %3096 = vst [vmem:[%s4266_s12 + $0x3] sm:$0x1] %v3095_v40  ;;  %3097 = vst [vmem:[%s4266_s12 + $0x6] sm:$0x2] %v3095_v40 }
0x2569   :  { %4075 = dma.done.wait [#allocation4], 32  }
0x256a   :  { %4076 = vsyncadd [#allocation4], 4294967264 }
0x256b   :  { %4077 = dma.done.wait [#allocation6], 32  }
0x256c   :  { %4078 = vsyncadd [#allocation6], 4294967264 }
0x256d   :  { %3130 = vsyncpa [#allocation4], 1 }
0x256e   :  { %3131 = vsyncpa [#allocation6], 1 }

</bundles_post_ra>
